<compile_context>
chip_gen: v6e
topology: v6e:2x2x1
jax: 0.10.0
libtpu: 0.0.40
codegen_flags: <defaults>
</compile_context>

<pallas_src>
import jax
import jax.numpy as jnp
import numpy as np
from jax.experimental import pallas as pl
from jax.experimental.pallas import tpu as pltpu


# ----------------------------- Pallas kernel -------------------------------
def _make_vae_kernel(hw_in, chans, bblk):
    """Fused 3x(conv k=4 s=2 p=1 + ReLU) kernel for a static geometry.

    All activations live in VMEM.  Every layer's padded input is held as two
    row-parity de-interleaved bf16 buffers of shape ((H_in/2+1)*B, (W_in+2)*C)
    with flat row index  half_row*B + image,  so that for each of the 4 kernel
    rows the GEMM lhs is a single contiguous slice (no strided loads, no
    reshapes), and the GEMM M dimension is B * H_out.
    """
    h0, w0 = hw_in
    dims = [(h0, w0), (h0 // 2, w0 // 2), (h0 // 4, w0 // 4)]  # per-layer H,W in

    def kernel(x_ref, w1_ref, b1_ref, w2_ref, b2_ref, w3_ref, b3_ref,
               o_ref, p1e, p1o, p2e, p2o, p3e, p3o):
        bufs = ((p1e, p1o), (p2e, p2o), (p3e, p3o))
        wrefs = (w1_ref, w2_ref, w3_ref)     # banded bf16 weights (4, Wp*Cin, Wn*Cout)
        brefs = (b1_ref, b2_ref, b3_ref)     # lane-tiled f32 biases (1, Wn*Cout)

        # ---- zero ONLY the conv-padding borders (interiors are fully
        #      overwritten below; per-step zeroing is megacore-safe). --------
        for l in range(3):
            h_in, w_in = dims[l]
            c = chans[l]
            wp = w_in + 2
            rhalf = h_in // 2 + 1                         # half-rows per buffer
            pe, po = bufs[l]
            zrow = jnp.zeros((bblk, wp * c), jnp.bfloat16)
            pe[pl.ds(0, bblk), :] = zrow                              # padded row 0
            po[pl.ds((rhalf - 1) * bblk, bblk), :] = zrow             # padded row Hp-1
            zcol = jnp.zeros((rhalf * bblk, c), jnp.bfloat16)
            for pref in (pe, po):
                pref[:, pl.ds(0, c)] = zcol                           # left pad cols
                pref[:, pl.ds((wp - 1) * c, c)] = zcol                # right pad cols

        # ---- layer-1 input: two contiguous stores into the padded interiors.
        #      x_ref[0] = even image rows -> odd padded rows (rr = d/2);
        #      x_ref[1] = odd  image rows -> even padded rows (rr = (d+1)/2).
        cin = chans[0]
        m0 = (h0 // 2) * bblk
        p1o[pl.ds(0, m0), pl.ds(cin, w0 * cin)] = x_ref[0].astype(jnp.bfloat16)
        p1e[pl.ds(bblk, m0), pl.ds(cin, w0 * cin)] = x_ref[1].astype(jnp.bfloat16)

        # ---- three conv(k=4,s=2,p=1)+ReLU layers, each = 4 accumulating GEMMs.
        for l in range(3):
            h_in, w_in = dims[l]
            h_out, w_out = h_in // 2, w_in // 2
            cout = chans[l + 1]
            mm = h_out * bblk                     # batch folded into GEMM M
            pe, po = bufs[l]
            acc = jnp.zeros((mm, w_out * cout), jnp.float32)
            for kh in range(4):
                # padded rows 2*ho + kh for all images: one contiguous slice.
                src = (pe, po)[kh % 2]
                a = src[pl.ds((kh // 2) * bblk, mm), :]       # bf16 (mm, Wp*Cin)
                acc = acc + jnp.dot(a, wrefs[l][kh],
                                    preferred_element_type=jnp.float32)
            act = jnp.maximum(acc + brefs[l][...], 0.0)       # f32 epilogue
            if l < 2:
                # de-interleave output rows by parity into the next layer's
                # padded buffers (row ho -> padded row ho+1).
                nxt_e, nxt_o = bufs[l + 1]
                act_bf = act.astype(jnp.bfloat16)
                for ho in range(h_out):
                    blk = act_bf[ho * bblk:(ho + 1) * bblk, :]
                    if ho % 2 == 0:   # -> odd padded row  ho+1
                        nxt_o[pl.ds((ho // 2) * bblk, bblk),
                              pl.ds(cout, w_out * cout)] = blk
                    else:             # -> even padded row ho+1
                        nxt_e[pl.ds(((ho + 1) // 2) * bblk, bblk),
                              pl.ds(cout, w_out * cout)] = blk
            else:
                o_ref[...] = act                               # (h3*B, W3*64) f32

    return kernel


# ------------------------- One-time weight repacking ------------------------
def _banded_weight(w_oihw, w_in):
    """Fold the kw/cin im2col gathering of a k=4,s=2,p=1 conv into 4 banded
    GEMM matrices: (KH, Wp*Cin, Wn*Cout), Wp = w_in+2, Wn = w_in//2, bf16."""
    cout, cin, kh_sz, kw_sz = w_oihw.shape
    wp, wn = w_in + 2, w_in // 2
    wp_idx = np.arange(wp)[:, None]                      # padded col index
    wo_idx = np.arange(wn)[None, :]                      # output col index
    kw_rel = wp_idx - 2 * wo_idx                         # kernel col offset
    valid = ((kw_rel >= 0) & (kw_rel < kw_sz)).astype(np.float32)
    kw_cl = np.clip(kw_rel, 0, kw_sz - 1)
    mats = []
    for kh in range(kh_sz):
        w_kh = jnp.transpose(w_oihw[:, :, kh, :], (2, 1, 0))   # (KW, Cin, Cout)
        gath = w_kh[kw_cl] * valid[:, :, None, None]           # (Wp, Wn, Cin, Cout)
        mats.append(jnp.transpose(gath, (0, 2, 1, 3)).reshape(wp * cin, wn * cout))
    # bf16 MXU operands (f32 accumulation happens in the kernel).
    return jnp.stack(mats, axis=0).astype(jnp.bfloat16)


def prepare_params(params, w_in):
    """Repack PyTorch-layout (OIHW weight, bias) per layer into
    (banded bf16 weight, lane-tiled f32 bias).  One-time, outside hot path."""
    prepared = []
    w_cur = w_in
    for (w_oihw, b) in params:
        cout = w_oihw.shape[0]
        wn = w_cur // 2
        wb = _banded_weight(w_oihw, w_cur)                        # (4, Wp*Cin, Wn*Cout)
        bl = jnp.tile(b.astype(jnp.float32), wn).reshape(1, wn * cout)
        prepared.append((wb, bl))
        w_cur = wn
    return prepared


# ------------------------------ Forward pass --------------------------------
def _pick_batch_block(n, h_out1, target_m=256):
    """Largest divisor of n such that divisor*h_out1 <= target GEMM M (~256
    fills a v6e/v7x MXU; 128 suffices on v5e)."""
    want = max(1, target_m // max(h_out1, 1))
    best = 1
    for d in range(1, n + 1):
        if n % d == 0 and d <= want:
            best = d
    return best


def vae_encoder_forward(x_nchw, prepared, b_blk=None, single_buffer_weights=True):
    """VAEEncoder forward.  Input/output follow the PyTorch NCHW convention."""
    n, cin, h, w = x_nchw.shape
    assert h % 8 == 0 and w % 8 == 0, "three stride-2 convs need H, W % 8 == 0"
    chans = (cin, 16, 32, 64)                 # fixed by the module definition
    h3, w3o = h // 8, w // 8

    if b_blk is None:
        # Fill MXU rows: aim for M = B_BLK * (H/2) ~ 256 on layer 1.  (For v7x
        # you additionally want >= 2 grid steps so both TensorCores get work.)
        b_blk = _pick_batch_block(n, h // 2)
    assert n % b_blk == 0
    ng = n // b_blk

    # Single layout pass (no jnp.pad): NCHW -> per-group, row-parity
    # de-interleaved (G, 2, (H/2)*B, W*C), flat row = half_row*B + image,
    # channel-minor lanes.  Spatial padding is applied inside the kernel.
    xt = x_nchw.reshape(ng, b_blk, cin, h // 2, 2, w)
    xt = jnp.transpose(xt, (0, 4, 3, 1, 5, 2))
    xt = xt.reshape(ng, 2, (h // 2) * b_blk, w * cin)

    (w1, b1), (w2, b2), (w3, b3) = prepared

    def const_spec(shape):
        idx = lambda i: (0,) * len(shape)
        if single_buffer_weights:
            # Constant index map -> fetched once; no need for a double buffer.
            return pl.BlockSpec(shape, idx, pipeline_mode=pl.Buffered(1))
        return pl.BlockSpec(shape, idx)

    # Scratch: per layer, even/odd padded-row bf16 buffers ((H/2+1)*B, (W+2)*C).
    scratch = []
    hc, wc = h, w
    for l in range(3):
        shape = ((hc // 2 + 1) * b_blk, (wc + 2) * chans[l])
        scratch += [pltpu.VMEM(shape, jnp.bfloat16),
                    pltpu.VMEM(shape, jnp.bfloat16)]
        hc, wc = hc // 2, wc // 2

    # Advisory cost estimate for XLA's scheduler.
    flops = 0
    hc, wc = h, w
    for l in range(3):
        flops += 2 * n * 4 * (hc // 2) * ((wc // 2) * chans[l + 1]) * ((wc + 2) * chans[l])
        hc, wc = hc // 2, wc // 2
    bytes_accessed = (x_nchw.size * 4 + n * h3 * w3o * chans[3] * 4
                      + sum(int(a.size) * a.dtype.itemsize
                            for pair in prepared for a in pair))

    kernel = _make_vae_kernel((h, w), chans, b_blk)
    out = pl.pallas_call(
        kernel,
        out_shape=jax.ShapeDtypeStruct((ng, h3 * b_blk, w3o * chans[3]), jnp.float32),
        grid=(ng,),
        in_specs=[
            # per-group de-interleaved input slab (group dim squeezed)
            pl.BlockSpec((None, 2, (h // 2) * b_blk, w * cin),
                         lambda i: (i, 0, 0, 0)),
            # weights/biases: constant index -> fetched once, VMEM-resident
            const_spec(w1.shape), const_spec(b1.shape),
            const_spec(w2.shape), const_spec(b2.shape),
            const_spec(w3.shape), const_spec(b3.shape),
        ],
        out_specs=pl.BlockSpec((None, h3 * b_blk, w3o * chans[3]),
                               lambda i: (i, 0, 0)),
        scratch_shapes=scratch,
        compiler_params=pltpu.CompilerParams(
            dimension_semantics=("parallel",)),
        cost_estimate=pl.CostEstimate(flops=flops, transcendentals=0,
                                      bytes_accessed=bytes_accessed),
    )(xt, w1, b1, w2, b2, w3, b3)

    # (G, h3*B, w3*64) with rows=(ho, image), lanes=(wo, cout)  ->  NCHW.
    out = out.reshape(ng, h3, b_blk, w3o, chans[3])
    out = jnp.transpose(out, (0, 2, 4, 1, 3)).reshape(n, chans[3], h3, w3o)
    return out


# ------------------------------- Parameters ---------------------------------
def init_params(input_channels=3, seed=0):
    """Deterministic synthetic parameters (same shapes as the PyTorch module)."""
    key = jax.random.PRNGKey(seed)
    shapes = [
        (16, input_channels, 4, 4),
        (32, 16, 4, 4),
        (64, 32, 4, 4),
    ]
    params = []
    for s in shapes:
        key, kw_, kb_ = jax.random.split(key, 3)
        wgt = 0.05 * jax.random.normal(kw_, s, dtype=jnp.float32)
        b = 0.01 * jax.random.normal(kb_, (s[0],), dtype=jnp.float32)
        params.append((wgt, b))
    return params


# ---------------------------------- Main -------------------------------------
if __name__ == "__main__":
    key = jax.random.PRNGKey(0)
    # batch=2, channels=3 (module default), spatial=16 -> output (2, 64, 2, 2)
    x = jax.random.normal(key, (2, 3, 16, 16), dtype=jnp.float32)
    params = init_params(input_channels=3, seed=0)

    prepared = prepare_params(params, 16)   # one-time weight repacking

    fwd = jax.jit(vae_encoder_forward,
                  static_argnames=("b_blk", "single_buffer_weights"))
    try:
        out = jax.block_until_ready(fwd(x, prepared))
    except Exception:
        # Fallback if this jax build rejects pl.Buffered(1) single-buffering
        # of the constant weight/bias blocks.
        out = jax.block_until_ready(fwd(x, prepared, single_buffer_weights=False))

    # Reference: XLA conv (same semantics as PyTorch Conv2d(k=4,s=2,p=1)+ReLU).
    ref = x
    for (wgt, b) in params:
        ref = jax.lax.conv_general_dilated(
            ref, wgt, window_strides=(2, 2), padding=((1, 1), (1, 1)),
            dimension_numbers=("NCHW", "OIHW", "NCHW"))
        ref = jax.nn.relu(ref + b.reshape(1, -1, 1, 1))

    assert out.shape == (2, 64, 2, 2), out.shape
    # bf16 MXU operands -> looser tolerance than a pure-f32 reference.
    assert jnp.allclose(out, ref, atol=2e-2, rtol=2e-2), float(
        jnp.max(jnp.abs(out - ref)))

    print("KERNEL_OK")
</pallas_src>

<mosaic_0001>
module attributes {stable_mosaic.version = 11 : i64} {
  func.func @kernel(%arg0: i32, %arg1: memref<1x2x16x48xf32, #tpu.memory_space<vmem>>, %arg2: memref<4x54x128xbf16, #tpu.memory_space<vmem>>, %arg3: memref<1x128xf32, #tpu.memory_space<vmem>>, %arg4: memref<4x160x128xbf16, #tpu.memory_space<vmem>>, %arg5: memref<1x128xf32, #tpu.memory_space<vmem>>, %arg6: memref<4x192x128xbf16, #tpu.memory_space<vmem>>, %arg7: memref<1x128xf32, #tpu.memory_space<vmem>>, %arg8: memref<1x4x128xf32, #tpu.memory_space<vmem>>, %arg9: memref<18x54xbf16, #tpu.memory_space<vmem>>, %arg10: memref<18x54xbf16, #tpu.memory_space<vmem>>, %arg11: memref<10x160xbf16, #tpu.memory_space<vmem>>, %arg12: memref<10x160xbf16, #tpu.memory_space<vmem>>, %arg13: memref<6x192xbf16, #tpu.memory_space<vmem>>, %arg14: memref<6x192xbf16, #tpu.memory_space<vmem>>) attributes {dimension_semantics = [#tpu.dimension_semantics<parallel>], iteration_bounds = array<i64: 1>, scalar_prefetch = 0 : i64, scratch_operands = 6 : i64, tpu.core_type = #tpu.core_type<tc>, window_params = [{transform_indices = @transform_0, window_bounds = array<i64: 1, 2, 16, 48>}, {pipeline_mode = #tpu.pipeline_mode<synchronous>, transform_indices = @transform_1, window_bounds = array<i64: 4, 54, 128>}, {pipeline_mode = #tpu.pipeline_mode<synchronous>, transform_indices = @transform_2, window_bounds = array<i64: 1, 128>}, {pipeline_mode = #tpu.pipeline_mode<synchronous>, transform_indices = @transform_3, window_bounds = array<i64: 4, 160, 128>}, {pipeline_mode = #tpu.pipeline_mode<synchronous>, transform_indices = @transform_4, window_bounds = array<i64: 1, 128>}, {pipeline_mode = #tpu.pipeline_mode<synchronous>, transform_indices = @transform_5, window_bounds = array<i64: 4, 192, 128>}, {pipeline_mode = #tpu.pipeline_mode<synchronous>, transform_indices = @transform_6, window_bounds = array<i64: 1, 128>}, {transform_indices = @transform_7, window_bounds = array<i64: 1, 4, 128>}]} {
    %cst = arith.constant 0.000000e+00 : bf16
    %0 = vector.broadcast %cst : bf16 to vector<2x54xbf16>
    %c0 = arith.constant 0 : index
    %c0_0 = arith.constant 0 : index
    %1 = vector.load %arg9[%c0, %c0_0] : memref<18x54xbf16, #tpu.memory_space<vmem>>, vector<2x54xbf16>
    tpu.vector_store %arg9[%c0, %c0_0], %0 {strides = array<i32>} : memref<18x54xbf16, #tpu.memory_space<vmem>>, vector<2x54xbf16>,
    %c16 = arith.constant 16 : index
    %c0_1 = arith.constant 0 : index
    %2 = vector.load %arg10[%c16, %c0_1] : memref<18x54xbf16, #tpu.memory_space<vmem>>, vector<2x54xbf16>
    tpu.vector_store %arg10[%c16, %c0_1], %0 {strides = array<i32>} : memref<18x54xbf16, #tpu.memory_space<vmem>>, vector<2x54xbf16>,
    %cst_2 = arith.constant 0.000000e+00 : bf16
    %3 = vector.broadcast %cst_2 : bf16 to vector<18x3xbf16>
    %c0_3 = arith.constant 0 : index
    %c0_4 = arith.constant 0 : index
    %4 = vector.load %arg9[%c0_3, %c0_4] : memref<18x54xbf16, #tpu.memory_space<vmem>>, vector<18x3xbf16>
    tpu.vector_store %arg9[%c0_3, %c0_4], %3 {strides = array<i32>} : memref<18x54xbf16, #tpu.memory_space<vmem>>, vector<18x3xbf16>,
    %c0_5 = arith.constant 0 : index
    %c51 = arith.constant 51 : index
    %5 = vector.load %arg9[%c0_5, %c51] : memref<18x54xbf16, #tpu.memory_space<vmem>>, vector<18x3xbf16>
    tpu.vector_store %arg9[%c0_5, %c51], %3 {strides = array<i32>} : memref<18x54xbf16, #tpu.memory_space<vmem>>, vector<18x3xbf16>,
    %c0_6 = arith.constant 0 : index
    %c0_7 = arith.constant 0 : index
    %6 = vector.load %arg10[%c0_6, %c0_7] : memref<18x54xbf16, #tpu.memory_space<vmem>>, vector<18x3xbf16>
    tpu.vector_store %arg10[%c0_6, %c0_7], %3 {strides = array<i32>} : memref<18x54xbf16, #tpu.memory_space<vmem>>, vector<18x3xbf16>,
    %c0_8 = arith.constant 0 : index
    %c51_9 = arith.constant 51 : index
    %7 = vector.load %arg10[%c0_8, %c51_9] : memref<18x54xbf16, #tpu.memory_space<vmem>>, vector<18x3xbf16>
    tpu.vector_store %arg10[%c0_8, %c51_9], %3 {strides = array<i32>} : memref<18x54xbf16, #tpu.memory_space<vmem>>, vector<18x3xbf16>,
    %cst_10 = arith.constant 0.000000e+00 : bf16
    %8 = vector.broadcast %cst_10 : bf16 to vector<2x160xbf16>
    %c0_11 = arith.constant 0 : index
    %c0_12 = arith.constant 0 : index
    %9 = vector.load %arg11[%c0_11, %c0_12] : memref<10x160xbf16, #tpu.memory_space<vmem>>, vector<2x160xbf16>
    tpu.vector_store %arg11[%c0_11, %c0_12], %8 {strides = array<i32>} : memref<10x160xbf16, #tpu.memory_space<vmem>>, vector<2x160xbf16>,
    %c8 = arith.constant 8 : index
    %c0_13 = arith.constant 0 : index
    %10 = vector.load %arg12[%c8, %c0_13] : memref<10x160xbf16, #tpu.memory_space<vmem>>, vector<2x160xbf16>
    tpu.vector_store %arg12[%c8, %c0_13], %8 {strides = array<i32>} : memref<10x160xbf16, #tpu.memory_space<vmem>>, vector<2x160xbf16>,
    %cst_14 = arith.constant 0.000000e+00 : bf16
    %11 = vector.broadcast %cst_14 : bf16 to vector<10x16xbf16>
    %c0_15 = arith.constant 0 : index
    %c0_16 = arith.constant 0 : index
    %12 = vector.load %arg11[%c0_15, %c0_16] : memref<10x160xbf16, #tpu.memory_space<vmem>>, vector<10x16xbf16>
    tpu.vector_store %arg11[%c0_15, %c0_16], %11 {strides = array<i32>} : memref<10x160xbf16, #tpu.memory_space<vmem>>, vector<10x16xbf16>,
    %c0_17 = arith.constant 0 : index
    %c144 = arith.constant 144 : index
    %13 = vector.load %arg11[%c0_17, %c144] : memref<10x160xbf16, #tpu.memory_space<vmem>>, vector<10x16xbf16>
    tpu.vector_store %arg11[%c0_17, %c144], %11 {strides = array<i32>} : memref<10x160xbf16, #tpu.memory_space<vmem>>, vector<10x16xbf16>,
    %c0_18 = arith.constant 0 : index
    %c0_19 = arith.constant 0 : index
    %14 = vector.load %arg12[%c0_18, %c0_19] : memref<10x160xbf16, #tpu.memory_space<vmem>>, vector<10x16xbf16>
    tpu.vector_store %arg12[%c0_18, %c0_19], %11 {strides = array<i32>} : memref<10x160xbf16, #tpu.memory_space<vmem>>, vector<10x16xbf16>,
    %c0_20 = arith.constant 0 : index
    %c144_21 = arith.constant 144 : index
    %15 = vector.load %arg12[%c0_20, %c144_21] : memref<10x160xbf16, #tpu.memory_space<vmem>>, vector<10x16xbf16>
    tpu.vector_store %arg12[%c0_20, %c144_21], %11 {strides = array<i32>} : memref<10x160xbf16, #tpu.memory_space<vmem>>, vector<10x16xbf16>,
    %cst_22 = arith.constant 0.000000e+00 : bf16
    %16 = vector.broadcast %cst_22 : bf16 to vector<2x192xbf16>
    %c0_23 = arith.constant 0 : index
    %c0_24 = arith.constant 0 : index
    %17 = vector.load %arg13[%c0_23, %c0_24] : memref<6x192xbf16, #tpu.memory_space<vmem>>, vector<2x192xbf16>
    tpu.vector_store %arg13[%c0_23, %c0_24], %16 {strides = array<i32>} : memref<6x192xbf16, #tpu.memory_space<vmem>>, vector<2x192xbf16>,
    %c4 = arith.constant 4 : index
    %c0_25 = arith.constant 0 : index
    %18 = vector.load %arg14[%c4, %c0_25] : memref<6x192xbf16, #tpu.memory_space<vmem>>, vector<2x192xbf16>
    tpu.vector_store %arg14[%c4, %c0_25], %16 {strides = array<i32>} : memref<6x192xbf16, #tpu.memory_space<vmem>>, vector<2x192xbf16>,
    %cst_26 = arith.constant 0.000000e+00 : bf16
    %19 = vector.broadcast %cst_26 : bf16 to vector<6x32xbf16>
    %c0_27 = arith.constant 0 : index
    %c0_28 = arith.constant 0 : index
    %20 = vector.load %arg13[%c0_27, %c0_28] : memref<6x192xbf16, #tpu.memory_space<vmem>>, vector<6x32xbf16>
    tpu.vector_store %arg13[%c0_27, %c0_28], %19 {strides = array<i32>} : memref<6x192xbf16, #tpu.memory_space<vmem>>, vector<6x32xbf16>,
    %c0_29 = arith.constant 0 : index
    %c160 = arith.constant 160 : index
    %21 = vector.load %arg13[%c0_29, %c160] : memref<6x192xbf16, #tpu.memory_space<vmem>>, vector<6x32xbf16>
    tpu.vector_store %arg13[%c0_29, %c160], %19 {strides = array<i32>} : memref<6x192xbf16, #tpu.memory_space<vmem>>, vector<6x32xbf16>,
    %c0_30 = arith.constant 0 : index
    %c0_31 = arith.constant 0 : index
    %22 = vector.load %arg14[%c0_30, %c0_31] : memref<6x192xbf16, #tpu.memory_space<vmem>>, vector<6x32xbf16>
    tpu.vector_store %arg14[%c0_30, %c0_31], %19 {strides = array<i32>} : memref<6x192xbf16, #tpu.memory_space<vmem>>, vector<6x32xbf16>,
    %c0_32 = arith.constant 0 : index
    %c160_33 = arith.constant 160 : index
    %23 = vector.load %arg14[%c0_32, %c160_33] : memref<6x192xbf16, #tpu.memory_space<vmem>>, vector<6x32xbf16>
    tpu.vector_store %arg14[%c0_32, %c160_33], %19 {strides = array<i32>} : memref<6x192xbf16, #tpu.memory_space<vmem>>, vector<6x32xbf16>,
    %c0_34 = arith.constant 0 : index
    %c0_35 = arith.constant 0 : index
    %c0_36 = arith.constant 0 : index
    %c0_37 = arith.constant 0 : index
    %24 = vector.load %arg1[%c0_34, %c0_35, %c0_36, %c0_37] : memref<1x2x16x48xf32, #tpu.memory_space<vmem>>, vector<1x1x16x48xf32>
    %25 = vector.shape_cast %24 : vector<1x1x16x48xf32> to vector<16x48xf32>
    %26 = arith.truncf %25 : vector<16x48xf32> to vector<16x48xbf16>
    %c0_38 = arith.constant 0 : index
    %c3 = arith.constant 3 : index
    %27 = vector.load %arg10[%c0_38, %c3] : memref<18x54xbf16, #tpu.memory_space<vmem>>, vector<16x48xbf16>
    tpu.vector_store %arg10[%c0_38, %c3], %26 {strides = array<i32>} : memref<18x54xbf16, #tpu.memory_space<vmem>>, vector<16x48xbf16>,
    %c0_39 = arith.constant 0 : index
    %c1 = arith.constant 1 : index
    %c0_40 = arith.constant 0 : index
    %c0_41 = arith.constant 0 : index
    %28 = vector.load %arg1[%c0_39, %c1, %c0_40, %c0_41] : memref<1x2x16x48xf32, #tpu.memory_space<vmem>>, vector<1x1x16x48xf32>
    %29 = vector.shape_cast %28 : vector<1x1x16x48xf32> to vector<16x48xf32>
    %30 = arith.truncf %29 : vector<16x48xf32> to vector<16x48xbf16>
    %c2 = arith.constant 2 : index
    %c3_42 = arith.constant 3 : index
    %31 = vector.load %arg9[%c2, %c3_42] : memref<18x54xbf16, #tpu.memory_space<vmem>>, vector<16x48xbf16>
    tpu.vector_store %arg9[%c2, %c3_42], %30 {strides = array<i32>} : memref<18x54xbf16, #tpu.memory_space<vmem>>, vector<16x48xbf16>,
    %cst_43 = arith.constant 0.000000e+00 : f32
    %32 = vector.broadcast %cst_43 : f32 to vector<16x128xf32>
    %c0_44 = arith.constant 0 : index
    %c0_45 = arith.constant 0 : index
    %33 = vector.load %arg9[%c0_44, %c0_45] : memref<18x54xbf16, #tpu.memory_space<vmem>>, vector<16x54xbf16>
    %c0_46 = arith.constant 0 : index
    %c0_47 = arith.constant 0 : index
    %c0_48 = arith.constant 0 : index
    %34 = vector.load %arg2[%c0_46, %c0_47, %c0_48] : memref<4x54x128xbf16, #tpu.memory_space<vmem>>, vector<1x54x128xbf16>
    %35 = vector.shape_cast %34 : vector<1x54x128xbf16> to vector<54x128xbf16>
    %cst_49 = arith.constant dense<0.000000e+00> : vector<16x128xf32>
    %36 = tpu.matmul %33, %35, %cst_49 {dimension_numbers = #tpu.dot_dimension_numbers<[1], [0], [0], [1], [0, 0, 1, 1], [], []>} : vector<16x54xbf16>, vector<54x128xbf16>, vector<16x128xf32> -> vector<16x128xf32>
    %37 = arith.addf %32, %36 : vector<16x128xf32>
    %c0_50 = arith.constant 0 : index
    %c0_51 = arith.constant 0 : index
    %38 = vector.load %arg10[%c0_50, %c0_51] : memref<18x54xbf16, #tpu.memory_space<vmem>>, vector<16x54xbf16>
    %c1_52 = arith.constant 1 : index
    %c0_53 = arith.constant 0 : index
    %c0_54 = arith.constant 0 : index
    %39 = vector.load %arg2[%c1_52, %c0_53, %c0_54] : memref<4x54x128xbf16, #tpu.memory_space<vmem>>, vector<1x54x128xbf16>
    %40 = vector.shape_cast %39 : vector<1x54x128xbf16> to vector<54x128xbf16>
    %cst_55 = arith.constant dense<0.000000e+00> : vector<16x128xf32>
    %41 = tpu.matmul %38, %40, %cst_55 {dimension_numbers = #tpu.dot_dimension_numbers<[1], [0], [0], [1], [0, 0, 1, 1], [], []>} : vector<16x54xbf16>, vector<54x128xbf16>, vector<16x128xf32> -> vector<16x128xf32>
    %42 = arith.addf %37, %41 : vector<16x128xf32>
    %c2_56 = arith.constant 2 : index
    %c0_57 = arith.constant 0 : index
    %43 = vector.load %arg9[%c2_56, %c0_57] : memref<18x54xbf16, #tpu.memory_space<vmem>>, vector<16x54xbf16>
    %c2_58 = arith.constant 2 : index
    %c0_59 = arith.constant 0 : index
    %c0_60 = arith.constant 0 : index
    %44 = vector.load %arg2[%c2_58, %c0_59, %c0_60] : memref<4x54x128xbf16, #tpu.memory_space<vmem>>, vector<1x54x128xbf16>
    %45 = vector.shape_cast %44 : vector<1x54x128xbf16> to vector<54x128xbf16>
    %cst_61 = arith.constant dense<0.000000e+00> : vector<16x128xf32>
    %46 = tpu.matmul %43, %45, %cst_61 {dimension_numbers = #tpu.dot_dimension_numbers<[1], [0], [0], [1], [0, 0, 1, 1], [], []>} : vector<16x54xbf16>, vector<54x128xbf16>, vector<16x128xf32> -> vector<16x128xf32>
    %47 = arith.addf %42, %46 : vector<16x128xf32>
    %c2_62 = arith.constant 2 : index
    %c0_63 = arith.constant 0 : index
    %48 = vector.load %arg10[%c2_62, %c0_63] : memref<18x54xbf16, #tpu.memory_space<vmem>>, vector<16x54xbf16>
    %c3_64 = arith.constant 3 : index
    %c0_65 = arith.constant 0 : index
    %c0_66 = arith.constant 0 : index
    %49 = vector.load %arg2[%c3_64, %c0_65, %c0_66] : memref<4x54x128xbf16, #tpu.memory_space<vmem>>, vector<1x54x128xbf16>
    %50 = vector.shape_cast %49 : vector<1x54x128xbf16> to vector<54x128xbf16>
    %cst_67 = arith.constant dense<0.000000e+00> : vector<16x128xf32>
    %51 = tpu.matmul %48, %50, %cst_67 {dimension_numbers = #tpu.dot_dimension_numbers<[1], [0], [0], [1], [0, 0, 1, 1], [], []>} : vector<16x54xbf16>, vector<54x128xbf16>, vector<16x128xf32> -> vector<16x128xf32>
    %52 = arith.addf %47, %51 : vector<16x128xf32>
    %c0_68 = arith.constant 0 : index
    %c0_69 = arith.constant 0 : index
    %53 = vector.load %arg3[%c0_68, %c0_69] : memref<1x128xf32, #tpu.memory_space<vmem>>, vector<1x128xf32>
    %54 = vector.broadcast %53 : vector<1x128xf32> to vector<16x128xf32>
    %55 = arith.addf %52, %54 : vector<16x128xf32>
    %cst_70 = arith.constant 0.000000e+00 : f32
    %56 = vector.broadcast %cst_70 : f32 to vector<16x128xf32>
    %57 = arith.maximumf %55, %56 : vector<16x128xf32>
    %58 = arith.truncf %57 : vector<16x128xf32> to vector<16x128xbf16>
    %59 = vector.extract_strided_slice %58 {offsets = [0, 0], sizes = [2, 128], strides = [1, 1]} : vector<16x128xbf16> to vector<2x128xbf16>
    %c0_71 = arith.constant 0 : index
    %c16_72 = arith.constant 16 : index
    %60 = vector.load %arg12[%c0_71, %c16_72] : memref<10x160xbf16, #tpu.memory_space<vmem>>, vector<2x128xbf16>
    tpu.vector_store %arg12[%c0_71, %c16_72], %59 {strides = array<i32>} : memref<10x160xbf16, #tpu.memory_space<vmem>>, vector<2x128xbf16>,
    %61 = vector.extract_strided_slice %58 {offsets = [2, 0], sizes = [2, 128], strides = [1, 1]} : vector<16x128xbf16> to vector<2x128xbf16>
    %c2_73 = arith.constant 2 : index
    %c16_74 = arith.constant 16 : index
    %62 = vector.load %arg11[%c2_73, %c16_74] : memref<10x160xbf16, #tpu.memory_space<vmem>>, vector<2x128xbf16>
    tpu.vector_store %arg11[%c2_73, %c16_74], %61 {strides = array<i32>} : memref<10x160xbf16, #tpu.memory_space<vmem>>, vector<2x128xbf16>,
    %63 = vector.extract_strided_slice %58 {offsets = [4, 0], sizes = [2, 128], strides = [1, 1]} : vector<16x128xbf16> to vector<2x128xbf16>
    %c2_75 = arith.constant 2 : index
    %c16_76 = arith.constant 16 : index
    %64 = vector.load %arg12[%c2_75, %c16_76] : memref<10x160xbf16, #tpu.memory_space<vmem>>, vector<2x128xbf16>
    tpu.vector_store %arg12[%c2_75, %c16_76], %63 {strides = array<i32>} : memref<10x160xbf16, #tpu.memory_space<vmem>>, vector<2x128xbf16>,
    %65 = vector.extract_strided_slice %58 {offsets = [6, 0], sizes = [2, 128], strides = [1, 1]} : vector<16x128xbf16> to vector<2x128xbf16>
    %c4_77 = arith.constant 4 : index
    %c16_78 = arith.constant 16 : index
    %66 = vector.load %arg11[%c4_77, %c16_78] : memref<10x160xbf16, #tpu.memory_space<vmem>>, vector<2x128xbf16>
    tpu.vector_store %arg11[%c4_77, %c16_78], %65 {strides = array<i32>} : memref<10x160xbf16, #tpu.memory_space<vmem>>, vector<2x128xbf16>,
    %67 = vector.extract_strided_slice %58 {offsets = [8, 0], sizes = [2, 128], strides = [1, 1]} : vector<16x128xbf16> to vector<2x128xbf16>
    %c4_79 = arith.constant 4 : index
    %c16_80 = arith.constant 16 : index
    %68 = vector.load %arg12[%c4_79, %c16_80] : memref<10x160xbf16, #tpu.memory_space<vmem>>, vector<2x128xbf16>
    tpu.vector_store %arg12[%c4_79, %c16_80], %67 {strides = array<i32>} : memref<10x160xbf16, #tpu.memory_space<vmem>>, vector<2x128xbf16>,
    %69 = vector.extract_strided_slice %58 {offsets = [10, 0], sizes = [2, 128], strides = [1, 1]} : vector<16x128xbf16> to vector<2x128xbf16>
    %c6 = arith.constant 6 : index
    %c16_81 = arith.constant 16 : index
    %70 = vector.load %arg11[%c6, %c16_81] : memref<10x160xbf16, #tpu.memory_space<vmem>>, vector<2x128xbf16>
    tpu.vector_store %arg11[%c6, %c16_81], %69 {strides = array<i32>} : memref<10x160xbf16, #tpu.memory_space<vmem>>, vector<2x128xbf16>,
    %71 = vector.extract_strided_slice %58 {offsets = [12, 0], sizes = [2, 128], strides = [1, 1]} : vector<16x128xbf16> to vector<2x128xbf16>
    %c6_82 = arith.constant 6 : index
    %c16_83 = arith.constant 16 : index
    %72 = vector.load %arg12[%c6_82, %c16_83] : memref<10x160xbf16, #tpu.memory_space<vmem>>, vector<2x128xbf16>
    tpu.vector_store %arg12[%c6_82, %c16_83], %71 {strides = array<i32>} : memref<10x160xbf16, #tpu.memory_space<vmem>>, vector<2x128xbf16>,
    %73 = vector.extract_strided_slice %58 {offsets = [14, 0], sizes = [2, 128], strides = [1, 1]} : vector<16x128xbf16> to vector<2x128xbf16>
    %c8_84 = arith.constant 8 : index
    %c16_85 = arith.constant 16 : index
    %74 = vector.load %arg11[%c8_84, %c16_85] : memref<10x160xbf16, #tpu.memory_space<vmem>>, vector<2x128xbf16>
    tpu.vector_store %arg11[%c8_84, %c16_85], %73 {strides = array<i32>} : memref<10x160xbf16, #tpu.memory_space<vmem>>, vector<2x128xbf16>,
    %cst_86 = arith.constant 0.000000e+00 : f32
    %75 = vector.broadcast %cst_86 : f32 to vector<8x128xf32>
    %c0_87 = arith.constant 0 : index
    %c0_88 = arith.constant 0 : index
    %76 = vector.load %arg11[%c0_87, %c0_88] : memref<10x160xbf16, #tpu.memory_space<vmem>>, vector<8x160xbf16>
    %c0_89 = arith.constant 0 : index
    %c0_90 = arith.constant 0 : index
    %c0_91 = arith.constant 0 : index
    %77 = vector.load %arg4[%c0_89, %c0_90, %c0_91] : memref<4x160x128xbf16, #tpu.memory_space<vmem>>, vector<1x160x128xbf16>
    %78 = vector.shape_cast %77 : vector<1x160x128xbf16> to vector<160x128xbf16>
    %cst_92 = arith.constant dense<0.000000e+00> : vector<8x128xf32>
    %79 = tpu.matmul %76, %78, %cst_92 {dimension_numbers = #tpu.dot_dimension_numbers<[1], [0], [0], [1], [0, 0, 1, 1], [], []>} : vector<8x160xbf16>, vector<160x128xbf16>, vector<8x128xf32> -> vector<8x128xf32>
    %80 = arith.addf %75, %79 : vector<8x128xf32>
    %c0_93 = arith.constant 0 : index
    %c0_94 = arith.constant 0 : index
    %81 = vector.load %arg12[%c0_93, %c0_94] : memref<10x160xbf16, #tpu.memory_space<vmem>>, vector<8x160xbf16>
    %c1_95 = arith.constant 1 : index
    %c0_96 = arith.constant 0 : index
    %c0_97 = arith.constant 0 : index
    %82 = vector.load %arg4[%c1_95, %c0_96, %c0_97] : memref<4x160x128xbf16, #tpu.memory_space<vmem>>, vector<1x160x128xbf16>
    %83 = vector.shape_cast %82 : vector<1x160x128xbf16> to vector<160x128xbf16>
    %cst_98 = arith.constant dense<0.000000e+00> : vector<8x128xf32>
    %84 = tpu.matmul %81, %83, %cst_98 {dimension_numbers = #tpu.dot_dimension_numbers<[1], [0], [0], [1], [0, 0, 1, 1], [], []>} : vector<8x160xbf16>, vector<160x128xbf16>, vector<8x128xf32> -> vector<8x128xf32>
    %85 = arith.addf %80, %84 : vector<8x128xf32>
    %c2_99 = arith.constant 2 : index
    %c0_100 = arith.constant 0 : index
    %86 = vector.load %arg11[%c2_99, %c0_100] : memref<10x160xbf16, #tpu.memory_space<vmem>>, vector<8x160xbf16>
    %c2_101 = arith.constant 2 : index
    %c0_102 = arith.constant 0 : index
    %c0_103 = arith.constant 0 : index
    %87 = vector.load %arg4[%c2_101, %c0_102, %c0_103] : memref<4x160x128xbf16, #tpu.memory_space<vmem>>, vector<1x160x128xbf16>
    %88 = vector.shape_cast %87 : vector<1x160x128xbf16> to vector<160x128xbf16>
    %cst_104 = arith.constant dense<0.000000e+00> : vector<8x128xf32>
    %89 = tpu.matmul %86, %88, %cst_104 {dimension_numbers = #tpu.dot_dimension_numbers<[1], [0], [0], [1], [0, 0, 1, 1], [], []>} : vector<8x160xbf16>, vector<160x128xbf16>, vector<8x128xf32> -> vector<8x128xf32>
    %90 = arith.addf %85, %89 : vector<8x128xf32>
    %c2_105 = arith.constant 2 : index
    %c0_106 = arith.constant 0 : index
    %91 = vector.load %arg12[%c2_105, %c0_106] : memref<10x160xbf16, #tpu.memory_space<vmem>>, vector<8x160xbf16>
    %c3_107 = arith.constant 3 : index
    %c0_108 = arith.constant 0 : index
    %c0_109 = arith.constant 0 : index
    %92 = vector.load %arg4[%c3_107, %c0_108, %c0_109] : memref<4x160x128xbf16, #tpu.memory_space<vmem>>, vector<1x160x128xbf16>
    %93 = vector.shape_cast %92 : vector<1x160x128xbf16> to vector<160x128xbf16>
    %cst_110 = arith.constant dense<0.000000e+00> : vector<8x128xf32>
    %94 = tpu.matmul %91, %93, %cst_110 {dimension_numbers = #tpu.dot_dimension_numbers<[1], [0], [0], [1], [0, 0, 1, 1], [], []>} : vector<8x160xbf16>, vector<160x128xbf16>, vector<8x128xf32> -> vector<8x128xf32>
    %95 = arith.addf %90, %94 : vector<8x128xf32>
    %c0_111 = arith.constant 0 : index
    %c0_112 = arith.constant 0 : index
    %96 = vector.load %arg5[%c0_111, %c0_112] : memref<1x128xf32, #tpu.memory_space<vmem>>, vector<1x128xf32>
    %97 = vector.broadcast %96 : vector<1x128xf32> to vector<8x128xf32>
    %98 = arith.addf %95, %97 : vector<8x128xf32>
    %cst_113 = arith.constant 0.000000e+00 : f32
    %99 = vector.broadcast %cst_113 : f32 to vector<8x128xf32>
    %100 = arith.maximumf %98, %99 : vector<8x128xf32>
    %101 = arith.truncf %100 : vector<8x128xf32> to vector<8x128xbf16>
    %102 = vector.extract_strided_slice %101 {offsets = [0, 0], sizes = [2, 128], strides = [1, 1]} : vector<8x128xbf16> to vector<2x128xbf16>
    %c0_114 = arith.constant 0 : index
    %c32 = arith.constant 32 : index
    %103 = vector.load %arg14[%c0_114, %c32] : memref<6x192xbf16, #tpu.memory_space<vmem>>, vector<2x128xbf16>
    tpu.vector_store %arg14[%c0_114, %c32], %102 {strides = array<i32>} : memref<6x192xbf16, #tpu.memory_space<vmem>>, vector<2x128xbf16>,
    %104 = vector.extract_strided_slice %101 {offsets = [2, 0], sizes = [2, 128], strides = [1, 1]} : vector<8x128xbf16> to vector<2x128xbf16>
    %c2_115 = arith.constant 2 : index
    %c32_116 = arith.constant 32 : index
    %105 = vector.load %arg13[%c2_115, %c32_116] : memref<6x192xbf16, #tpu.memory_space<vmem>>, vector<2x128xbf16>
    tpu.vector_store %arg13[%c2_115, %c32_116], %104 {strides = array<i32>} : memref<6x192xbf16, #tpu.memory_space<vmem>>, vector<2x128xbf16>,
    %106 = vector.extract_strided_slice %101 {offsets = [4, 0], sizes = [2, 128], strides = [1, 1]} : vector<8x128xbf16> to vector<2x128xbf16>
    %c2_117 = arith.constant 2 : index
    %c32_118 = arith.constant 32 : index
    %107 = vector.load %arg14[%c2_117, %c32_118] : memref<6x192xbf16, #tpu.memory_space<vmem>>, vector<2x128xbf16>
    tpu.vector_store %arg14[%c2_117, %c32_118], %106 {strides = array<i32>} : memref<6x192xbf16, #tpu.memory_space<vmem>>, vector<2x128xbf16>,
    %108 = vector.extract_strided_slice %101 {offsets = [6, 0], sizes = [2, 128], strides = [1, 1]} : vector<8x128xbf16> to vector<2x128xbf16>
    %c4_119 = arith.constant 4 : index
    %c32_120 = arith.constant 32 : index
    %109 = vector.load %arg13[%c4_119, %c32_120] : memref<6x192xbf16, #tpu.memory_space<vmem>>, vector<2x128xbf16>
    tpu.vector_store %arg13[%c4_119, %c32_120], %108 {strides = array<i32>} : memref<6x192xbf16, #tpu.memory_space<vmem>>, vector<2x128xbf16>,
    %cst_121 = arith.constant 0.000000e+00 : f32
    %110 = vector.broadcast %cst_121 : f32 to vector<4x128xf32>
    %c0_122 = arith.constant 0 : index
    %c0_123 = arith.constant 0 : index
    %111 = vector.load %arg13[%c0_122, %c0_123] : memref<6x192xbf16, #tpu.memory_space<vmem>>, vector<4x192xbf16>
    %c0_124 = arith.constant 0 : index
    %c0_125 = arith.constant 0 : index
    %c0_126 = arith.constant 0 : index
    %112 = vector.load %arg6[%c0_124, %c0_125, %c0_126] : memref<4x192x128xbf16, #tpu.memory_space<vmem>>, vector<1x192x128xbf16>
    %113 = vector.shape_cast %112 : vector<1x192x128xbf16> to vector<192x128xbf16>
    %cst_127 = arith.constant dense<0.000000e+00> : vector<4x128xf32>
    %114 = tpu.matmul %111, %113, %cst_127 {dimension_numbers = #tpu.dot_dimension_numbers<[1], [0], [0], [1], [0, 0, 1, 1], [], []>} : vector<4x192xbf16>, vector<192x128xbf16>, vector<4x128xf32> -> vector<4x128xf32>
    %115 = arith.addf %110, %114 : vector<4x128xf32>
    %c0_128 = arith.constant 0 : index
    %c0_129 = arith.constant 0 : index
    %116 = vector.load %arg14[%c0_128, %c0_129] : memref<6x192xbf16, #tpu.memory_space<vmem>>, vector<4x192xbf16>
    %c1_130 = arith.constant 1 : index
    %c0_131 = arith.constant 0 : index
    %c0_132 = arith.constant 0 : index
    %117 = vector.load %arg6[%c1_130, %c0_131, %c0_132] : memref<4x192x128xbf16, #tpu.memory_space<vmem>>, vector<1x192x128xbf16>
    %118 = vector.shape_cast %117 : vector<1x192x128xbf16> to vector<192x128xbf16>
    %cst_133 = arith.constant dense<0.000000e+00> : vector<4x128xf32>
    %119 = tpu.matmul %116, %118, %cst_133 {dimension_numbers = #tpu.dot_dimension_numbers<[1], [0], [0], [1], [0, 0, 1, 1], [], []>} : vector<4x192xbf16>, vector<192x128xbf16>, vector<4x128xf32> -> vector<4x128xf32>
    %120 = arith.addf %115, %119 : vector<4x128xf32>
    %c2_134 = arith.constant 2 : index
    %c0_135 = arith.constant 0 : index
    %121 = vector.load %arg13[%c2_134, %c0_135] : memref<6x192xbf16, #tpu.memory_space<vmem>>, vector<4x192xbf16>
    %c2_136 = arith.constant 2 : index
    %c0_137 = arith.constant 0 : index
    %c0_138 = arith.constant 0 : index
    %122 = vector.load %arg6[%c2_136, %c0_137, %c0_138] : memref<4x192x128xbf16, #tpu.memory_space<vmem>>, vector<1x192x128xbf16>
    %123 = vector.shape_cast %122 : vector<1x192x128xbf16> to vector<192x128xbf16>
    %cst_139 = arith.constant dense<0.000000e+00> : vector<4x128xf32>
    %124 = tpu.matmul %121, %123, %cst_139 {dimension_numbers = #tpu.dot_dimension_numbers<[1], [0], [0], [1], [0, 0, 1, 1], [], []>} : vector<4x192xbf16>, vector<192x128xbf16>, vector<4x128xf32> -> vector<4x128xf32>
    %125 = arith.addf %120, %124 : vector<4x128xf32>
    %c2_140 = arith.constant 2 : index
    %c0_141 = arith.constant 0 : index
    %126 = vector.load %arg14[%c2_140, %c0_141] : memref<6x192xbf16, #tpu.memory_space<vmem>>, vector<4x192xbf16>
    %c3_142 = arith.constant 3 : index
    %c0_143 = arith.constant 0 : index
    %c0_144 = arith.constant 0 : index
    %127 = vector.load %arg6[%c3_142, %c0_143, %c0_144] : memref<4x192x128xbf16, #tpu.memory_space<vmem>>, vector<1x192x128xbf16>
    %128 = vector.shape_cast %127 : vector<1x192x128xbf16> to vector<192x128xbf16>
    %cst_145 = arith.constant dense<0.000000e+00> : vector<4x128xf32>
    %129 = tpu.matmul %126, %128, %cst_145 {dimension_numbers = #tpu.dot_dimension_numbers<[1], [0], [0], [1], [0, 0, 1, 1], [], []>} : vector<4x192xbf16>, vector<192x128xbf16>, vector<4x128xf32> -> vector<4x128xf32>
    %130 = arith.addf %125, %129 : vector<4x128xf32>
    %c0_146 = arith.constant 0 : index
    %c0_147 = arith.constant 0 : index
    %131 = vector.load %arg7[%c0_146, %c0_147] : memref<1x128xf32, #tpu.memory_space<vmem>>, vector<1x128xf32>
    %132 = vector.broadcast %131 : vector<1x128xf32> to vector<4x128xf32>
    %133 = arith.addf %130, %132 : vector<4x128xf32>
    %cst_148 = arith.constant 0.000000e+00 : f32
    %134 = vector.broadcast %cst_148 : f32 to vector<4x128xf32>
    %135 = arith.maximumf %133, %134 : vector<4x128xf32>
    %c0_149 = arith.constant 0 : index
    %c0_150 = arith.constant 0 : index
    %c0_151 = arith.constant 0 : index
    %136 = vector.load %arg8[%c0_149, %c0_150, %c0_151] : memref<1x4x128xf32, #tpu.memory_space<vmem>>, vector<1x4x128xf32>
    %137 = vector.shape_cast %136 : vector<1x4x128xf32> to vector<4x128xf32>
    %138 = vector.shape_cast %135 : vector<4x128xf32> to vector<1x4x128xf32>
    tpu.vector_store %arg8[%c0_149, %c0_150, %c0_151], %138 {strides = array<i32>} : memref<1x4x128xf32, #tpu.memory_space<vmem>>, vector<1x4x128xf32>,
    return
  }
  func.func @transform_0(%arg0: i32) -> (i32, i32, i32, i32) {
    %c0_i32 = arith.constant 0 : i32
    %c0_i32_0 = arith.constant 0 : i32
    %c0_i32_1 = arith.constant 0 : i32
    %c0_i32_2 = arith.constant 0 : i32
    return %arg0, %c0_i32, %c0_i32_0, %c0_i32_1 : i32, i32, i32, i32
  }
  func.func @transform_1(%arg0: i32) -> (i32, i32, i32) {
    %c0_i32 = arith.constant 0 : i32
    %c0_i32_0 = arith.constant 0 : i32
    %c0_i32_1 = arith.constant 0 : i32
    %c0_i32_2 = arith.constant 0 : i32
    return %c0_i32, %c0_i32_0, %c0_i32_1 : i32, i32, i32
  }
  func.func @transform_2(%arg0: i32) -> (i32, i32) {
    %c0_i32 = arith.constant 0 : i32
    %c0_i32_0 = arith.constant 0 : i32
    %c0_i32_1 = arith.constant 0 : i32
    return %c0_i32, %c0_i32_0 : i32, i32
  }
  func.func @transform_3(%arg0: i32) -> (i32, i32, i32) {
    %c0_i32 = arith.constant 0 : i32
    %c0_i32_0 = arith.constant 0 : i32
    %c0_i32_1 = arith.constant 0 : i32
    %c0_i32_2 = arith.constant 0 : i32
    return %c0_i32, %c0_i32_0, %c0_i32_1 : i32, i32, i32
  }
  func.func @transform_4(%arg0: i32) -> (i32, i32) {
    %c0_i32 = arith.constant 0 : i32
    %c0_i32_0 = arith.constant 0 : i32
    %c0_i32_1 = arith.constant 0 : i32
    return %c0_i32, %c0_i32_0 : i32, i32
  }
  func.func @transform_5(%arg0: i32) -> (i32, i32, i32) {
    %c0_i32 = arith.constant 0 : i32
    %c0_i32_0 = arith.constant 0 : i32
    %c0_i32_1 = arith.constant 0 : i32
    %c0_i32_2 = arith.constant 0 : i32
    return %c0_i32, %c0_i32_0, %c0_i32_1 : i32, i32, i32
  }
  func.func @transform_6(%arg0: i32) -> (i32, i32) {
    %c0_i32 = arith.constant 0 : i32
    %c0_i32_0 = arith.constant 0 : i32
    %c0_i32_1 = arith.constant 0 : i32
    return %c0_i32, %c0_i32_0 : i32, i32
  }
  func.func @transform_7(%arg0: i32) -> (i32, i32, i32) {
    %c0_i32 = arith.constant 0 : i32
    %c0_i32_0 = arith.constant 0 : i32
    %c0_i32_1 = arith.constant 0 : i32
    return %arg0, %c0_i32, %c0_i32_0 : i32, i32, i32
  }
}

module attributes {stable_mosaic.version = 11 : i64} {
  func.func @kernel(%arg0: i32, %arg1: memref<1x2x16x48xf32, #tpu.memory_space<vmem>>, %arg2: memref<4x54x128xbf16, #tpu.memory_space<vmem>>, %arg3: memref<1x128xf32, #tpu.memory_space<vmem>>, %arg4: memref<4x160x128xbf16, #tpu.memory_space<vmem>>, %arg5: memref<1x128xf32, #tpu.memory_space<vmem>>, %arg6: memref<4x192x128xbf16, #tpu.memory_space<vmem>>, %arg7: memref<1x128xf32, #tpu.memory_space<vmem>>, %arg8: memref<1x4x128xf32, #tpu.memory_space<vmem>>, %arg9: memref<18x54xbf16, #tpu.memory_space<vmem>>, %arg10: memref<18x54xbf16, #tpu.memory_space<vmem>>, %arg11: memref<10x160xbf16, #tpu.memory_space<vmem>>, %arg12: memref<10x160xbf16, #tpu.memory_space<vmem>>, %arg13: memref<6x192xbf16, #tpu.memory_space<vmem>>, %arg14: memref<6x192xbf16, #tpu.memory_space<vmem>>) attributes {dimension_semantics = [#tpu.dimension_semantics<parallel>], iteration_bounds = array<i64: 1>, scalar_prefetch = 0 : i64, scratch_operands = 6 : i64, tpu.core_type = #tpu.core_type<tc>, window_params = [{transform_indices = @transform_0, window_bounds = array<i64: 1, 2, 16, 48>}, {pipeline_mode = #tpu.pipeline_mode<synchronous>, transform_indices = @transform_1, window_bounds = array<i64: 4, 54, 128>}, {pipeline_mode = #tpu.pipeline_mode<synchronous>, transform_indices = @transform_2, window_bounds = array<i64: 1, 128>}, {pipeline_mode = #tpu.pipeline_mode<synchronous>, transform_indices = @transform_3, window_bounds = array<i64: 4, 160, 128>}, {pipeline_mode = #tpu.pipeline_mode<synchronous>, transform_indices = @transform_4, window_bounds = array<i64: 1, 128>}, {pipeline_mode = #tpu.pipeline_mode<synchronous>, transform_indices = @transform_5, window_bounds = array<i64: 4, 192, 128>}, {pipeline_mode = #tpu.pipeline_mode<synchronous>, transform_indices = @transform_6, window_bounds = array<i64: 1, 128>}, {transform_indices = @transform_7, window_bounds = array<i64: 1, 4, 128>}]} {
    %cst = arith.constant 0.000000e+00 : bf16
    %0 = vector.broadcast %cst : bf16 to vector<2x54xbf16>
    %c0 = arith.constant 0 : index
    %c0_0 = arith.constant 0 : index
    %1 = vector.load %arg9[%c0, %c0_0] : memref<18x54xbf16, #tpu.memory_space<vmem>>, vector<2x54xbf16>
    tpu.vector_store %arg9[%c0, %c0_0], %0 {strides = array<i32>} : memref<18x54xbf16, #tpu.memory_space<vmem>>, vector<2x54xbf16>,
    %c16 = arith.constant 16 : index
    %c0_1 = arith.constant 0 : index
    %2 = vector.load %arg10[%c16, %c0_1] : memref<18x54xbf16, #tpu.memory_space<vmem>>, vector<2x54xbf16>
    tpu.vector_store %arg10[%c16, %c0_1], %0 {strides = array<i32>} : memref<18x54xbf16, #tpu.memory_space<vmem>>, vector<2x54xbf16>,
    %cst_2 = arith.constant 0.000000e+00 : bf16
    %3 = vector.broadcast %cst_2 : bf16 to vector<18x3xbf16>
    %c0_3 = arith.constant 0 : index
    %c0_4 = arith.constant 0 : index
    %4 = vector.load %arg9[%c0_3, %c0_4] : memref<18x54xbf16, #tpu.memory_space<vmem>>, vector<18x3xbf16>
    tpu.vector_store %arg9[%c0_3, %c0_4], %3 {strides = array<i32>} : memref<18x54xbf16, #tpu.memory_space<vmem>>, vector<18x3xbf16>,
    %c0_5 = arith.constant 0 : index
    %c51 = arith.constant 51 : index
    %5 = vector.load %arg9[%c0_5, %c51] : memref<18x54xbf16, #tpu.memory_space<vmem>>, vector<18x3xbf16>
    tpu.vector_store %arg9[%c0_5, %c51], %3 {strides = array<i32>} : memref<18x54xbf16, #tpu.memory_space<vmem>>, vector<18x3xbf16>,
    %c0_6 = arith.constant 0 : index
    %c0_7 = arith.constant 0 : index
    %6 = vector.load %arg10[%c0_6, %c0_7] : memref<18x54xbf16, #tpu.memory_space<vmem>>, vector<18x3xbf16>
    tpu.vector_store %arg10[%c0_6, %c0_7], %3 {strides = array<i32>} : memref<18x54xbf16, #tpu.memory_space<vmem>>, vector<18x3xbf16>,
    %c0_8 = arith.constant 0 : index
    %c51_9 = arith.constant 51 : index
    %7 = vector.load %arg10[%c0_8, %c51_9] : memref<18x54xbf16, #tpu.memory_space<vmem>>, vector<18x3xbf16>
    tpu.vector_store %arg10[%c0_8, %c51_9], %3 {strides = array<i32>} : memref<18x54xbf16, #tpu.memory_space<vmem>>, vector<18x3xbf16>,
    %cst_10 = arith.constant 0.000000e+00 : bf16
    %8 = vector.broadcast %cst_10 : bf16 to vector<2x160xbf16>
    %c0_11 = arith.constant 0 : index
    %c0_12 = arith.constant 0 : index
    %9 = vector.load %arg11[%c0_11, %c0_12] : memref<10x160xbf16, #tpu.memory_space<vmem>>, vector<2x160xbf16>
    tpu.vector_store %arg11[%c0_11, %c0_12], %8 {strides = array<i32>} : memref<10x160xbf16, #tpu.memory_space<vmem>>, vector<2x160xbf16>,
    %c8 = arith.constant 8 : index
    %c0_13 = arith.constant 0 : index
    %10 = vector.load %arg12[%c8, %c0_13] : memref<10x160xbf16, #tpu.memory_space<vmem>>, vector<2x160xbf16>
    tpu.vector_store %arg12[%c8, %c0_13], %8 {strides = array<i32>} : memref<10x160xbf16, #tpu.memory_space<vmem>>, vector<2x160xbf16>,
    %cst_14 = arith.constant 0.000000e+00 : bf16
    %11 = vector.broadcast %cst_14 : bf16 to vector<10x16xbf16>
    %c0_15 = arith.constant 0 : index
    %c0_16 = arith.constant 0 : index
    %12 = vector.load %arg11[%c0_15, %c0_16] : memref<10x160xbf16, #tpu.memory_space<vmem>>, vector<10x16xbf16>
    tpu.vector_store %arg11[%c0_15, %c0_16], %11 {strides = array<i32>} : memref<10x160xbf16, #tpu.memory_space<vmem>>, vector<10x16xbf16>,
    %c0_17 = arith.constant 0 : index
    %c144 = arith.constant 144 : index
    %13 = vector.load %arg11[%c0_17, %c144] : memref<10x160xbf16, #tpu.memory_space<vmem>>, vector<10x16xbf16>
    tpu.vector_store %arg11[%c0_17, %c144], %11 {strides = array<i32>} : memref<10x160xbf16, #tpu.memory_space<vmem>>, vector<10x16xbf16>,
    %c0_18 = arith.constant 0 : index
    %c0_19 = arith.constant 0 : index
    %14 = vector.load %arg12[%c0_18, %c0_19] : memref<10x160xbf16, #tpu.memory_space<vmem>>, vector<10x16xbf16>
    tpu.vector_store %arg12[%c0_18, %c0_19], %11 {strides = array<i32>} : memref<10x160xbf16, #tpu.memory_space<vmem>>, vector<10x16xbf16>,
    %c0_20 = arith.constant 0 : index
    %c144_21 = arith.constant 144 : index
    %15 = vector.load %arg12[%c0_20, %c144_21] : memref<10x160xbf16, #tpu.memory_space<vmem>>, vector<10x16xbf16>
    tpu.vector_store %arg12[%c0_20, %c144_21], %11 {strides = array<i32>} : memref<10x160xbf16, #tpu.memory_space<vmem>>, vector<10x16xbf16>,
    %cst_22 = arith.constant 0.000000e+00 : bf16
    %16 = vector.broadcast %cst_22 : bf16 to vector<2x192xbf16>
    %c0_23 = arith.constant 0 : index
    %c0_24 = arith.constant 0 : index
    %17 = vector.load %arg13[%c0_23, %c0_24] : memref<6x192xbf16, #tpu.memory_space<vmem>>, vector<2x192xbf16>
    tpu.vector_store %arg13[%c0_23, %c0_24], %16 {strides = array<i32>} : memref<6x192xbf16, #tpu.memory_space<vmem>>, vector<2x192xbf16>,
    %c4 = arith.constant 4 : index
    %c0_25 = arith.constant 0 : index
    %18 = vector.load %arg14[%c4, %c0_25] : memref<6x192xbf16, #tpu.memory_space<vmem>>, vector<2x192xbf16>
    tpu.vector_store %arg14[%c4, %c0_25], %16 {strides = array<i32>} : memref<6x192xbf16, #tpu.memory_space<vmem>>, vector<2x192xbf16>,
    %cst_26 = arith.constant 0.000000e+00 : bf16
    %19 = vector.broadcast %cst_26 : bf16 to vector<6x32xbf16>
    %c0_27 = arith.constant 0 : index
    %c0_28 = arith.constant 0 : index
    %20 = vector.load %arg13[%c0_27, %c0_28] : memref<6x192xbf16, #tpu.memory_space<vmem>>, vector<6x32xbf16>
    tpu.vector_store %arg13[%c0_27, %c0_28], %19 {strides = array<i32>} : memref<6x192xbf16, #tpu.memory_space<vmem>>, vector<6x32xbf16>,
    %c0_29 = arith.constant 0 : index
    %c160 = arith.constant 160 : index
    %21 = vector.load %arg13[%c0_29, %c160] : memref<6x192xbf16, #tpu.memory_space<vmem>>, vector<6x32xbf16>
    tpu.vector_store %arg13[%c0_29, %c160], %19 {strides = array<i32>} : memref<6x192xbf16, #tpu.memory_space<vmem>>, vector<6x32xbf16>,
    %c0_30 = arith.constant 0 : index
    %c0_31 = arith.constant 0 : index
    %22 = vector.load %arg14[%c0_30, %c0_31] : memref<6x192xbf16, #tpu.memory_space<vmem>>, vector<6x32xbf16>
    tpu.vector_store %arg14[%c0_30, %c0_31], %19 {strides = array<i32>} : memref<6x192xbf16, #tpu.memory_space<vmem>>, vector<6x32xbf16>,
    %c0_32 = arith.constant 0 : index
    %c160_33 = arith.constant 160 : index
    %23 = vector.load %arg14[%c0_32, %c160_33] : memref<6x192xbf16, #tpu.memory_space<vmem>>, vector<6x32xbf16>
    tpu.vector_store %arg14[%c0_32, %c160_33], %19 {strides = array<i32>} : memref<6x192xbf16, #tpu.memory_space<vmem>>, vector<6x32xbf16>,
    %c0_34 = arith.constant 0 : index
    %c0_35 = arith.constant 0 : index
    %c0_36 = arith.constant 0 : index
    %c0_37 = arith.constant 0 : index
    %24 = vector.load %arg1[%c0_34, %c0_35, %c0_36, %c0_37] : memref<1x2x16x48xf32, #tpu.memory_space<vmem>>, vector<1x1x16x48xf32>
    %25 = vector.shape_cast %24 : vector<1x1x16x48xf32> to vector<16x48xf32>
    %26 = arith.truncf %25 : vector<16x48xf32> to vector<16x48xbf16>
    %c0_38 = arith.constant 0 : index
    %c3 = arith.constant 3 : index
    %27 = vector.load %arg10[%c0_38, %c3] : memref<18x54xbf16, #tpu.memory_space<vmem>>, vector<16x48xbf16>
    tpu.vector_store %arg10[%c0_38, %c3], %26 {strides = array<i32>} : memref<18x54xbf16, #tpu.memory_space<vmem>>, vector<16x48xbf16>,
    %c0_39 = arith.constant 0 : index
    %c1 = arith.constant 1 : index
    %c0_40 = arith.constant 0 : index
    %c0_41 = arith.constant 0 : index
    %28 = vector.load %arg1[%c0_39, %c1, %c0_40, %c0_41] : memref<1x2x16x48xf32, #tpu.memory_space<vmem>>, vector<1x1x16x48xf32>
    %29 = vector.shape_cast %28 : vector<1x1x16x48xf32> to vector<16x48xf32>
    %30 = arith.truncf %29 : vector<16x48xf32> to vector<16x48xbf16>
    %c2 = arith.constant 2 : index
    %c3_42 = arith.constant 3 : index
    %31 = vector.load %arg9[%c2, %c3_42] : memref<18x54xbf16, #tpu.memory_space<vmem>>, vector<16x48xbf16>
    tpu.vector_store %arg9[%c2, %c3_42], %30 {strides = array<i32>} : memref<18x54xbf16, #tpu.memory_space<vmem>>, vector<16x48xbf16>,
    %cst_43 = arith.constant 0.000000e+00 : f32
    %32 = vector.broadcast %cst_43 : f32 to vector<16x128xf32>
    %c0_44 = arith.constant 0 : index
    %c0_45 = arith.constant 0 : index
    %33 = vector.load %arg9[%c0_44, %c0_45] : memref<18x54xbf16, #tpu.memory_space<vmem>>, vector<16x54xbf16>
    %c0_46 = arith.constant 0 : index
    %c0_47 = arith.constant 0 : index
    %c0_48 = arith.constant 0 : index
    %34 = vector.load %arg2[%c0_46, %c0_47, %c0_48] : memref<4x54x128xbf16, #tpu.memory_space<vmem>>, vector<1x54x128xbf16>
    %35 = vector.shape_cast %34 : vector<1x54x128xbf16> to vector<54x128xbf16>
    %cst_49 = arith.constant dense<0.000000e+00> : vector<16x128xf32>
    %36 = tpu.matmul %33, %35, %cst_49 {dimension_numbers = #tpu.dot_dimension_numbers<[1], [0], [0], [1], [0, 0, 1, 1], [], []>} : vector<16x54xbf16>, vector<54x128xbf16>, vector<16x128xf32> -> vector<16x128xf32>
    %37 = arith.addf %32, %36 : vector<16x128xf32>
    %c0_50 = arith.constant 0 : index
    %c0_51 = arith.constant 0 : index
    %38 = vector.load %arg10[%c0_50, %c0_51] : memref<18x54xbf16, #tpu.memory_space<vmem>>, vector<16x54xbf16>
    %c1_52 = arith.constant 1 : index
    %c0_53 = arith.constant 0 : index
    %c0_54 = arith.constant 0 : index
    %39 = vector.load %arg2[%c1_52, %c0_53, %c0_54] : memref<4x54x128xbf16, #tpu.memory_space<vmem>>, vector<1x54x128xbf16>
    %40 = vector.shape_cast %39 : vector<1x54x128xbf16> to vector<54x128xbf16>
    %cst_55 = arith.constant dense<0.000000e+00> : vector<16x128xf32>
    %41 = tpu.matmul %38, %40, %cst_55 {dimension_numbers = #tpu.dot_dimension_numbers<[1], [0], [0], [1], [0, 0, 1, 1], [], []>} : vector<16x54xbf16>, vector<54x128xbf16>, vector<16x128xf32> -> vector<16x128xf32>
    %42 = arith.addf %37, %41 : vector<16x128xf32>
    %c2_56 = arith.constant 2 : index
    %c0_57 = arith.constant 0 : index
    %43 = vector.load %arg9[%c2_56, %c0_57] : memref<18x54xbf16, #tpu.memory_space<vmem>>, vector<16x54xbf16>
    %c2_58 = arith.constant 2 : index
    %c0_59 = arith.constant 0 : index
    %c0_60 = arith.constant 0 : index
    %44 = vector.load %arg2[%c2_58, %c0_59, %c0_60] : memref<4x54x128xbf16, #tpu.memory_space<vmem>>, vector<1x54x128xbf16>
    %45 = vector.shape_cast %44 : vector<1x54x128xbf16> to vector<54x128xbf16>
    %cst_61 = arith.constant dense<0.000000e+00> : vector<16x128xf32>
    %46 = tpu.matmul %43, %45, %cst_61 {dimension_numbers = #tpu.dot_dimension_numbers<[1], [0], [0], [1], [0, 0, 1, 1], [], []>} : vector<16x54xbf16>, vector<54x128xbf16>, vector<16x128xf32> -> vector<16x128xf32>
    %47 = arith.addf %42, %46 : vector<16x128xf32>
    %c2_62 = arith.constant 2 : index
    %c0_63 = arith.constant 0 : index
    %48 = vector.load %arg10[%c2_62, %c0_63] : memref<18x54xbf16, #tpu.memory_space<vmem>>, vector<16x54xbf16>
    %c3_64 = arith.constant 3 : index
    %c0_65 = arith.constant 0 : index
    %c0_66 = arith.constant 0 : index
    %49 = vector.load %arg2[%c3_64, %c0_65, %c0_66] : memref<4x54x128xbf16, #tpu.memory_space<vmem>>, vector<1x54x128xbf16>
    %50 = vector.shape_cast %49 : vector<1x54x128xbf16> to vector<54x128xbf16>
    %cst_67 = arith.constant dense<0.000000e+00> : vector<16x128xf32>
    %51 = tpu.matmul %48, %50, %cst_67 {dimension_numbers = #tpu.dot_dimension_numbers<[1], [0], [0], [1], [0, 0, 1, 1], [], []>} : vector<16x54xbf16>, vector<54x128xbf16>, vector<16x128xf32> -> vector<16x128xf32>
    %52 = arith.addf %47, %51 : vector<16x128xf32>
    %c0_68 = arith.constant 0 : index
    %c0_69 = arith.constant 0 : index
    %53 = vector.load %arg3[%c0_68, %c0_69] : memref<1x128xf32, #tpu.memory_space<vmem>>, vector<1x128xf32>
    %54 = vector.broadcast %53 : vector<1x128xf32> to vector<16x128xf32>
    %55 = arith.addf %52, %54 : vector<16x128xf32>
    %cst_70 = arith.constant 0.000000e+00 : f32
    %56 = vector.broadcast %cst_70 : f32 to vector<16x128xf32>
    %57 = arith.maximumf %55, %56 : vector<16x128xf32>
    %58 = arith.truncf %57 : vector<16x128xf32> to vector<16x128xbf16>
    %59 = vector.extract_strided_slice %58 {offsets = [0, 0], sizes = [2, 128], strides = [1, 1]} : vector<16x128xbf16> to vector<2x128xbf16>
    %c0_71 = arith.constant 0 : index
    %c16_72 = arith.constant 16 : index
    %60 = vector.load %arg12[%c0_71, %c16_72] : memref<10x160xbf16, #tpu.memory_space<vmem>>, vector<2x128xbf16>
    tpu.vector_store %arg12[%c0_71, %c16_72], %59 {strides = array<i32>} : memref<10x160xbf16, #tpu.memory_space<vmem>>, vector<2x128xbf16>,
    %61 = vector.extract_strided_slice %58 {offsets = [2, 0], sizes = [2, 128], strides = [1, 1]} : vector<16x128xbf16> to vector<2x128xbf16>
    %c2_73 = arith.constant 2 : index
    %c16_74 = arith.constant 16 : index
    %62 = vector.load %arg11[%c2_73, %c16_74] : memref<10x160xbf16, #tpu.memory_space<vmem>>, vector<2x128xbf16>
    tpu.vector_store %arg11[%c2_73, %c16_74], %61 {strides = array<i32>} : memref<10x160xbf16, #tpu.memory_space<vmem>>, vector<2x128xbf16>,
    %63 = vector.extract_strided_slice %58 {offsets = [4, 0], sizes = [2, 128], strides = [1, 1]} : vector<16x128xbf16> to vector<2x128xbf16>
    %c2_75 = arith.constant 2 : index
    %c16_76 = arith.constant 16 : index
    %64 = vector.load %arg12[%c2_75, %c16_76] : memref<10x160xbf16, #tpu.memory_space<vmem>>, vector<2x128xbf16>
    tpu.vector_store %arg12[%c2_75, %c16_76], %63 {strides = array<i32>} : memref<10x160xbf16, #tpu.memory_space<vmem>>, vector<2x128xbf16>,
    %65 = vector.extract_strided_slice %58 {offsets = [6, 0], sizes = [2, 128], strides = [1, 1]} : vector<16x128xbf16> to vector<2x128xbf16>
    %c4_77 = arith.constant 4 : index
    %c16_78 = arith.constant 16 : index
    %66 = vector.load %arg11[%c4_77, %c16_78] : memref<10x160xbf16, #tpu.memory_space<vmem>>, vector<2x128xbf16>
    tpu.vector_store %arg11[%c4_77, %c16_78], %65 {strides = array<i32>} : memref<10x160xbf16, #tpu.memory_space<vmem>>, vector<2x128xbf16>,
    %67 = vector.extract_strided_slice %58 {offsets = [8, 0], sizes = [2, 128], strides = [1, 1]} : vector<16x128xbf16> to vector<2x128xbf16>
    %c4_79 = arith.constant 4 : index
    %c16_80 = arith.constant 16 : index
    %68 = vector.load %arg12[%c4_79, %c16_80] : memref<10x160xbf16, #tpu.memory_space<vmem>>, vector<2x128xbf16>
    tpu.vector_store %arg12[%c4_79, %c16_80], %67 {strides = array<i32>} : memref<10x160xbf16, #tpu.memory_space<vmem>>, vector<2x128xbf16>,
    %69 = vector.extract_strided_slice %58 {offsets = [10, 0], sizes = [2, 128], strides = [1, 1]} : vector<16x128xbf16> to vector<2x128xbf16>
    %c6 = arith.constant 6 : index
    %c16_81 = arith.constant 16 : index
    %70 = vector.load %arg11[%c6, %c16_81] : memref<10x160xbf16, #tpu.memory_space<vmem>>, vector<2x128xbf16>
    tpu.vector_store %arg11[%c6, %c16_81], %69 {strides = array<i32>} : memref<10x160xbf16, #tpu.memory_space<vmem>>, vector<2x128xbf16>,
    %71 = vector.extract_strided_slice %58 {offsets = [12, 0], sizes = [2, 128], strides = [1, 1]} : vector<16x128xbf16> to vector<2x128xbf16>
    %c6_82 = arith.constant 6 : index
    %c16_83 = arith.constant 16 : index
    %72 = vector.load %arg12[%c6_82, %c16_83] : memref<10x160xbf16, #tpu.memory_space<vmem>>, vector<2x128xbf16>
    tpu.vector_store %arg12[%c6_82, %c16_83], %71 {strides = array<i32>} : memref<10x160xbf16, #tpu.memory_space<vmem>>, vector<2x128xbf16>,
    %73 = vector.extract_strided_slice %58 {offsets = [14, 0], sizes = [2, 128], strides = [1, 1]} : vector<16x128xbf16> to vector<2x128xbf16>
    %c8_84 = arith.constant 8 : index
    %c16_85 = arith.constant 16 : index
    %74 = vector.load %arg11[%c8_84, %c16_85] : memref<10x160xbf16, #tpu.memory_space<vmem>>, vector<2x128xbf16>
    tpu.vector_store %arg11[%c8_84, %c16_85], %73 {strides = array<i32>} : memref<10x160xbf16, #tpu.memory_space<vmem>>, vector<2x128xbf16>,
    %cst_86 = arith.constant 0.000000e+00 : f32
    %75 = vector.broadcast %cst_86 : f32 to vector<8x128xf32>
    %c0_87 = arith.constant 0 : index
    %c0_88 = arith.constant 0 : index
    %76 = vector.load %arg11[%c0_87, %c0_88] : memref<10x160xbf16, #tpu.memory_space<vmem>>, vector<8x160xbf16>
    %c0_89 = arith.constant 0 : index
    %c0_90 = arith.constant 0 : index
    %c0_91 = arith.constant 0 : index
    %77 = vector.load %arg4[%c0_89, %c0_90, %c0_91] : memref<4x160x128xbf16, #tpu.memory_space<vmem>>, vector<1x160x128xbf16>
    %78 = vector.shape_cast %77 : vector<1x160x128xbf16> to vector<160x128xbf16>
    %cst_92 = arith.constant dense<0.000000e+00> : vector<8x128xf32>
    %79 = tpu.matmul %76, %78, %cst_92 {dimension_numbers = #tpu.dot_dimension_numbers<[1], [0], [0], [1], [0, 0, 1, 1], [], []>} : vector<8x160xbf16>, vector<160x128xbf16>, vector<8x128xf32> -> vector<8x128xf32>
    %80 = arith.addf %75, %79 : vector<8x128xf32>
    %c0_93 = arith.constant 0 : index
    %c0_94 = arith.constant 0 : index
    %81 = vector.load %arg12[%c0_93, %c0_94] : memref<10x160xbf16, #tpu.memory_space<vmem>>, vector<8x160xbf16>
    %c1_95 = arith.constant 1 : index
    %c0_96 = arith.constant 0 : index
    %c0_97 = arith.constant 0 : index
    %82 = vector.load %arg4[%c1_95, %c0_96, %c0_97] : memref<4x160x128xbf16, #tpu.memory_space<vmem>>, vector<1x160x128xbf16>
    %83 = vector.shape_cast %82 : vector<1x160x128xbf16> to vector<160x128xbf16>
    %cst_98 = arith.constant dense<0.000000e+00> : vector<8x128xf32>
    %84 = tpu.matmul %81, %83, %cst_98 {dimension_numbers = #tpu.dot_dimension_numbers<[1], [0], [0], [1], [0, 0, 1, 1], [], []>} : vector<8x160xbf16>, vector<160x128xbf16>, vector<8x128xf32> -> vector<8x128xf32>
    %85 = arith.addf %80, %84 : vector<8x128xf32>
    %c2_99 = arith.constant 2 : index
    %c0_100 = arith.constant 0 : index
    %86 = vector.load %arg11[%c2_99, %c0_100] : memref<10x160xbf16, #tpu.memory_space<vmem>>, vector<8x160xbf16>
    %c2_101 = arith.constant 2 : index
    %c0_102 = arith.constant 0 : index
    %c0_103 = arith.constant 0 : index
    %87 = vector.load %arg4[%c2_101, %c0_102, %c0_103] : memref<4x160x128xbf16, #tpu.memory_space<vmem>>, vector<1x160x128xbf16>
    %88 = vector.shape_cast %87 : vector<1x160x128xbf16> to vector<160x128xbf16>
    %cst_104 = arith.constant dense<0.000000e+00> : vector<8x128xf32>
    %89 = tpu.matmul %86, %88, %cst_104 {dimension_numbers = #tpu.dot_dimension_numbers<[1], [0], [0], [1], [0, 0, 1, 1], [], []>} : vector<8x160xbf16>, vector<160x128xbf16>, vector<8x128xf32> -> vector<8x128xf32>
    %90 = arith.addf %85, %89 : vector<8x128xf32>
    %c2_105 = arith.constant 2 : index
    %c0_106 = arith.constant 0 : index
    %91 = vector.load %arg12[%c2_105, %c0_106] : memref<10x160xbf16, #tpu.memory_space<vmem>>, vector<8x160xbf16>
    %c3_107 = arith.constant 3 : index
    %c0_108 = arith.constant 0 : index
    %c0_109 = arith.constant 0 : index
    %92 = vector.load %arg4[%c3_107, %c0_108, %c0_109] : memref<4x160x128xbf16, #tpu.memory_space<vmem>>, vector<1x160x128xbf16>
    %93 = vector.shape_cast %92 : vector<1x160x128xbf16> to vector<160x128xbf16>
    %cst_110 = arith.constant dense<0.000000e+00> : vector<8x128xf32>
    %94 = tpu.matmul %91, %93, %cst_110 {dimension_numbers = #tpu.dot_dimension_numbers<[1], [0], [0], [1], [0, 0, 1, 1], [], []>} : vector<8x160xbf16>, vector<160x128xbf16>, vector<8x128xf32> -> vector<8x128xf32>
    %95 = arith.addf %90, %94 : vector<8x128xf32>
    %c0_111 = arith.constant 0 : index
    %c0_112 = arith.constant 0 : index
    %96 = vector.load %arg5[%c0_111, %c0_112] : memref<1x128xf32, #tpu.memory_space<vmem>>, vector<1x128xf32>
    %97 = vector.broadcast %96 : vector<1x128xf32> to vector<8x128xf32>
    %98 = arith.addf %95, %97 : vector<8x128xf32>
    %cst_113 = arith.constant 0.000000e+00 : f32
    %99 = vector.broadcast %cst_113 : f32 to vector<8x128xf32>
    %100 = arith.maximumf %98, %99 : vector<8x128xf32>
    %101 = arith.truncf %100 : vector<8x128xf32> to vector<8x128xbf16>
    %102 = vector.extract_strided_slice %101 {offsets = [0, 0], sizes = [2, 128], strides = [1, 1]} : vector<8x128xbf16> to vector<2x128xbf16>
    %c0_114 = arith.constant 0 : index
    %c32 = arith.constant 32 : index
    %103 = vector.load %arg14[%c0_114, %c32] : memref<6x192xbf16, #tpu.memory_space<vmem>>, vector<2x128xbf16>
    tpu.vector_store %arg14[%c0_114, %c32], %102 {strides = array<i32>} : memref<6x192xbf16, #tpu.memory_space<vmem>>, vector<2x128xbf16>,
    %104 = vector.extract_strided_slice %101 {offsets = [2, 0], sizes = [2, 128], strides = [1, 1]} : vector<8x128xbf16> to vector<2x128xbf16>
    %c2_115 = arith.constant 2 : index
    %c32_116 = arith.constant 32 : index
    %105 = vector.load %arg13[%c2_115, %c32_116] : memref<6x192xbf16, #tpu.memory_space<vmem>>, vector<2x128xbf16>
    tpu.vector_store %arg13[%c2_115, %c32_116], %104 {strides = array<i32>} : memref<6x192xbf16, #tpu.memory_space<vmem>>, vector<2x128xbf16>,
    %106 = vector.extract_strided_slice %101 {offsets = [4, 0], sizes = [2, 128], strides = [1, 1]} : vector<8x128xbf16> to vector<2x128xbf16>
    %c2_117 = arith.constant 2 : index
    %c32_118 = arith.constant 32 : index
    %107 = vector.load %arg14[%c2_117, %c32_118] : memref<6x192xbf16, #tpu.memory_space<vmem>>, vector<2x128xbf16>
    tpu.vector_store %arg14[%c2_117, %c32_118], %106 {strides = array<i32>} : memref<6x192xbf16, #tpu.memory_space<vmem>>, vector<2x128xbf16>,
    %108 = vector.extract_strided_slice %101 {offsets = [6, 0], sizes = [2, 128], strides = [1, 1]} : vector<8x128xbf16> to vector<2x128xbf16>
    %c4_119 = arith.constant 4 : index
    %c32_120 = arith.constant 32 : index
    %109 = vector.load %arg13[%c4_119, %c32_120] : memref<6x192xbf16, #tpu.memory_space<vmem>>, vector<2x128xbf16>
    tpu.vector_store %arg13[%c4_119, %c32_120], %108 {strides = array<i32>} : memref<6x192xbf16, #tpu.memory_space<vmem>>, vector<2x128xbf16>,
    %cst_121 = arith.constant 0.000000e+00 : f32
    %110 = vector.broadcast %cst_121 : f32 to vector<4x128xf32>
    %c0_122 = arith.constant 0 : index
    %c0_123 = arith.constant 0 : index
    %111 = vector.load %arg13[%c0_122, %c0_123] : memref<6x192xbf16, #tpu.memory_space<vmem>>, vector<4x192xbf16>
    %c0_124 = arith.constant 0 : index
    %c0_125 = arith.constant 0 : index
    %c0_126 = arith.constant 0 : index
    %112 = vector.load %arg6[%c0_124, %c0_125, %c0_126] : memref<4x192x128xbf16, #tpu.memory_space<vmem>>, vector<1x192x128xbf16>
    %113 = vector.shape_cast %112 : vector<1x192x128xbf16> to vector<192x128xbf16>
    %cst_127 = arith.constant dense<0.000000e+00> : vector<4x128xf32>
    %114 = tpu.matmul %111, %113, %cst_127 {dimension_numbers = #tpu.dot_dimension_numbers<[1], [0], [0], [1], [0, 0, 1, 1], [], []>} : vector<4x192xbf16>, vector<192x128xbf16>, vector<4x128xf32> -> vector<4x128xf32>
    %115 = arith.addf %110, %114 : vector<4x128xf32>
    %c0_128 = arith.constant 0 : index
    %c0_129 = arith.constant 0 : index
    %116 = vector.load %arg14[%c0_128, %c0_129] : memref<6x192xbf16, #tpu.memory_space<vmem>>, vector<4x192xbf16>
    %c1_130 = arith.constant 1 : index
    %c0_131 = arith.constant 0 : index
    %c0_132 = arith.constant 0 : index
    %117 = vector.load %arg6[%c1_130, %c0_131, %c0_132] : memref<4x192x128xbf16, #tpu.memory_space<vmem>>, vector<1x192x128xbf16>
    %118 = vector.shape_cast %117 : vector<1x192x128xbf16> to vector<192x128xbf16>
    %cst_133 = arith.constant dense<0.000000e+00> : vector<4x128xf32>
    %119 = tpu.matmul %116, %118, %cst_133 {dimension_numbers = #tpu.dot_dimension_numbers<[1], [0], [0], [1], [0, 0, 1, 1], [], []>} : vector<4x192xbf16>, vector<192x128xbf16>, vector<4x128xf32> -> vector<4x128xf32>
    %120 = arith.addf %115, %119 : vector<4x128xf32>
    %c2_134 = arith.constant 2 : index
    %c0_135 = arith.constant 0 : index
    %121 = vector.load %arg13[%c2_134, %c0_135] : memref<6x192xbf16, #tpu.memory_space<vmem>>, vector<4x192xbf16>
    %c2_136 = arith.constant 2 : index
    %c0_137 = arith.constant 0 : index
    %c0_138 = arith.constant 0 : index
    %122 = vector.load %arg6[%c2_136, %c0_137, %c0_138] : memref<4x192x128xbf16, #tpu.memory_space<vmem>>, vector<1x192x128xbf16>
    %123 = vector.shape_cast %122 : vector<1x192x128xbf16> to vector<192x128xbf16>
    %cst_139 = arith.constant dense<0.000000e+00> : vector<4x128xf32>
    %124 = tpu.matmul %121, %123, %cst_139 {dimension_numbers = #tpu.dot_dimension_numbers<[1], [0], [0], [1], [0, 0, 1, 1], [], []>} : vector<4x192xbf16>, vector<192x128xbf16>, vector<4x128xf32> -> vector<4x128xf32>
    %125 = arith.addf %120, %124 : vector<4x128xf32>
    %c2_140 = arith.constant 2 : index
    %c0_141 = arith.constant 0 : index
    %126 = vector.load %arg14[%c2_140, %c0_141] : memref<6x192xbf16, #tpu.memory_space<vmem>>, vector<4x192xbf16>
    %c3_142 = arith.constant 3 : index
    %c0_143 = arith.constant 0 : index
    %c0_144 = arith.constant 0 : index
    %127 = vector.load %arg6[%c3_142, %c0_143, %c0_144] : memref<4x192x128xbf16, #tpu.memory_space<vmem>>, vector<1x192x128xbf16>
    %128 = vector.shape_cast %127 : vector<1x192x128xbf16> to vector<192x128xbf16>
    %cst_145 = arith.constant dense<0.000000e+00> : vector<4x128xf32>
    %129 = tpu.matmul %126, %128, %cst_145 {dimension_numbers = #tpu.dot_dimension_numbers<[1], [0], [0], [1], [0, 0, 1, 1], [], []>} : vector<4x192xbf16>, vector<192x128xbf16>, vector<4x128xf32> -> vector<4x128xf32>
    %130 = arith.addf %125, %129 : vector<4x128xf32>
    %c0_146 = arith.constant 0 : index
    %c0_147 = arith.constant 0 : index
    %131 = vector.load %arg7[%c0_146, %c0_147] : memref<1x128xf32, #tpu.memory_space<vmem>>, vector<1x128xf32>
    %132 = vector.broadcast %131 : vector<1x128xf32> to vector<4x128xf32>
    %133 = arith.addf %130, %132 : vector<4x128xf32>
    %cst_148 = arith.constant 0.000000e+00 : f32
    %134 = vector.broadcast %cst_148 : f32 to vector<4x128xf32>
    %135 = arith.maximumf %133, %134 : vector<4x128xf32>
    %c0_149 = arith.constant 0 : index
    %c0_150 = arith.constant 0 : index
    %c0_151 = arith.constant 0 : index
    %136 = vector.load %arg8[%c0_149, %c0_150, %c0_151] : memref<1x4x128xf32, #tpu.memory_space<vmem>>, vector<1x4x128xf32>
    %137 = vector.shape_cast %136 : vector<1x4x128xf32> to vector<4x128xf32>
    %138 = vector.shape_cast %135 : vector<4x128xf32> to vector<1x4x128xf32>
    tpu.vector_store %arg8[%c0_149, %c0_150, %c0_151], %138 {strides = array<i32>} : memref<1x4x128xf32, #tpu.memory_space<vmem>>, vector<1x4x128xf32>,
    return
  }
  func.func @transform_0(%arg0: i32) -> (i32, i32, i32, i32) {
    %c0_i32 = arith.constant 0 : i32
    %c0_i32_0 = arith.constant 0 : i32
    %c0_i32_1 = arith.constant 0 : i32
    %c0_i32_2 = arith.constant 0 : i32
    return %arg0, %c0_i32, %c0_i32_0, %c0_i32_1 : i32, i32, i32, i32
  }
  func.func @transform_1(%arg0: i32) -> (i32, i32, i32) {
    %c0_i32 = arith.constant 0 : i32
    %c0_i32_0 = arith.constant 0 : i32
    %c0_i32_1 = arith.constant 0 : i32
    %c0_i32_2 = arith.constant 0 : i32
    return %c0_i32, %c0_i32_0, %c0_i32_1 : i32, i32, i32
  }
  func.func @transform_2(%arg0: i32) -> (i32, i32) {
    %c0_i32 = arith.constant 0 : i32
    %c0_i32_0 = arith.constant 0 : i32
    %c0_i32_1 = arith.constant 0 : i32
    return %c0_i32, %c0_i32_0 : i32, i32
  }
  func.func @transform_3(%arg0: i32) -> (i32, i32, i32) {
    %c0_i32 = arith.constant 0 : i32
    %c0_i32_0 = arith.constant 0 : i32
    %c0_i32_1 = arith.constant 0 : i32
    %c0_i32_2 = arith.constant 0 : i32
    return %c0_i32, %c0_i32_0, %c0_i32_1 : i32, i32, i32
  }
  func.func @transform_4(%arg0: i32) -> (i32, i32) {
    %c0_i32 = arith.constant 0 : i32
    %c0_i32_0 = arith.constant 0 : i32
    %c0_i32_1 = arith.constant 0 : i32
    return %c0_i32, %c0_i32_0 : i32, i32
  }
  func.func @transform_5(%arg0: i32) -> (i32, i32, i32) {
    %c0_i32 = arith.constant 0 : i32
    %c0_i32_0 = arith.constant 0 : i32
    %c0_i32_1 = arith.constant 0 : i32
    %c0_i32_2 = arith.constant 0 : i32
    return %c0_i32, %c0_i32_0, %c0_i32_1 : i32, i32, i32
  }
  func.func @transform_6(%arg0: i32) -> (i32, i32) {
    %c0_i32 = arith.constant 0 : i32
    %c0_i32_0 = arith.constant 0 : i32
    %c0_i32_1 = arith.constant 0 : i32
    return %c0_i32, %c0_i32_0 : i32, i32
  }
  func.func @transform_7(%arg0: i32) -> (i32, i32, i32) {
    %c0_i32 = arith.constant 0 : i32
    %c0_i32_0 = arith.constant 0 : i32
    %c0_i32_1 = arith.constant 0 : i32
    return %arg0, %c0_i32, %c0_i32_0 : i32, i32, i32
  }
}

</mosaic_0001>

<bundles_post_ra>
// kernel: vae_encoder_forward.1
= control target key start
LH: loop header
LB: loop body
LE: loop exit
PB: predicated region body
PF: predicated region fallthrough
CT: control target
= control target key end

     0   :  { %vm47_vm0 = vcmask 258052   ;;  %vm63_vm1 = vcmask 520196   ;;  %vm46_vm2 = vcmask 1040384   ;;  %vm103_vm3 = vcmask 1044484   ;;  %s2246_s28 = smov 16   ;;  %s2247_s17 = smov 32   ;;  %s2841_s0 = inlined_call_operand.vmem [shape: f32[1,2,16,48], index: 0, kind: input, shape index: {}]   ;;  %s2842_s1 = inlined_call_operand.vmem [shape: bf16[4,54,128], index: 1, kind: input, shape index: {}]   ;;  %s2843_s3 = inlined_call_operand.vmem [shape: bf16[4,160,128], index: 3, kind: input, shape index: {}]   ;;  %s2844_s2 = inlined_call_operand.vmem [shape: f32[1,128], index: 2, kind: input, shape index: {}]   ;;  %s2845_s5 = inlined_call_operand.vmem [shape: bf16[4,192,128], index: 5, kind: input, shape index: {}]   ;;  %s2846_s4 = inlined_call_operand.vmem [shape: f32[1,128], index: 4, kind: input, shape index: {}]   ;;  %s2847_s6 = inlined_call_operand.vmem [shape: f32[1,128], index: 6, kind: input, shape index: {}]   ;;  %s2848_s7 = inlined_call_operand.vmem [shape: f32[1,4,128], index: 7, kind: output, shape index: {}]  }
   0x1   :  { %v76_v0 = vld [vmem:[%s2841_s0] sm:$0xff]  ;;  %v1730_v1 = vld [vmem:[%s2841_s0 + $0x10] sm:$0xff]  ;;  %v77_v2 = vld [vmem:[%s2841_s0 + $0x8] sm:$0xff]  ;;  %v2242_v6 = vmov 0.0   ;;  %vm173_vm5 = vcmask 1042432   ;;  %vm30_vm6 = vcmask 19456  }
   0x2   :  { %v2033_v3 = vpack.c.bf16 %v76_v0, %v76_v0  ;;  %v2035_v4 = vpack.c.bf16 %v1730_v1, %v1730_v1  ;;  %vm48_vm4 = vmor %vm47_vm0, %vm46_vm2  ;;  %v1731_v5 = vld [vmem:[%s2841_s0 + $0x18] sm:$0xff]  ;;  %2060 = vmatprep.subr.bf16.mxu0 %v2242_v6  ;;  %2072 = vmatprep.subr.bf16.mxu1 %v2242_v6  ;;  %v2243_v7 = vmov 0   ;;  %v2114_v9 = vld [vmem:[%s2842_s1 + $0x34] ss:$0 sps:$4 sm:$0x77]   ;;  %vm35_vm8 = vcmask 437656  }
   0x3   :  { %49 = vst.msk [vmem:[#allocation4] sm:$0x11] %vm48_vm4, %v2243_v7  ;;  %50 = vst.msk [vmem:[#allocation5 + $0x8] sm:$0x11] %vm48_vm4, %v2243_v7  ;;  %v2036_v8 = vpack.c.bf16 %v1731_v5, %v1731_v5  ;;  %vm27_vm9 = vcmask 434176   ;;  %s2244_s0 = smov 3   ;;  %v2034_v11 = vpack.c.bf16 %v77_v2, %v77_v2 }
   0x4   :  { %vm64_vm7 = vmor %vm63_vm1, %vm46_vm2  ;;  %40 = vst.msk [vmem:[#allocation3] sm:$0xf] %vm30_vm6, %v2243_v7  ;;  %84 = vrot.lane.b32.xlu0 %v2033_v3, %s2244_s0  ;;  %v105_v10 = vrot.slane %v2035_v4, 7  ;;  %v2115_v12 = vld [vmem:[%s2842_s1 + $0x18] ss:$0 sps:$4 sm:$0x77]  }
   0x5   :  { %32 = vst.msk [vmem:[#allocation2 + $0x4] sm:$0xf] %vm30_vm6, %v2243_v7  ;;  %41 = vst.msk [vmem:[#allocation3 + $0x4] sm:$0xf] %vm30_vm6, %v2243_v7  ;;  %v107_v13 = vrot.slane %v2036_v8, 7  ;;  %v175_v14 = vsel %vm173_vm5, %v2114_v9, 0 }
   0x6   :  { %65 = vst.msk [vmem:[#allocation6] sm:$0x11] %vm64_vm7, %v2243_v7  ;;  %vm104_vm10 = vmor %vm46_vm2, %vm103_vm3  ;;  %v2116_v15 = vld [vmem:[%s2842_s1 + $0x2c] sm:$0xff]   ;;  %110 = vrot.lane.b32.xlu1 %v105_v10, %s2244_s0  ;;  %v106_v16 = vrot.slane %v105_v10, 4  ;;  %2061 = vmatpush3.bf16.msra.mxu0 %v175_v14  ;;  %v248_v17 = vsel %vm173_vm5, %v2115_v12, 0  ;;  %vm33_vm11 = vcmask 16384  }
   0x7   :  { %43 = vst.msk [vmem:[#allocation3] sm:$0xf] %vm35_vm8, %v2243_v7  ;;  %37 = vst.msk [vmem:[#allocation2 + $0x4] sm:$0xf] %vm35_vm8, %v2243_v7  ;;  %2073 = vmatpush3.bf16.msra.mxu1 %v248_v17  ;;  %2062 = vmatprep.subr.bf16.mxu0 %v2242_v6  ;;  %v2117_v18 = vld [vmem:[%s2842_s1 + $0x10] sm:$0xff]   ;;  %v109_v20 = vrot.slane %v107_v13, 4 }
   0x8   :  { %44 = vst.msk [vmem:[#allocation3 + $0x4] sm:$0xf] %vm35_vm8, %v2243_v7  ;;  %86 = vrot.lane.b32.xlu0 %v2034_v11, %s2244_s0  ;;  %v108_v19 = vsel %vm104_vm10, %v106_v16, %v107_v13  ;;  %2074 = vmatprep.subr.bf16.mxu1 %v2242_v6  ;;  %vm38_vm12 = vcmask 434584   ;;  %v2118_v21 = vld [vmem:[%s2842_s1 + $0x24] sm:$0xff]   ;;  %vm2245_vm13 = vmmov 0   ;;  %v2120_v25 = vld [vmem:[%s2842_s1 + $0x1c] sm:$0xff]  }
   0x9   :  { %28 = vst.msk [vmem:[#allocation2] sm:$0x1] %vm27_vm9, %v2243_v7  ;;  %29 = vst.msk [vmem:[#allocation3 + $0x8] sm:$0x1] %vm27_vm9, %v2243_v7  ;;  %v2119_v22 = vld [vmem:[%s2842_s1 + $0x8] sm:$0xff]   ;;  %2068 = vmatprep.mubr.msk.bf16.mxu0 %vm2245_vm13, %v2242_v6  ;;  %2080 = vmatprep.mubr.msk.bf16.mxu1 %vm2245_vm13, %v2242_v6  ;;  %v2121_v27 = vld [vmem:[%s2842_s1] sm:$0xff]  }
   0xa   :  { %31 = vst.msk [vmem:[#allocation2] sm:$0xf] %vm30_vm6, %v2243_v7  ;;  %112 = vrot.lane.b32.xlu1 %v108_v19, %s2244_s0  ;;  %2063 = vmatpush3.bf16.msra.mxu0 %v2116_v15  ;;  %v2123_v23 = vld [vmem:[%s2842_s1 + $0x50] ss:$0 sps:$4 sm:$0x77]   ;;  %vm90_vm14 = vcmask 412696  }
   0xb   :  { %36 = vst.msk [vmem:[#allocation2] sm:$0xf] %vm35_vm8, %v2243_v7  ;;  %2075 = vmatpush3.bf16.msra.mxu1 %v2117_v18  ;;  %2064 = vmatprep.subr.bf16.mxu0 %v2242_v6  ;;  %v2125_v24 = vld [vmem:[%s2842_s1 + $0x6c] ss:$0 sps:$4 sm:$0x77]   ;;  %v339_v26 = vsel %vm173_vm5, %v2123_v23, 0 }
   0xc   :  { %34 = vst.msk [vmem:[#allocation2 + $0x8] sm:$0x1] %vm33_vm11, %v2243_v7  ;;  %42 = vst.msk [vmem:[#allocation3 + $0x8] sm:$0x1] %vm33_vm11, %v2243_v7  ;;  %114 = vrot.lane.b32.xlu0 %v109_v20, %s2244_s0  ;;  %2076 = vmatprep.subr.bf16.mxu1 %v2242_v6  ;;  %v431_v28 = vsel %vm173_vm5, %v2125_v24, 0  ;;  %vm119_vm15 = vcmask 412697  }
   0xd   :  { %39 = vst.msk [vmem:[#allocation2 + $0x8] sm:$0x1] %vm38_vm12, %v2243_v7  ;;  %45 = vst.msk [vmem:[#allocation3 + $0x8] sm:$0x1] %vm38_vm12, %v2243_v7  ;;  %vm122_vm1 = vcmask 409624   ;;  %vm169_vm2 = vcmask 441344  }
   0xe   :  { %2065 = vmatpush3.bf16.msra.mxu0 %v2118_v21  ;;  %v2126_v36 = vld [vmem:[%s2842_s1 + $0x48] sm:$0xff]   ;;  %v2128_v38 = vld [vmem:[%s2842_s1 + $0x40] sm:$0xff]   ;;  %v2130_v42 = vld [vmem:[%s2842_s1 + $0x38] sm:$0xff]   ;;  %vm310_vm3 = vcmask 1046528   ;;  %vm51_vm4 = vcmask 125952   ;;  %vm55_vm5 = vcmask 257152  }
   0xf   :  { %2077 = vmatpush3.bf16.msra.mxu1 %v2119_v22  ;;  %2066 = vmatprep.subr.bf16.mxu0 %v2242_v6  ;;  %v2127_v37 = vld [vmem:[%s2842_s1 + $0x64] sm:$0xff]   ;;  %v2129_v39 = vld [vmem:[%s2842_s1 + $0x5c] sm:$0xff]   ;;  %v2131_v45 = vld [vmem:[%s2842_s1 + $0x54] sm:$0xff]   ;;  %52 = vst.msk [vmem:[#allocation4] sm:$0xf] %vm51_vm4, %v2243_v7  ;;  %vm53_vm6 = vcmask 122880  }
  0x10   :  { %2078 = vmatprep.subr.bf16.mxu1 %v2242_v6  ;;  %v2136_v52 = vld [vmem:[%s2843_s3 + $0x88] sm:$0xff]   ;;  %56 = vst.msk [vmem:[#allocation4 + $0x4] sm:$0xf] %vm55_vm5, %v2243_v7  ;;  %61 = vst.msk [vmem:[#allocation5 + $0x4] sm:$0xf] %vm55_vm5, %v2243_v7  ;;  %v2137_v53 = vld [vmem:[%s2843_s3 + $0x38] sm:$0xff]  }
  0x11   :  { %59 = vst.msk [vmem:[#allocation5] sm:$0xf] %vm51_vm4, %v2243_v7  ;;  %v2138_v54 = vld [vmem:[%s2843_s3 + $0x80] sm:$0xff]   ;;  %v2139_v55 = vld [vmem:[%s2843_s3 + $0x30] sm:$0xff]   ;;  %v2140_v56 = vld [vmem:[%s2843_s3 + $0x78] sm:$0xff]   ;;  %vm57_vm7 = vcmask 254080  }
  0x12   :  { %2067 = vmatpush3.bf16.msra.mxu0 %v2120_v25  ;;  %v2141_v57 = vld [vmem:[%s2843_s3 + $0x28] sm:$0xff]   ;;  %v2142_v58 = vld [vmem:[%s2843_s3 + $0x70] sm:$0xff]   ;;  %v2143_v59 = vld [vmem:[%s2843_s3 + $0x20] sm:$0xff]   ;;  %54 = vst.msk [vmem:[#allocation4 + $0x8] sm:$0x1] %vm53_vm6, %v2243_v7  ;;  %vm497_vm8 = vcmask 1040512  }
  0x13   :  { %2079 = vmatpush3.bf16.msra.mxu1 %v2121_v27  ;;  %2084 = vmatprep.subr.bf16.mxu0 %v2242_v6  ;;  %v2144_v60 = vld [vmem:[%s2843_s3 + $0x68] sm:$0xff]   ;;  %v2145_v61 = vld [vmem:[%s2843_s3 + $0x18] sm:$0xff]   ;;  %v2147_v8 = vld [vmem:[%s2843_s3 + $0x10] sm:$0xff]   ;;  %58 = vst.msk [vmem:[#allocation4 + $0xc] sm:$0x1] %vm57_vm7, %v2243_v7  ;;  %vm498_vm9 = vcmask 126980  }
  0x14   :  { %2096 = vmatprep.subr.bf16.mxu1 %v2242_v6  ;;  %v2135_v41 = vld [vmem:[#allocation3 + $0x8] ss:$0 sps:$4 sm:$0x11]   ;;  %v2148_v11 = vld [vmem:[%s2843_s3 + $0x58] sm:$0xff]   ;;  %v2149_v12 = vld [vmem:[%s2843_s3 + $0x8] sm:$0xff]   ;;  %vm501_vm10 = vcmask 1041537  }
  0x15   :  { %v404_v49 = vrot.slane %v2135_v41, 1  ;;  %v1781_v16 = vld [vmem:[%s2844_s2] ss:$0 sm:$0xff]  ;;  %v2150_v21 = vld [vmem:[%s2843_s3 + $0x50] sm:$0xff]   ;;  %60 = vst.msk [vmem:[#allocation5 + $0x8] sm:$0x1] %vm53_vm6, %v2243_v7 }
  0x16   :  { %v2151_v22 = vld [vmem:[%s2843_s3] sm:$0xff]   ;;  %62 = vst.msk [vmem:[#allocation5 + $0xc] sm:$0x1] %vm57_vm7, %v2243_v7  ;;  %vm502_vm11 = vcmask 128005   ;;  %vm494_vm12 = vcmask 130048   ;;  %vm527_vm4 = vcmask 130055  }
  0x17   :  { %vm653_vm6 = vcmask 261120   ;;  %vm70_vm7 = vcmask 256000  }
  0x18   :  { %71 = vst.msk [vmem:[#allocation6] sm:$0x7] %vm70_vm7, %v2243_v7 }
  0x76   :  { %v85_v29 = vpop.permute.xlu0 %84 }
  0x77   :  { %91 = vst.msk [vmem:[#allocation3] sm:$0xf] %vm90_vm14, %v85_v29 }
  0x78   :  { %v111_v30 = vpop.permute.xlu1 %110 }
  0x79   :  { %120 = vst.msk [vmem:[#allocation2] sm:$0xe] %vm119_vm15, %v111_v30  ;;  %v2152_v30 = vld [vmem:[%s2843_s3 + $0x98] sm:$0xff]   ;;  %vm514_vm15 = vcmask 129030  }
  0x7a   :  { %v87_v31 = vpop.permute.xlu0 %86 }
  0x7b   :  { %92 = vst.msk [vmem:[#allocation3 + $0x4] sm:$0xf] %vm90_vm14, %v87_v31  ;;  %v2153_v31 = vld [vmem:[%s2843_s3 + $0x48] sm:$0xff]  }
  0x7c   :  { %v113_v32 = vpop.permute.xlu1 %112 }
  0x7d   :  { %121 = vst.msk [vmem:[#allocation2 + $0x4] sm:$0xf] %vm90_vm14, %v113_v32  ;;  %vm513_vm14 = vcmask 1042562  }
  0x7e   :  { %v115_v33 = vpop.permute.xlu0 %114 }
  0x7f   :  { %123 = vst.msk [vmem:[#allocation2 + $0x8] sm:$0x1] %vm122_vm1, %v115_v33  ;;  %vm503_vm1 = vmor %vm502_vm11, %vm501_vm10  ;;  %vm67_vm10 = vcmask 522246  }
  0x82   :  { %v2122_v34 = vld [vmem:[#allocation3] sm:$0xff]  }
  0x83   :  { %2069 = vmatmul.mubr.msk.bf16.vlgmr.msra.gmra.mxu0 %vm169_vm2, %v2122_v34  ;;  %v2134_v44 = vld [vmem:[#allocation3] sm:$0xfe]  }
  0x84   :  { %v2124_v35 = vld [vmem:[#allocation2] sm:$0xff]   ;;  %2085 = vmatpush3.bf16.msra.mxu0 %v339_v26  ;;  %2092 = vmatprep.mubr.msk.bf16.mxu0 %vm2245_vm13, %v2242_v6  ;;  %v403_v48 = vrot.slane %v2134_v44, 1 }
  0x85   :  { %2081 = vmatmul.mubr.msk.bf16.vlgmr.msra.gmra.mxu1 %vm169_vm2, %v2124_v35  ;;  %2086 = vmatprep.subr.bf16.mxu0 %v2242_v6  ;;  %v2132_v43 = vld [vmem:[#allocation2] sm:$0xfe]  }
  0x86   :  { %2097 = vmatpush3.bf16.msra.mxu1 %v431_v28  ;;  %2104 = vmatprep.mubr.msk.bf16.mxu1 %vm2245_vm13, %v2242_v6  ;;  %v2133_v40 = vld [vmem:[#allocation2 + $0x8] ss:$0 sps:$4 sm:$0x11]   ;;  %v311_v47 = vrot.slane %v2132_v43, 1  ;;  %v405_v51 = vsel %vm310_vm3, %v403_v48, %v404_v49  ;;  %vm2509_vm13 = vmor %vm498_vm9, %vm497_vm8  ;;  %vm72_vm8 = vcmask 518400   ;;  %vm66_vm9 = vcmask 1042434  }
  0x87   :  { %2098 = vmatprep.subr.bf16.mxu1 %v2242_v6  ;;  %v312_v46 = vrot.slane %v2133_v40, 1  ;;  %73 = vst.msk [vmem:[#allocation6 + $0x4] sm:$0x7] %vm72_vm8, %v2243_v7  ;;  %vm68_vm11 = vmor %vm67_vm10, %vm66_vm9 }
  0x88   :  { %2087 = vmatpush3.bf16.msra.mxu0 %v2126_v36  ;;  %v2154_v36 = vld [vmem:[%s2843_s3 + $0x90] sm:$0xff]   ;;  %69 = vst.msk [vmem:[#allocation7] sm:$0x44] %vm68_vm11, %v2243_v7 }
  0x89   :  { %2088 = vmatprep.subr.bf16.mxu0 %v2242_v6  ;;  %v313_v50 = vsel %vm310_vm3, %v311_v47, %v312_v46  ;;  %vm526_vm3 = vcmask 1043587   ;;  %74 = vst.msk [vmem:[#allocation7] sm:$0x7] %vm70_vm7, %v2243_v7 }
  0x8a   :  { %2099 = vmatpush3.bf16.msra.mxu1 %v2127_v37  ;;  %v2155_v37 = vld [vmem:[%s2843_s3 + $0x40] sm:$0xff]   ;;  %vm528_vm5 = vmor %vm527_vm4, %vm526_vm3  ;;  %75 = vst.msk [vmem:[#allocation7 + $0x4] sm:$0x7] %vm72_vm8, %v2243_v7 }
  0x8b   :  { %2100 = vmatprep.subr.bf16.mxu1 %v2242_v6 }
  0x8c   :  { %2089 = vmatpush3.bf16.msra.mxu0 %v2128_v38 }
  0x8d   :  { %2090 = vmatprep.subr.bf16.mxu0 %v2242_v6 }
  0x8e   :  { %2101 = vmatpush3.bf16.msra.mxu1 %v2129_v39 }
  0x8f   :  { %2102 = vmatprep.subr.bf16.mxu1 %v2242_v6  ;;  %v2146_v6 = vld [vmem:[%s2843_s3 + $0x60] sm:$0xff]  }
  0x90   :  { %2091 = vmatpush3.bf16.msra.mxu0 %v2130_v42  ;;  %v2198_v42 = vld [vmem:[%s2845_s5 + $0x8] sm:$0xff]  }
  0x91   :  { %657 = vmatprep.subr.bf16.mxu0 %v2243_v7 }
  0x92   :  { %2103 = vmatpush3.bf16.msra.mxu1 %v2131_v45 }
  0x93   :  { %2093 = vmatmul.mubr.msk.bf16.vlgmr.msra.gmra.mxu0 %vm169_vm2, %v313_v50  ;;  %766 = vmatprep.subr.bf16.mxu1 %v2243_v7 }
  0x94   :  { %658 = vmatpush1.bf16.msra.mxu0 %v2136_v52 }
  0x95   :  { %2105 = vmatmul.mubr.msk.bf16.vlgmr.msra.gmra.mxu1 %vm169_vm2, %v405_v51  ;;  %659 = vmatprep.subr.bf16.mxu0 %v2243_v7  ;;  %vm2514_vm2 = vmor %vm514_vm15, %vm513_vm14  ;;  %vm1105_vm14 = vcmask 259077  }
  0x96   :  { %767 = vmatpush1.bf16.msra.mxu1 %v2137_v53 }
  0x97   :  { %768 = vmatprep.subr.bf16.mxu1 %v2243_v7 }
  0x98   :  { %660 = vmatpush1.bf16.msra.mxu0 %v2138_v54 }
  0x99   :  { %661 = vmatprep.subr.bf16.mxu0 %v2243_v7 }
  0x9a   :  { %769 = vmatpush1.bf16.msra.mxu1 %v2139_v55 }
  0x9b   :  { %770 = vmatprep.subr.bf16.mxu1 %v2243_v7 }
  0x9c   :  { %662 = vmatpush1.bf16.msra.mxu0 %v2140_v56 }
  0x9d   :  { %663 = vmatprep.subr.bf16.mxu0 %v2243_v7 }
  0x9e   :  { %771 = vmatpush1.bf16.msra.mxu1 %v2141_v57 }
  0x9f   :  { %772 = vmatprep.subr.bf16.mxu1 %v2243_v7 }
  0xa0   :  { %664 = vmatpush1.bf16.msra.mxu0 %v2142_v58 }
  0xa1   :  { %665 = vmatprep.subr.bf16.mxu0 %v2243_v7 }
  0xa2   :  { %773 = vmatpush1.bf16.msra.mxu1 %v2143_v59  ;;  %v2160_v59 = vld [vmem:[%s2843_s3 + $0xd8] sm:$0xff]  }
  0xa3   :  { %774 = vmatprep.subr.bf16.mxu1 %v2243_v7 }
  0xa4   :  { %666 = vmatpush1.bf16.msra.mxu0 %v2144_v60 }
  0xa5   :  { %667 = vmatprep.subr.bf16.mxu0 %v2243_v7 }
  0xa6   :  { %775 = vmatpush1.bf16.msra.mxu1 %v2145_v61 }
  0xa7   :  { %776 = vmatprep.subr.bf16.mxu1 %v2243_v7 }
  0xa8   :  { %668 = vmatpush1.bf16.msra.mxu0 %v2146_v6  ;;  %v2164_v6 = vld [vmem:[%s2843_s3 + $0xd0] sm:$0xff]  }
  0xa9   :  { %669 = vmatprep.subr.bf16.mxu0 %v2243_v7 }
  0xaa   :  { %777 = vmatpush1.bf16.msra.mxu1 %v2147_v8  ;;  %v2165_v8 = vld [vmem:[%s2843_s3 + $0x120] sm:$0xff]  }
  0xab   :  { %778 = vmatprep.subr.bf16.mxu1 %v2243_v7 }
  0xac   :  { %670 = vmatpush1.bf16.msra.mxu0 %v2148_v11  ;;  %v2169_v11 = vld [vmem:[%s2843_s3 + $0x118] sm:$0xff]  }
  0xad   :  { %671 = vmatprep.subr.bf16.mxu0 %v2243_v7 }
  0xae   :  { %779 = vmatpush1.bf16.msra.mxu1 %v2149_v12  ;;  %v2170_v12 = vld [vmem:[%s2843_s3 + $0xc0] sm:$0xff]  }
  0xaf   :  { %780 = vmatprep.subr.bf16.mxu1 %v2243_v7 }
  0xb0   :  { %672 = vmatpush1.bf16.msra.mxu0 %v2150_v21  ;;  %v2179_v21 = vld [vmem:[%s2843_s3 + $0xf0] sm:$0xff]  }
  0xb1   :  { %685 = vmatprep.subr.bf16.mxu0 %v2243_v7 }
  0xb2   :  { %781 = vmatpush1.bf16.msra.mxu1 %v2151_v22  ;;  %v2180_v22 = vld [vmem:[%s2843_s3 + $0xe8] sm:$0xff]  }
  0xb3   :  { %794 = vmatprep.subr.bf16.mxu1 %v2243_v7 }
  0xb4   :  { %686 = vmatpush2.bf16.msra.mxu0 %v2152_v30  ;;  %v2186_v30 = vld [vmem:[%s2845_s5 + $0x38] sm:$0xff]  }
  0xb5   :  { %687 = vmatprep.subr.bf16.mxu0 %v2243_v7 }
  0xb6   :  { %795 = vmatpush2.bf16.msra.mxu1 %v2153_v31  ;;  %v2187_v31 = vld [vmem:[%s2845_s5 + $0x98] sm:$0xff]  }
  0xb7   :  { %796 = vmatprep.subr.bf16.mxu1 %v2243_v7 }
  0xb8   :  { %688 = vmatpush2.bf16.msra.mxu0 %v2154_v36  ;;  %v2192_v36 = vld [vmem:[%s2845_s5 + $0x20] sm:$0xff]  }
  0xb9   :  { %903 = vmatprep.subr.bf16.mxu0 %v2243_v7 }
  0xba   :  { %797 = vmatpush2.bf16.msra.mxu1 %v2155_v37  ;;  %v2193_v37 = vld [vmem:[%s2845_s5 + $0x80] sm:$0xff]  }
  0xbb   :  { %1041 = vmatprep.subr.bf16.mxu1 %v2243_v7 }
 0x143   :  { %v211_v62 = vpop.f32.mrf.mxu0 }
 0x145   :  { %v2070_v63 = vpop.f32.mrf.mxu0  ;;  %v284_v0 = vpop.f32.mrf.mxu1 }
 0x146   :  { %v285_v9 = vadd.f32 %v284_v0, %v211_v62 }
 0x147   :  { %v214_v1 = vpop.f32.mrf.mxu0  ;;  %v2082_v2 = vpop.f32.mrf.mxu1 }
 0x148   :  { %v2161_v2 = vld [vmem:[%s2843_s3 + $0x128] sm:$0xff]  }
 0x149   :  { %v2071_v3 = vpop.f32.mrf.mxu0  ;;  %v287_v4 = vpop.f32.mrf.mxu1 }
 0x14a   :  { %v288_v17 = vadd.f32 %v287_v4, %v214_v1 }
 0x14b   :  { %v2083_v5 = vpop.f32.mrf.mxu1 }
 0x153   :  { %v375_v10 = vpop.f32.mrf.mxu0 }
 0x154   :  { %v382_v13 = vadd.f32 %v375_v10, %v285_v9  ;;  %v2168_v10 = vld [vmem:[%s2843_s3 + $0xc8] sm:$0xff]  }
 0x155   :  { %v2094_v14 = vpop.f32.mrf.mxu0  ;;  %v467_v15 = vpop.f32.mrf.mxu1 }
 0x156   :  { %v474_v18 = vadd.f32 %v467_v15, %v382_v13  ;;  %v2171_v13 = vld [vmem:[%s2843_s3 + $0x110] sm:$0xff]   ;;  %v2172_v14 = vld [vmem:[%s2843_s3 + $0xb8] sm:$0xff]   ;;  %v2173_v15 = vld [vmem:[%s2843_s3 + $0x108] sm:$0xff]  }
 0x157   :  { %v378_v19 = vpop.f32.mrf.mxu0  ;;  %v2106_v20 = vpop.f32.mrf.mxu1 }
 0x158   :  { %v483_v23 = vadd.f32 %v1781_v16, %v474_v18  ;;  %v383_v24 = vadd.f32 %v378_v19, %v288_v17  ;;  %v2175_v17 = vld [vmem:[%s2843_s3 + $0x100] sm:$0xff]   ;;  %v2176_v18 = vld [vmem:[%s2843_s3 + $0xa8] sm:$0xff]   ;;  %v2177_v19 = vld [vmem:[%s2843_s3 + $0xf8] sm:$0xff]  }
 0x159   :  { %v2095_v25 = vpop.f32.mrf.mxu0  ;;  %v470_v26 = vpop.f32.mrf.mxu1  ;;  %v2178_v20 = vld [vmem:[%s2843_s3 + $0xa0] sm:$0xff]  }
 0x15a   :  { %v485_v27 = vmax.f32 %v483_v23, 0.0  ;;  %v475_v28 = vadd.f32 %v470_v26, %v383_v24  ;;  %v2181_v23 = vld [vmem:[%s2843_s3 + $0x138] sm:$0xff]   ;;  %v2182_v24 = vld [vmem:[%s2843_s3 + $0xe0] sm:$0xff]   ;;  %v2183_v25 = vld [vmem:[%s2843_s3 + $0x130] sm:$0xff]  }
 0x15b   :  { %v2107_v29 = vpop.f32.mrf.mxu1 }
 0x15c   :  { %v2037_v32 = vpack.c.bf16 %v485_v27, %v485_v27  ;;  %v484_v33 = vadd.f32 %v1781_v16, %v475_v28  ;;  %v2174_v16 = vld [vmem:[%s2843_s3 + $0xb0] sm:$0xff]  }
 0x15e   :  { %v486_v34 = vmax.f32 %v484_v33, 0.0  ;;  %491 = vrot.lane.b32.xlu1 %v2037_v32, %s2246_s28  ;;  %v1783_v35 = vrot.slane %v2037_v32, 9  ;;  %v2188_v32 = vld [vmem:[%s2845_s5 + $0x30] sm:$0xff]  }
 0x15f   :  { %v2189_v33 = vld [vmem:[%s2845_s5 + $0x90] sm:$0xff]  }
 0x160   :  { %v2038_v38 = vpack.c.bf16 %v486_v34, %v486_v34  ;;  %507 = vrot.lane.b32.xlu0 %v1783_v35, %s2246_s28  ;;  %v2190_v34 = vld [vmem:[%s2845_s5 + $0x28] sm:$0xff]  }
 0x161   :  { %v2191_v35 = vld [vmem:[%s2845_s5 + $0x88] sm:$0xff]  }
 0x162   :  { %v530_v39 = vrot.slane %v2038_v38, 7  ;;  %v519_v40 = vrot.slane %v2038_v38, 6  ;;  %v2194_v38 = vld [vmem:[%s2845_s5 + $0x18] sm:$0xff]  }
 0x164   :  { %531 = vrot.lane.b32.xlu0 %v530_v39, %s2246_s28  ;;  %520 = vrot.lane.b32.xlu1 %v519_v40, %s2246_s28  ;;  %v537_v41 = vrot.slane %v530_v39, 4  ;;  %v2195_v39 = vld [vmem:[%s2845_s5 + $0x78] sm:$0xff]   ;;  %v2196_v40 = vld [vmem:[%s2845_s5 + $0x10] sm:$0xff]  }
 0x168   :  { %538 = vrot.lane.b32.xlu1 %v537_v41, %s2246_s28  ;;  %v2197_v41 = vld [vmem:[%s2845_s5 + $0x70] sm:$0xff]  }
 0x1d0   :  { %v492_v43 = vpop.permute.xlu1 %491 }
 0x1d1   :  { %v493_v44 = vrot.slane %v492_v43, 4 }
 0x1d2   :  { %v508_v45 = vpop.permute.xlu0 %507 }
 0x1d3   :  { %v495_v46 = vsel %vm494_vm12, %v493_v44, %v492_v43  ;;  %v509_v48 = vrot.slane %v508_v45, 4  ;;  %v2199_v43 = vld [vmem:[%s2845_s5 + $0x68] sm:$0xff]   ;;  %v2200_v44 = vld [vmem:[%s2845_s5] sm:$0xff]  }
 0x1d4   :  { %500 = vst.msk [vmem:[#allocation5] sm:$0x11] %vm2509_vm13, %v495_v46 }
 0x1d5   :  { %504 = vst.msk [vmem:[#allocation4] sm:$0x22] %vm503_vm1, %v495_v46  ;;  %v510_v49 = vsel %vm494_vm12, %v509_v48, %v508_v45  ;;  %v2201_v45 = vld [vmem:[%s2845_s5 + $0x60] sm:$0xff]   ;;  %v2202_v46 = vld [vmem:[%s2845_s5 + $0x58] sm:$0xff]  }
 0x1d6   :  { %512 = vst.msk [vmem:[#allocation5] sm:$0x22] %vm503_vm1, %v510_v49  ;;  %v532_v50 = vpop.permute.xlu0 %531  ;;  %v521_v51 = vpop.permute.xlu1 %520  ;;  %vm1116_vm1 = vcmask 1042690  }
 0x1d7   :  { %516 = vst.msk [vmem:[#allocation4] sm:$0x44] %vm2514_vm2, %v510_v49  ;;  %v533_v52 = vrot.slane %v532_v50, 4  ;;  %v522_v53 = vrot.slane %v521_v51, 4 }
 0x1d9   :  { %v534_v54 = vsel %vm494_vm12, %v533_v52, %v532_v50  ;;  %v523_v55 = vsel %vm494_vm12, %v522_v53, %v521_v51 }
 0x1da   :  { %536 = vst.msk [vmem:[#allocation5] sm:$0x88] %vm528_vm5, %v534_v54  ;;  %529 = vst.msk [vmem:[#allocation4] sm:$0x88] %vm528_vm5, %v523_v55  ;;  %v539_v56 = vpop.permute.xlu1 %538  ;;  %vm1249_vm5 = vcmask 523264  }
 0x1db   :  { %525 = vst.msk [vmem:[#allocation5] sm:$0x44] %vm2514_vm2, %v523_v55  ;;  %v540_v57 = vrot.slane %v539_v56, 4  ;;  %v2203_v55 = vld [vmem:[%s2845_s5 + $0xb8] sm:$0xff]   ;;  %vm1117_vm2 = vcmask 260102  }
 0x1dc   :  { %vm1118_vm4 = vmor %vm1117_vm2, %vm1116_vm1 }
 0x1dd   :  { %v541_v58 = vsel %vm494_vm12, %v540_v57, %v539_v56  ;;  %v2204_v57 = vld [vmem:[%s2845_s5 + $0x50] sm:$0xff]   ;;  %vm1101_vm12 = vcmask 1040640  }
 0x1de   :  { %543 = vst.msk [vmem:[#allocation4 + $0x8] sm:$0x11] %vm2509_vm13, %v541_v58  ;;  %vm1104_vm13 = vcmask 1041665   ;;  %vm1102_vm15 = vmor %vm47_vm0, %vm1101_vm12 }
 0x1df   :  { %vm1106_vm3 = vmor %vm1105_vm14, %vm1104_vm13 }
 0x1e1   :  { %v544_v61 = vld [vmem:[#allocation4] sm:$0xff] }
 0x1e2   :  { %v565_v60 = vld [vmem:[#allocation5] sm:$0xff]  ;;  %v1819_v63 = vcombine.high %v544_v61, %v544_v61  ;;  %v1818_v1 = vcombine.low %v544_v61, %v544_v61  ;;  %v2205_v61 = vld [vmem:[%s2845_s5 + $0xb0] sm:$0xff]  }
 0x1e3   :  { %v1806_v62 = vcombine.high %v565_v60, %v565_v60  ;;  %v1805_v0 = vcombine.low %v565_v60, %v565_v60  ;;  %v2162_v3 = vld [vmem:[#allocation5 + $0x4] ss:$8 sps:$4 sm:$0x1e]   ;;  %v2185_v27 = vld [vmem:[#allocation5] ss:$8 sps:$4 sm:$0x1e]  }
 0x1e4   :  { %1830 = vmatprep.mubr.msk.bf16.mxu1 %vm653_vm6, %v1819_v63  ;;  %v976_v4 = vrot.slane %v2162_v3, 1  ;;  %v975_v29 = vrot.slane %v2185_v27, 1  ;;  %v2207_v3 = vld [vmem:[%s2845_s5 + $0xa8] sm:$0xff]  }
 0x1e5   :  { %1817 = vmatprep.mubr.msk.bf16.mxu0 %vm653_vm6, %v1806_v62  ;;  %799 = vmatmul.mubr.bf16.vlgmr.msra.gmra.mxu1 %v1818_v1  ;;  %v2166_v5 = vld [vmem:[#allocation4 + $0x4] ss:$8 sps:$4 sm:$0x1e]   ;;  %v2184_v26 = vld [vmem:[#allocation4] ss:$8 sps:$4 sm:$0x1e]  }
 0x1e6   :  { %690 = vmatmul.mubr.bf16.vlgmr.msra.gmra.mxu0 %v1805_v0  ;;  %1042 = vmatpush1.bf16.msra.mxu1 %v2161_v2  ;;  %v838_v9 = vrot.slane %v2166_v5, 1  ;;  %v837_v28 = vrot.slane %v2184_v26, 1  ;;  %v1897_v62 = vld [vmem:[%s2846_s4] ss:$0 sm:$0xff]  ;;  %v2206_v2 = vld [vmem:[%s2845_s5 + $0x48] sm:$0xff]  }
 0x1e7   :  { %904 = vmatpush1.bf16.msra.mxu0 %v2160_v59  ;;  %1896 = vmatprep.mubr.msk.bf16.mxu1 %vm653_vm6, %v976_v4 }
 0x1e8   :  { %905 = vmatprep.subr.bf16.mxu0 %v2243_v7  ;;  %1043 = vmatprep.subr.bf16.mxu1 %v2243_v7 }
 0x1e9   :  { %1863 = vmatprep.mubr.msk.bf16.mxu0 %vm653_vm6, %v838_v9 }
 0x1ea   :  { %1044 = vmatpush1.bf16.msra.mxu1 %v2165_v8  ;;  %v2208_v8 = vld [vmem:[%s2845_s5 + $0x40] sm:$0xff]  }
 0x1eb   :  { %906 = vmatpush1.bf16.msra.mxu0 %v2164_v6  ;;  %1045 = vmatprep.subr.bf16.mxu1 %v2243_v7 }
 0x1ec   :  { %907 = vmatprep.subr.bf16.mxu0 %v2243_v7 }
 0x1ee   :  { %1046 = vmatpush1.bf16.msra.mxu1 %v2169_v11 }
 0x1ef   :  { %908 = vmatpush1.bf16.msra.mxu0 %v2168_v10  ;;  %1047 = vmatprep.subr.bf16.mxu1 %v2243_v7 }
 0x1f0   :  { %909 = vmatprep.subr.bf16.mxu0 %v2243_v7 }
 0x1f2   :  { %1048 = vmatpush1.bf16.msra.mxu1 %v2171_v13 }
 0x1f3   :  { %910 = vmatpush1.bf16.msra.mxu0 %v2170_v12  ;;  %1049 = vmatprep.subr.bf16.mxu1 %v2243_v7  ;;  %v2209_v12 = vld [vmem:[%s2845_s5 + $0xa0] sm:$0xff]  }
 0x1f4   :  { %911 = vmatprep.subr.bf16.mxu0 %v2243_v7 }
 0x1f6   :  { %1050 = vmatpush1.bf16.msra.mxu1 %v2173_v15 }
 0x1f7   :  { %912 = vmatpush1.bf16.msra.mxu0 %v2172_v14  ;;  %1051 = vmatprep.subr.bf16.mxu1 %v2243_v7 }
 0x1f8   :  { %913 = vmatprep.subr.bf16.mxu0 %v2243_v7 }
 0x1fa   :  { %1052 = vmatpush1.bf16.msra.mxu1 %v2175_v17 }
 0x1fb   :  { %914 = vmatpush1.bf16.msra.mxu0 %v2174_v16  ;;  %1053 = vmatprep.subr.bf16.mxu1 %v2243_v7 }
 0x1fc   :  { %915 = vmatprep.subr.bf16.mxu0 %v2243_v7 }
 0x1fe   :  { %1054 = vmatpush1.bf16.msra.mxu1 %v2177_v19 }
 0x1ff   :  { %916 = vmatpush1.bf16.msra.mxu0 %v2176_v18  ;;  %1055 = vmatprep.subr.bf16.mxu1 %v2243_v7 }
 0x200   :  { %917 = vmatprep.subr.bf16.mxu0 %v2243_v7 }
 0x202   :  { %1056 = vmatpush1.bf16.msra.mxu1 %v2179_v21 }
 0x203   :  { %918 = vmatpush1.bf16.msra.mxu0 %v2178_v20  ;;  %1069 = vmatprep.subr.bf16.mxu1 %v2243_v7 }
 0x204   :  { %931 = vmatprep.subr.bf16.mxu0 %v2243_v7 }
 0x206   :  { %1070 = vmatpush2.bf16.msra.mxu1 %v2181_v23 }
 0x207   :  { %932 = vmatpush2.bf16.msra.mxu0 %v2180_v22  ;;  %1071 = vmatprep.subr.bf16.mxu1 %v2243_v7 }
 0x208   :  { %933 = vmatprep.subr.bf16.mxu0 %v2243_v7 }
 0x20a   :  { %1072 = vmatpush2.bf16.msra.mxu1 %v2183_v25 }
 0x20b   :  { %934 = vmatpush2.bf16.msra.mxu0 %v2182_v24  ;;  %1374 = vmatprep.subr.bf16.mxu1 %v2243_v7  ;;  %v2212_v24 = vld [vmem:[%s2845_s5 + $0x158] sm:$0xff]  }
 0x20c   :  { %1253 = vmatprep.subr.bf16.mxu0 %v2243_v7 }
 0x20d   :  { %1074 = vmatmul.mubr.bf16.vlgmr.msra.gmra.mxu1 %v975_v29 }
 0x20e   :  { %936 = vmatmul.mubr.bf16.vlgmr.msra.gmra.mxu0 %v837_v28  ;;  %1375 = vmatpush1.bf16.msra.mxu1 %v2186_v30  ;;  %v2215_v30 = vld [vmem:[%s2845_s5 + $0xf8] sm:$0xff]  }
 0x20f   :  { %1254 = vmatpush1.bf16.msra.mxu0 %v2187_v31  ;;  %1376 = vmatprep.subr.bf16.mxu1 %v2243_v7 }
 0x210   :  { %1255 = vmatprep.subr.bf16.mxu0 %v2243_v7 }
 0x212   :  { %1377 = vmatpush1.bf16.msra.mxu1 %v2188_v32 }
 0x213   :  { %1256 = vmatpush1.bf16.msra.mxu0 %v2189_v33  ;;  %1378 = vmatprep.subr.bf16.mxu1 %v2243_v7 }
 0x214   :  { %1257 = vmatprep.subr.bf16.mxu0 %v2243_v7 }
 0x216   :  { %1379 = vmatpush1.bf16.msra.mxu1 %v2190_v34 }
 0x217   :  { %1258 = vmatpush1.bf16.msra.mxu0 %v2191_v35  ;;  %1380 = vmatprep.subr.bf16.mxu1 %v2243_v7  ;;  %v2218_v35 = vld [vmem:[%s2845_s5 + $0x150] sm:$0xff]  }
 0x218   :  { %1259 = vmatprep.subr.bf16.mxu0 %v2243_v7 }
 0x21a   :  { %1381 = vmatpush1.bf16.msra.mxu1 %v2192_v36  ;;  %v2219_v36 = vld [vmem:[%s2845_s5 + $0xf0] sm:$0xff]  }
 0x21b   :  { %1260 = vmatpush1.bf16.msra.mxu0 %v2193_v37  ;;  %1382 = vmatprep.subr.bf16.mxu1 %v2243_v7  ;;  %v2220_v37 = vld [vmem:[%s2845_s5 + $0x148] sm:$0xff]  }
 0x21c   :  { %1261 = vmatprep.subr.bf16.mxu0 %v2243_v7 }
 0x21e   :  { %1383 = vmatpush1.bf16.msra.mxu1 %v2194_v38  ;;  %v2221_v38 = vld [vmem:[%s2845_s5 + $0xe8] sm:$0xff]  }
 0x21f   :  { %1262 = vmatpush1.bf16.msra.mxu0 %v2195_v39  ;;  %1384 = vmatprep.subr.bf16.mxu1 %v2243_v7  ;;  %v2222_v39 = vld [vmem:[%s2845_s5 + $0x140] sm:$0xff]  }
 0x220   :  { %1263 = vmatprep.subr.bf16.mxu0 %v2243_v7 }
 0x222   :  { %1385 = vmatpush1.bf16.msra.mxu1 %v2196_v40  ;;  %v2223_v40 = vld [vmem:[%s2845_s5 + $0xe0] sm:$0xff]  }
 0x223   :  { %1264 = vmatpush1.bf16.msra.mxu0 %v2197_v41  ;;  %1386 = vmatprep.subr.bf16.mxu1 %v2243_v7  ;;  %v2224_v41 = vld [vmem:[%s2845_s5 + $0x138] sm:$0xff]  }
 0x224   :  { %1265 = vmatprep.subr.bf16.mxu0 %v2243_v7 }
 0x226   :  { %1387 = vmatpush1.bf16.msra.mxu1 %v2198_v42  ;;  %v2225_v42 = vld [vmem:[%s2845_s5 + $0xd8] sm:$0xff]  }
 0x227   :  { %1266 = vmatpush1.bf16.msra.mxu0 %v2199_v43  ;;  %1388 = vmatprep.subr.bf16.mxu1 %v2243_v7  ;;  %v2226_v43 = vld [vmem:[%s2845_s5 + $0x130] sm:$0xff]  }
 0x228   :  { %1267 = vmatprep.subr.bf16.mxu0 %v2243_v7 }
 0x22a   :  { %1389 = vmatpush1.bf16.msra.mxu1 %v2200_v44  ;;  %v2227_v44 = vld [vmem:[%s2845_s5 + $0xd0] sm:$0xff]  }
 0x22b   :  { %1268 = vmatpush1.bf16.msra.mxu0 %v2201_v45  ;;  %1398 = vmatprep.subr.bf16.mxu1 %v2243_v7  ;;  %v2228_v45 = vld [vmem:[%s2845_s5 + $0x128] sm:$0xff]  }
 0x22c   :  { %1277 = vmatprep.subr.bf16.mxu0 %v2243_v7 }
 0x22e   :  { %1399 = vmatpush2.bf16.msra.mxu1 %v2202_v46  ;;  %v2229_v46 = vld [vmem:[%s2845_s5 + $0xc8] sm:$0xff]  }
 0x22f   :  { %1400 = vmatprep.subr.bf16.mxu1 %v2243_v7  ;;  %1278 = vmatpush2.bf16.msra.mxu0 %v2203_v55  ;;  %v2238_v55 = vld [vmem:[%s2845_s5 + $0x160] sm:$0xff]  }
 0x230   :  { %1279 = vmatprep.subr.bf16.mxu0 %v2243_v7 }
 0x232   :  { %1401 = vmatpush2.bf16.msra.mxu1 %v2204_v57  ;;  %v2239_v57 = vld [vmem:[%s2845_s5 + $0x100] sm:$0xff]  }
 0x233   :  { %1402 = vmatprep.subr.bf16.mxu1 %v2243_v7  ;;  %1280 = vmatpush2.bf16.msra.mxu0 %v2205_v61 }
 0x234   :  { %1281 = vmatprep.subr.bf16.mxu0 %v2243_v7 }
 0x236   :  { %1403 = vmatpush2.bf16.msra.mxu1 %v2206_v2 }
 0x237   :  { %1404 = vmatprep.subr.bf16.mxu1 %v2243_v7  ;;  %1282 = vmatpush2.bf16.msra.mxu0 %v2207_v3 }
 0x238   :  { %1283 = vmatprep.subr.bf16.mxu0 %v2243_v7 }
 0x23a   :  { %1405 = vmatpush2.bf16.msra.mxu1 %v2208_v8 }
 0x23b   :  { %1673 = vmatprep.subr.bf16.mxu1 %v2243_v7  ;;  %1284 = vmatpush2.bf16.msra.mxu0 %v2209_v12 }
 0x23c   :  { %1523 = vmatprep.subr.bf16.mxu0 %v2243_v7 }
 0x2a5   :  { %v800_v48 = vpop.f32.mrf.mxu1 }
 0x2a6   :  { %v691_v47 = vpop.f32.mrf.mxu0 }
 0x2a7   :  { %v802_v50 = vpop.f32.mrf.mxu1  ;;  %v801_v56 = vadd.f32 %v800_v48, %v691_v47  ;;  %v2230_v47 = vld [vmem:[%s2845_s5 + $0x120] sm:$0xff]  }
 0x2a8   :  { %v693_v49 = vpop.f32.mrf.mxu0  ;;  %v2231_v48 = vld [vmem:[%s2845_s5 + $0xc0] sm:$0xff]   ;;  %v2233_v50 = vld [vmem:[%s2845_s5 + $0x118] sm:$0xff]  }
 0x2a9   :  { %v803_v52 = vpop.f32.mrf.mxu1  ;;  %v2232_v49 = vld [vmem:[%s2845_s5 + $0x178] sm:$0xff]  }
 0x2aa   :  { %v694_v51 = vpop.f32.mrf.mxu0  ;;  %v2235_v52 = vld [vmem:[%s2845_s5 + $0x110] sm:$0xff]  }
 0x2ab   :  { %v804_v54 = vpop.f32.mrf.mxu1  ;;  %v2234_v51 = vld [vmem:[%s2845_s5 + $0x170] sm:$0xff]  }
 0x2ac   :  { %v695_v53 = vpop.f32.mrf.mxu0  ;;  %v2237_v54 = vld [vmem:[%s2845_s5 + $0x108] sm:$0xff]  }
 0x2ad   :  { %v2236_v53 = vld [vmem:[%s2845_s5 + $0x168] sm:$0xff]  }
 0x2cd   :  { %v1075_v59 = vpop.f32.mrf.mxu1 }
 0x2ce   :  { %v937_v58 = vpop.f32.mrf.mxu0 }
 0x2cf   :  { %v943_v60 = vadd.f32 %v937_v58, %v801_v56  ;;  %v1077_v0 = vpop.f32.mrf.mxu1 }
 0x2d0   :  { %v939_v63 = vpop.f32.mrf.mxu0 }
 0x2d1   :  { %v1081_v1 = vadd.f32 %v1075_v59, %v943_v60  ;;  %v1078_v5 = vpop.f32.mrf.mxu1 }
 0x2d2   :  { %v940_v4 = vpop.f32.mrf.mxu0 }
 0x2d3   :  { %v1089_v6 = vadd.f32 %v1897_v62, %v1081_v1  ;;  %v1079_v10 = vpop.f32.mrf.mxu1 }
 0x2d4   :  { %v941_v9 = vpop.f32.mrf.mxu0  ;;  %v2032_v10 = vld [vmem:[%s2847_s6] ss:$0 sm:$0xff] }
 0x2d5   :  { %v1090_v11 = vmax.f32 %v1089_v6, 0.0 }
 0x2d7   :  { %v2039_v13 = vpack.c.bf16 %v1090_v11, %v1090_v11 }
 0x2d9   :  { %1095 = vrot.lane.b32.xlu0 %v2039_v13, %s2247_s17  ;;  %v1899_v14 = vrot.slane %v2039_v13, 9 }
 0x2db   :  { %1110 = vrot.lane.b32.xlu1 %v1899_v14, %s2247_s17 }
 0x34b   :  { %v1096_v15 = vpop.permute.xlu0 %1095 }
 0x34c   :  { %v1097_v16 = vrot.slane %v1096_v15, 4 }
 0x34d   :  { %v1111_v17 = vpop.permute.xlu1 %1110 }
 0x34e   :  { %v1099_v18 = vsel %vm653_vm6, %v1097_v16, %v1096_v15  ;;  %v1112_v19 = vrot.slane %v1111_v17, 4 }
 0x34f   :  { %1103 = vst.msk [vmem:[#allocation7] sm:$0x11] %vm1102_vm15, %v1099_v18 }
 0x350   :  { %1107 = vst.msk [vmem:[#allocation6] sm:$0x22] %vm1106_vm3, %v1099_v18  ;;  %v1113_v20 = vsel %vm653_vm6, %v1112_v19, %v1111_v17 }
 0x351   :  { %1115 = vst.msk [vmem:[#allocation7] sm:$0x22] %vm1106_vm3, %v1113_v20 }
 0x352   :  { %1119 = vst.msk [vmem:[#allocation6] sm:$0x44] %vm1118_vm4, %v1113_v20 }
 0x357   :  { %v1120_v21 = vld [vmem:[#allocation6] sm:$0x33] }
 0x358   :  { %v1940_v22 = vcombine.high %v1120_v21, %v1120_v21  ;;  %v1939_v23 = vcombine.low %v1120_v21, %v1120_v21  ;;  %v1145_v25 = vld [vmem:[#allocation7] sm:$0x33] }
 0x359   :  { %v2728_v26 = vld [vmem:[#allocation6] sm:$0x66]  ;;  %v2730_v27 = vld [vmem:[#allocation7] sm:$0x66]  ;;  %v1925_v28 = vcombine.high %v1145_v25, %v1145_v25  ;;  %v1924_v29 = vcombine.low %v1145_v25, %v1145_v25 }
 0x35a   :  { %1953 = vmatprep.mubr.msk.bf16.mxu1 %vm1249_vm5, %v1940_v22  ;;  %v1979_v31 = vcombine.high %v2728_v26, %v2728_v26  ;;  %v2018_v32 = vcombine.high %v2730_v27, %v2730_v27  ;;  %v2017_v56 = vcombine.low %v2730_v27, %v2730_v27  ;;  %v1978_v58 = vcombine.low %v2728_v26, %v2728_v26 }
 0x35b   :  { %1407 = vmatmul.mubr.bf16.vlgmr.msra.gmra.mxu1 %v1939_v23  ;;  %1938 = vmatprep.mubr.msk.bf16.mxu0 %vm1249_vm5, %v1925_v28 }
 0x35c   :  { %1674 = vmatpush1.bf16.msra.mxu1 %v2212_v24  ;;  %v1446_v33 = vrot.slane %v1979_v31, 1  ;;  %v1596_v34 = vrot.slane %v2018_v32, 1  ;;  %1286 = vmatmul.mubr.bf16.vlgmr.msra.gmra.mxu0 %v1924_v29  ;;  %v1595_v59 = vrot.slane %v2017_v56, 1  ;;  %v1445_v60 = vrot.slane %v1978_v58, 1 }
 0x35d   :  { %1675 = vmatprep.subr.bf16.mxu1 %v2243_v7  ;;  %1524 = vmatpush1.bf16.msra.mxu0 %v2215_v30 }
 0x35e   :  { %1992 = vmatprep.mubr.msk.bf16.mxu0 %vm1249_vm5, %v1446_v33  ;;  %2031 = vmatprep.mubr.msk.bf16.mxu1 %vm1249_vm5, %v1596_v34 }
 0x35f   :  { %1525 = vmatprep.subr.bf16.mxu0 %v2243_v7 }
 0x360   :  { %1676 = vmatpush1.bf16.msra.mxu1 %v2218_v35 }
 0x361   :  { %1677 = vmatprep.subr.bf16.mxu1 %v2243_v7  ;;  %1526 = vmatpush1.bf16.msra.mxu0 %v2219_v36 }
 0x362   :  { %1527 = vmatprep.subr.bf16.mxu0 %v2243_v7 }
 0x364   :  { %1678 = vmatpush1.bf16.msra.mxu1 %v2220_v37 }
 0x365   :  { %1679 = vmatprep.subr.bf16.mxu1 %v2243_v7  ;;  %1528 = vmatpush1.bf16.msra.mxu0 %v2221_v38 }
 0x366   :  { %1529 = vmatprep.subr.bf16.mxu0 %v2243_v7 }
 0x368   :  { %1680 = vmatpush1.bf16.msra.mxu1 %v2222_v39 }
 0x369   :  { %1681 = vmatprep.subr.bf16.mxu1 %v2243_v7  ;;  %1530 = vmatpush1.bf16.msra.mxu0 %v2223_v40 }
 0x36a   :  { %1531 = vmatprep.subr.bf16.mxu0 %v2243_v7 }
 0x36c   :  { %1682 = vmatpush1.bf16.msra.mxu1 %v2224_v41 }
 0x36d   :  { %1683 = vmatprep.subr.bf16.mxu1 %v2243_v7  ;;  %1532 = vmatpush1.bf16.msra.mxu0 %v2225_v42 }
 0x36e   :  { %1533 = vmatprep.subr.bf16.mxu0 %v2243_v7 }
 0x370   :  { %1684 = vmatpush1.bf16.msra.mxu1 %v2226_v43 }
 0x371   :  { %1685 = vmatprep.subr.bf16.mxu1 %v2243_v7  ;;  %1534 = vmatpush1.bf16.msra.mxu0 %v2227_v44 }
 0x372   :  { %1535 = vmatprep.subr.bf16.mxu0 %v2243_v7 }
 0x374   :  { %1686 = vmatpush1.bf16.msra.mxu1 %v2228_v45 }
 0x375   :  { %1687 = vmatprep.subr.bf16.mxu1 %v2243_v7  ;;  %1536 = vmatpush1.bf16.msra.mxu0 %v2229_v46 }
 0x376   :  { %1537 = vmatprep.subr.bf16.mxu0 %v2243_v7 }
 0x378   :  { %1688 = vmatpush1.bf16.msra.mxu1 %v2230_v47 }
 0x379   :  { %1697 = vmatprep.subr.bf16.mxu1 %v2243_v7  ;;  %1538 = vmatpush1.bf16.msra.mxu0 %v2231_v48 }
 0x37a   :  { %1547 = vmatprep.subr.bf16.mxu0 %v2243_v7 }
 0x37c   :  { %1698 = vmatpush2.bf16.msra.mxu1 %v2232_v49 }
 0x37d   :  { %1699 = vmatprep.subr.bf16.mxu1 %v2243_v7  ;;  %1548 = vmatpush2.bf16.msra.mxu0 %v2233_v50 }
 0x37e   :  { %1549 = vmatprep.subr.bf16.mxu0 %v2243_v7 }
 0x380   :  { %1700 = vmatpush2.bf16.msra.mxu1 %v2234_v51 }
 0x381   :  { %1701 = vmatprep.subr.bf16.mxu1 %v2243_v7  ;;  %1550 = vmatpush2.bf16.msra.mxu0 %v2235_v52 }
 0x382   :  { %1551 = vmatprep.subr.bf16.mxu0 %v2243_v7 }
 0x384   :  { %1702 = vmatpush2.bf16.msra.mxu1 %v2236_v53 }
 0x385   :  { %1703 = vmatprep.subr.bf16.mxu1 %v2243_v7  ;;  %1552 = vmatpush2.bf16.msra.mxu0 %v2237_v54 }
 0x386   :  { %1553 = vmatprep.subr.bf16.mxu0 %v2243_v7 }
 0x388   :  { %1704 = vmatpush2.bf16.msra.mxu1 %v2238_v55 }
 0x389   :  { %1554 = vmatpush2.bf16.msra.mxu0 %v2239_v57 }
 0x38b   :  { %1706 = vmatmul.mubr.bf16.vlgmr.msra.gmra.mxu1 %v1595_v59 }
 0x38c   :  { %1556 = vmatmul.mubr.bf16.vlgmr.msra.gmra.mxu0 %v1445_v60 }
 0x41b   :  { %v1408_v61 = vpop.f32.mrf.mxu1 }
 0x41c   :  { %v1287_v62 = vpop.f32.mrf.mxu0 }
 0x41d   :  { %v1410_v63 = vpop.f32.mrf.mxu1  ;;  %v1409_v6 = vadd.f32 %v1408_v61, %v1287_v62 }
 0x41e   :  { %v1289_v0 = vpop.f32.mrf.mxu0 }
 0x41f   :  { %v1411_v1 = vpop.f32.mrf.mxu1 }
 0x420   :  { %v1290_v2 = vpop.f32.mrf.mxu0 }
 0x421   :  { %v1412_v3 = vpop.f32.mrf.mxu1 }
 0x422   :  { %v1291_v4 = vpop.f32.mrf.mxu0 }
 0x44b   :  { %v1707_v5 = vpop.f32.mrf.mxu1 }
 0x44c   :  { %v1557_v7 = vpop.f32.mrf.mxu0 }
 0x44d   :  { %v1709_v8 = vpop.f32.mrf.mxu1  ;;  %v1563_v9 = vadd.f32 %v1557_v7, %v1409_v6 }
 0x44e   :  { %v1559_v11 = vpop.f32.mrf.mxu0 }
 0x44f   :  { %v1710_v12 = vpop.f32.mrf.mxu1  ;;  %v1713_v13 = vadd.f32 %v1707_v5, %v1563_v9 }
 0x450   :  { %v1560_v14 = vpop.f32.mrf.mxu0 }
 0x451   :  { %v1711_v15 = vpop.f32.mrf.mxu1  ;;  %v1721_v16 = vadd.f32 %v2032_v10, %v1713_v13 }
 0x452   :  { %v1561_v17 = vpop.f32.mrf.mxu0 }
 0x453   :  { %v1722_v18 = vmax.f32 %v1721_v16, 0.0 }
 0x455   :  { %1723 = vst [vmem:[%s2848_s7] sm:$0xf] %v1722_v18 }

// kernel: vae_encoder_forward.1
= control target key start
LH: loop header
LB: loop body
LE: loop exit
PB: predicated region body
PF: predicated region fallthrough
CT: control target
= control target key end

     0   :  { %vm47_vm0 = vcmask 258052   ;;  %vm63_vm1 = vcmask 520196   ;;  %vm46_vm2 = vcmask 1040384   ;;  %vm103_vm3 = vcmask 1044484   ;;  %s2246_s28 = smov 16   ;;  %s2247_s17 = smov 32   ;;  %s2841_s0 = inlined_call_operand.vmem [shape: f32[1,2,16,48], index: 0, kind: input, shape index: {}]   ;;  %s2842_s1 = inlined_call_operand.vmem [shape: bf16[4,54,128], index: 1, kind: input, shape index: {}]   ;;  %s2843_s3 = inlined_call_operand.vmem [shape: bf16[4,160,128], index: 3, kind: input, shape index: {}]   ;;  %s2844_s2 = inlined_call_operand.vmem [shape: f32[1,128], index: 2, kind: input, shape index: {}]   ;;  %s2845_s5 = inlined_call_operand.vmem [shape: bf16[4,192,128], index: 5, kind: input, shape index: {}]   ;;  %s2846_s4 = inlined_call_operand.vmem [shape: f32[1,128], index: 4, kind: input, shape index: {}]   ;;  %s2847_s6 = inlined_call_operand.vmem [shape: f32[1,128], index: 6, kind: input, shape index: {}]   ;;  %s2848_s7 = inlined_call_operand.vmem [shape: f32[1,4,128], index: 7, kind: output, shape index: {}]  }
   0x1   :  { %v76_v0 = vld [vmem:[%s2841_s0] sm:$0xff]  ;;  %v1730_v1 = vld [vmem:[%s2841_s0 + $0x10] sm:$0xff]  ;;  %v77_v2 = vld [vmem:[%s2841_s0 + $0x8] sm:$0xff]  ;;  %v2242_v6 = vmov 0.0   ;;  %vm173_vm5 = vcmask 1042432   ;;  %vm30_vm6 = vcmask 19456  }
   0x2   :  { %v2033_v3 = vpack.c.bf16 %v76_v0, %v76_v0  ;;  %v2035_v4 = vpack.c.bf16 %v1730_v1, %v1730_v1  ;;  %vm48_vm4 = vmor %vm47_vm0, %vm46_vm2  ;;  %v1731_v5 = vld [vmem:[%s2841_s0 + $0x18] sm:$0xff]  ;;  %2060 = vmatprep.subr.bf16.mxu0 %v2242_v6  ;;  %2072 = vmatprep.subr.bf16.mxu1 %v2242_v6  ;;  %v2243_v7 = vmov 0   ;;  %v2114_v9 = vld [vmem:[%s2842_s1 + $0x34] ss:$0 sps:$4 sm:$0x77]   ;;  %vm35_vm8 = vcmask 437656  }
   0x3   :  { %49 = vst.msk [vmem:[#allocation4] sm:$0x11] %vm48_vm4, %v2243_v7  ;;  %50 = vst.msk [vmem:[#allocation5 + $0x8] sm:$0x11] %vm48_vm4, %v2243_v7  ;;  %v2036_v8 = vpack.c.bf16 %v1731_v5, %v1731_v5  ;;  %vm27_vm9 = vcmask 434176   ;;  %s2244_s0 = smov 3   ;;  %v2034_v11 = vpack.c.bf16 %v77_v2, %v77_v2 }
   0x4   :  { %vm64_vm7 = vmor %vm63_vm1, %vm46_vm2  ;;  %40 = vst.msk [vmem:[#allocation3] sm:$0xf] %vm30_vm6, %v2243_v7  ;;  %84 = vrot.lane.b32.xlu0 %v2033_v3, %s2244_s0  ;;  %v105_v10 = vrot.slane %v2035_v4, 7  ;;  %v2115_v12 = vld [vmem:[%s2842_s1 + $0x18] ss:$0 sps:$4 sm:$0x77]  }
   0x5   :  { %32 = vst.msk [vmem:[#allocation2 + $0x4] sm:$0xf] %vm30_vm6, %v2243_v7  ;;  %41 = vst.msk [vmem:[#allocation3 + $0x4] sm:$0xf] %vm30_vm6, %v2243_v7  ;;  %v107_v13 = vrot.slane %v2036_v8, 7  ;;  %v175_v14 = vsel %vm173_vm5, %v2114_v9, 0 }
   0x6   :  { %65 = vst.msk [vmem:[#allocation6] sm:$0x11] %vm64_vm7, %v2243_v7  ;;  %vm104_vm10 = vmor %vm46_vm2, %vm103_vm3  ;;  %v2116_v15 = vld [vmem:[%s2842_s1 + $0x2c] sm:$0xff]   ;;  %110 = vrot.lane.b32.xlu1 %v105_v10, %s2244_s0  ;;  %v106_v16 = vrot.slane %v105_v10, 4  ;;  %2061 = vmatpush3.bf16.msra.mxu0 %v175_v14  ;;  %v248_v17 = vsel %vm173_vm5, %v2115_v12, 0  ;;  %vm33_vm11 = vcmask 16384  }
   0x7   :  { %43 = vst.msk [vmem:[#allocation3] sm:$0xf] %vm35_vm8, %v2243_v7  ;;  %37 = vst.msk [vmem:[#allocation2 + $0x4] sm:$0xf] %vm35_vm8, %v2243_v7  ;;  %2073 = vmatpush3.bf16.msra.mxu1 %v248_v17  ;;  %2062 = vmatprep.subr.bf16.mxu0 %v2242_v6  ;;  %v2117_v18 = vld [vmem:[%s2842_s1 + $0x10] sm:$0xff]   ;;  %v109_v20 = vrot.slane %v107_v13, 4 }
   0x8   :  { %44 = vst.msk [vmem:[#allocation3 + $0x4] sm:$0xf] %vm35_vm8, %v2243_v7  ;;  %86 = vrot.lane.b32.xlu0 %v2034_v11, %s2244_s0  ;;  %v108_v19 = vsel %vm104_vm10, %v106_v16, %v107_v13  ;;  %2074 = vmatprep.subr.bf16.mxu1 %v2242_v6  ;;  %vm38_vm12 = vcmask 434584   ;;  %v2118_v21 = vld [vmem:[%s2842_s1 + $0x24] sm:$0xff]   ;;  %vm2245_vm13 = vmmov 0   ;;  %v2120_v25 = vld [vmem:[%s2842_s1 + $0x1c] sm:$0xff]  }
   0x9   :  { %28 = vst.msk [vmem:[#allocation2] sm:$0x1] %vm27_vm9, %v2243_v7  ;;  %29 = vst.msk [vmem:[#allocation3 + $0x8] sm:$0x1] %vm27_vm9, %v2243_v7  ;;  %v2119_v22 = vld [vmem:[%s2842_s1 + $0x8] sm:$0xff]   ;;  %2068 = vmatprep.mubr.msk.bf16.mxu0 %vm2245_vm13, %v2242_v6  ;;  %2080 = vmatprep.mubr.msk.bf16.mxu1 %vm2245_vm13, %v2242_v6  ;;  %v2121_v27 = vld [vmem:[%s2842_s1] sm:$0xff]  }
   0xa   :  { %31 = vst.msk [vmem:[#allocation2] sm:$0xf] %vm30_vm6, %v2243_v7  ;;  %112 = vrot.lane.b32.xlu1 %v108_v19, %s2244_s0  ;;  %2063 = vmatpush3.bf16.msra.mxu0 %v2116_v15  ;;  %v2123_v23 = vld [vmem:[%s2842_s1 + $0x50] ss:$0 sps:$4 sm:$0x77]   ;;  %vm90_vm14 = vcmask 412696  }
   0xb   :  { %36 = vst.msk [vmem:[#allocation2] sm:$0xf] %vm35_vm8, %v2243_v7  ;;  %2075 = vmatpush3.bf16.msra.mxu1 %v2117_v18  ;;  %2064 = vmatprep.subr.bf16.mxu0 %v2242_v6  ;;  %v2125_v24 = vld [vmem:[%s2842_s1 + $0x6c] ss:$0 sps:$4 sm:$0x77]   ;;  %v339_v26 = vsel %vm173_vm5, %v2123_v23, 0 }
   0xc   :  { %34 = vst.msk [vmem:[#allocation2 + $0x8] sm:$0x1] %vm33_vm11, %v2243_v7  ;;  %42 = vst.msk [vmem:[#allocation3 + $0x8] sm:$0x1] %vm33_vm11, %v2243_v7  ;;  %114 = vrot.lane.b32.xlu0 %v109_v20, %s2244_s0  ;;  %2076 = vmatprep.subr.bf16.mxu1 %v2242_v6  ;;  %v431_v28 = vsel %vm173_vm5, %v2125_v24, 0  ;;  %vm119_vm15 = vcmask 412697  }
   0xd   :  { %39 = vst.msk [vmem:[#allocation2 + $0x8] sm:$0x1] %vm38_vm12, %v2243_v7  ;;  %45 = vst.msk [vmem:[#allocation3 + $0x8] sm:$0x1] %vm38_vm12, %v2243_v7  ;;  %vm122_vm1 = vcmask 409624   ;;  %vm169_vm2 = vcmask 441344  }
   0xe   :  { %2065 = vmatpush3.bf16.msra.mxu0 %v2118_v21  ;;  %v2126_v36 = vld [vmem:[%s2842_s1 + $0x48] sm:$0xff]   ;;  %v2128_v38 = vld [vmem:[%s2842_s1 + $0x40] sm:$0xff]   ;;  %v2130_v42 = vld [vmem:[%s2842_s1 + $0x38] sm:$0xff]   ;;  %vm310_vm3 = vcmask 1046528   ;;  %vm51_vm4 = vcmask 125952   ;;  %vm55_vm5 = vcmask 257152  }
   0xf   :  { %2077 = vmatpush3.bf16.msra.mxu1 %v2119_v22  ;;  %2066 = vmatprep.subr.bf16.mxu0 %v2242_v6  ;;  %v2127_v37 = vld [vmem:[%s2842_s1 + $0x64] sm:$0xff]   ;;  %v2129_v39 = vld [vmem:[%s2842_s1 + $0x5c] sm:$0xff]   ;;  %v2131_v45 = vld [vmem:[%s2842_s1 + $0x54] sm:$0xff]   ;;  %52 = vst.msk [vmem:[#allocation4] sm:$0xf] %vm51_vm4, %v2243_v7  ;;  %vm53_vm6 = vcmask 122880  }
  0x10   :  { %2078 = vmatprep.subr.bf16.mxu1 %v2242_v6  ;;  %v2136_v52 = vld [vmem:[%s2843_s3 + $0x88] sm:$0xff]   ;;  %56 = vst.msk [vmem:[#allocation4 + $0x4] sm:$0xf] %vm55_vm5, %v2243_v7  ;;  %61 = vst.msk [vmem:[#allocation5 + $0x4] sm:$0xf] %vm55_vm5, %v2243_v7  ;;  %v2137_v53 = vld [vmem:[%s2843_s3 + $0x38] sm:$0xff]  }
  0x11   :  { %59 = vst.msk [vmem:[#allocation5] sm:$0xf] %vm51_vm4, %v2243_v7  ;;  %v2138_v54 = vld [vmem:[%s2843_s3 + $0x80] sm:$0xff]   ;;  %v2139_v55 = vld [vmem:[%s2843_s3 + $0x30] sm:$0xff]   ;;  %v2140_v56 = vld [vmem:[%s2843_s3 + $0x78] sm:$0xff]   ;;  %vm57_vm7 = vcmask 254080  }
  0x12   :  { %2067 = vmatpush3.bf16.msra.mxu0 %v2120_v25  ;;  %v2141_v57 = vld [vmem:[%s2843_s3 + $0x28] sm:$0xff]   ;;  %v2142_v58 = vld [vmem:[%s2843_s3 + $0x70] sm:$0xff]   ;;  %v2143_v59 = vld [vmem:[%s2843_s3 + $0x20] sm:$0xff]   ;;  %54 = vst.msk [vmem:[#allocation4 + $0x8] sm:$0x1] %vm53_vm6, %v2243_v7  ;;  %vm497_vm8 = vcmask 1040512  }
  0x13   :  { %2079 = vmatpush3.bf16.msra.mxu1 %v2121_v27  ;;  %2084 = vmatprep.subr.bf16.mxu0 %v2242_v6  ;;  %v2144_v60 = vld [vmem:[%s2843_s3 + $0x68] sm:$0xff]   ;;  %v2145_v61 = vld [vmem:[%s2843_s3 + $0x18] sm:$0xff]   ;;  %v2147_v8 = vld [vmem:[%s2843_s3 + $0x10] sm:$0xff]   ;;  %58 = vst.msk [vmem:[#allocation4 + $0xc] sm:$0x1] %vm57_vm7, %v2243_v7  ;;  %vm498_vm9 = vcmask 126980  }
  0x14   :  { %2096 = vmatprep.subr.bf16.mxu1 %v2242_v6  ;;  %v2135_v41 = vld [vmem:[#allocation3 + $0x8] ss:$0 sps:$4 sm:$0x11]   ;;  %v2148_v11 = vld [vmem:[%s2843_s3 + $0x58] sm:$0xff]   ;;  %v2149_v12 = vld [vmem:[%s2843_s3 + $0x8] sm:$0xff]   ;;  %vm501_vm10 = vcmask 1041537  }
  0x15   :  { %v404_v49 = vrot.slane %v2135_v41, 1  ;;  %v1781_v16 = vld [vmem:[%s2844_s2] ss:$0 sm:$0xff]  ;;  %v2150_v21 = vld [vmem:[%s2843_s3 + $0x50] sm:$0xff]   ;;  %60 = vst.msk [vmem:[#allocation5 + $0x8] sm:$0x1] %vm53_vm6, %v2243_v7 }
  0x16   :  { %v2151_v22 = vld [vmem:[%s2843_s3] sm:$0xff]   ;;  %62 = vst.msk [vmem:[#allocation5 + $0xc] sm:$0x1] %vm57_vm7, %v2243_v7  ;;  %vm502_vm11 = vcmask 128005   ;;  %vm494_vm12 = vcmask 130048   ;;  %vm527_vm4 = vcmask 130055  }
  0x17   :  { %vm653_vm6 = vcmask 261120   ;;  %vm70_vm7 = vcmask 256000  }
  0x18   :  { %71 = vst.msk [vmem:[#allocation6] sm:$0x7] %vm70_vm7, %v2243_v7 }
  0x76   :  { %v85_v29 = vpop.permute.xlu0 %84 }
  0x77   :  { %91 = vst.msk [vmem:[#allocation3] sm:$0xf] %vm90_vm14, %v85_v29 }
  0x78   :  { %v111_v30 = vpop.permute.xlu1 %110 }
  0x79   :  { %120 = vst.msk [vmem:[#allocation2] sm:$0xe] %vm119_vm15, %v111_v30  ;;  %v2152_v30 = vld [vmem:[%s2843_s3 + $0x98] sm:$0xff]   ;;  %vm514_vm15 = vcmask 129030  }
  0x7a   :  { %v87_v31 = vpop.permute.xlu0 %86 }
  0x7b   :  { %92 = vst.msk [vmem:[#allocation3 + $0x4] sm:$0xf] %vm90_vm14, %v87_v31  ;;  %v2153_v31 = vld [vmem:[%s2843_s3 + $0x48] sm:$0xff]  }
  0x7c   :  { %v113_v32 = vpop.permute.xlu1 %112 }
  0x7d   :  { %121 = vst.msk [vmem:[#allocation2 + $0x4] sm:$0xf] %vm90_vm14, %v113_v32  ;;  %vm513_vm14 = vcmask 1042562  }
  0x7e   :  { %v115_v33 = vpop.permute.xlu0 %114 }
  0x7f   :  { %123 = vst.msk [vmem:[#allocation2 + $0x8] sm:$0x1] %vm122_vm1, %v115_v33  ;;  %vm503_vm1 = vmor %vm502_vm11, %vm501_vm10  ;;  %vm67_vm10 = vcmask 522246  }
  0x82   :  { %v2122_v34 = vld [vmem:[#allocation3] sm:$0xff]  }
  0x83   :  { %2069 = vmatmul.mubr.msk.bf16.vlgmr.msra.gmra.mxu0 %vm169_vm2, %v2122_v34  ;;  %v2134_v44 = vld [vmem:[#allocation3] sm:$0xfe]  }
  0x84   :  { %v2124_v35 = vld [vmem:[#allocation2] sm:$0xff]   ;;  %2085 = vmatpush3.bf16.msra.mxu0 %v339_v26  ;;  %2092 = vmatprep.mubr.msk.bf16.mxu0 %vm2245_vm13, %v2242_v6  ;;  %v403_v48 = vrot.slane %v2134_v44, 1 }
  0x85   :  { %2081 = vmatmul.mubr.msk.bf16.vlgmr.msra.gmra.mxu1 %vm169_vm2, %v2124_v35  ;;  %2086 = vmatprep.subr.bf16.mxu0 %v2242_v6  ;;  %v2132_v43 = vld [vmem:[#allocation2] sm:$0xfe]  }
  0x86   :  { %2097 = vmatpush3.bf16.msra.mxu1 %v431_v28  ;;  %2104 = vmatprep.mubr.msk.bf16.mxu1 %vm2245_vm13, %v2242_v6  ;;  %v2133_v40 = vld [vmem:[#allocation2 + $0x8] ss:$0 sps:$4 sm:$0x11]   ;;  %v311_v47 = vrot.slane %v2132_v43, 1  ;;  %v405_v51 = vsel %vm310_vm3, %v403_v48, %v404_v49  ;;  %vm2509_vm13 = vmor %vm498_vm9, %vm497_vm8  ;;  %vm72_vm8 = vcmask 518400   ;;  %vm66_vm9 = vcmask 1042434  }
  0x87   :  { %2098 = vmatprep.subr.bf16.mxu1 %v2242_v6  ;;  %v312_v46 = vrot.slane %v2133_v40, 1  ;;  %73 = vst.msk [vmem:[#allocation6 + $0x4] sm:$0x7] %vm72_vm8, %v2243_v7  ;;  %vm68_vm11 = vmor %vm67_vm10, %vm66_vm9 }
  0x88   :  { %2087 = vmatpush3.bf16.msra.mxu0 %v2126_v36  ;;  %v2154_v36 = vld [vmem:[%s2843_s3 + $0x90] sm:$0xff]   ;;  %69 = vst.msk [vmem:[#allocation7] sm:$0x44] %vm68_vm11, %v2243_v7 }
  0x89   :  { %2088 = vmatprep.subr.bf16.mxu0 %v2242_v6  ;;  %v313_v50 = vsel %vm310_vm3, %v311_v47, %v312_v46  ;;  %vm526_vm3 = vcmask 1043587   ;;  %74 = vst.msk [vmem:[#allocation7] sm:$0x7] %vm70_vm7, %v2243_v7 }
  0x8a   :  { %2099 = vmatpush3.bf16.msra.mxu1 %v2127_v37  ;;  %v2155_v37 = vld [vmem:[%s2843_s3 + $0x40] sm:$0xff]   ;;  %vm528_vm5 = vmor %vm527_vm4, %vm526_vm3  ;;  %75 = vst.msk [vmem:[#allocation7 + $0x4] sm:$0x7] %vm72_vm8, %v2243_v7 }
  0x8b   :  { %2100 = vmatprep.subr.bf16.mxu1 %v2242_v6 }
  0x8c   :  { %2089 = vmatpush3.bf16.msra.mxu0 %v2128_v38 }
  0x8d   :  { %2090 = vmatprep.subr.bf16.mxu0 %v2242_v6 }
  0x8e   :  { %2101 = vmatpush3.bf16.msra.mxu1 %v2129_v39 }
  0x8f   :  { %2102 = vmatprep.subr.bf16.mxu1 %v2242_v6  ;;  %v2146_v6 = vld [vmem:[%s2843_s3 + $0x60] sm:$0xff]  }
  0x90   :  { %2091 = vmatpush3.bf16.msra.mxu0 %v2130_v42  ;;  %v2198_v42 = vld [vmem:[%s2845_s5 + $0x8] sm:$0xff]  }
  0x91   :  { %657 = vmatprep.subr.bf16.mxu0 %v2243_v7 }
  0x92   :  { %2103 = vmatpush3.bf16.msra.mxu1 %v2131_v45 }
  0x93   :  { %2093 = vmatmul.mubr.msk.bf16.vlgmr.msra.gmra.mxu0 %vm169_vm2, %v313_v50  ;;  %766 = vmatprep.subr.bf16.mxu1 %v2243_v7 }
  0x94   :  { %658 = vmatpush1.bf16.msra.mxu0 %v2136_v52 }
  0x95   :  { %2105 = vmatmul.mubr.msk.bf16.vlgmr.msra.gmra.mxu1 %vm169_vm2, %v405_v51  ;;  %659 = vmatprep.subr.bf16.mxu0 %v2243_v7  ;;  %vm2514_vm2 = vmor %vm514_vm15, %vm513_vm14  ;;  %vm1105_vm14 = vcmask 259077  }
  0x96   :  { %767 = vmatpush1.bf16.msra.mxu1 %v2137_v53 }
  0x97   :  { %768 = vmatprep.subr.bf16.mxu1 %v2243_v7 }
  0x98   :  { %660 = vmatpush1.bf16.msra.mxu0 %v2138_v54 }
  0x99   :  { %661 = vmatprep.subr.bf16.mxu0 %v2243_v7 }
  0x9a   :  { %769 = vmatpush1.bf16.msra.mxu1 %v2139_v55 }
  0x9b   :  { %770 = vmatprep.subr.bf16.mxu1 %v2243_v7 }
  0x9c   :  { %662 = vmatpush1.bf16.msra.mxu0 %v2140_v56 }
  0x9d   :  { %663 = vmatprep.subr.bf16.mxu0 %v2243_v7 }
  0x9e   :  { %771 = vmatpush1.bf16.msra.mxu1 %v2141_v57 }
  0x9f   :  { %772 = vmatprep.subr.bf16.mxu1 %v2243_v7 }
  0xa0   :  { %664 = vmatpush1.bf16.msra.mxu0 %v2142_v58 }
  0xa1   :  { %665 = vmatprep.subr.bf16.mxu0 %v2243_v7 }
  0xa2   :  { %773 = vmatpush1.bf16.msra.mxu1 %v2143_v59  ;;  %v2160_v59 = vld [vmem:[%s2843_s3 + $0xd8] sm:$0xff]  }
  0xa3   :  { %774 = vmatprep.subr.bf16.mxu1 %v2243_v7 }
  0xa4   :  { %666 = vmatpush1.bf16.msra.mxu0 %v2144_v60 }
  0xa5   :  { %667 = vmatprep.subr.bf16.mxu0 %v2243_v7 }
  0xa6   :  { %775 = vmatpush1.bf16.msra.mxu1 %v2145_v61 }
  0xa7   :  { %776 = vmatprep.subr.bf16.mxu1 %v2243_v7 }
  0xa8   :  { %668 = vmatpush1.bf16.msra.mxu0 %v2146_v6  ;;  %v2164_v6 = vld [vmem:[%s2843_s3 + $0xd0] sm:$0xff]  }
  0xa9   :  { %669 = vmatprep.subr.bf16.mxu0 %v2243_v7 }
  0xaa   :  { %777 = vmatpush1.bf16.msra.mxu1 %v2147_v8  ;;  %v2165_v8 = vld [vmem:[%s2843_s3 + $0x120] sm:$0xff]  }
  0xab   :  { %778 = vmatprep.subr.bf16.mxu1 %v2243_v7 }
  0xac   :  { %670 = vmatpush1.bf16.msra.mxu0 %v2148_v11  ;;  %v2169_v11 = vld [vmem:[%s2843_s3 + $0x118] sm:$0xff]  }
  0xad   :  { %671 = vmatprep.subr.bf16.mxu0 %v2243_v7 }
  0xae   :  { %779 = vmatpush1.bf16.msra.mxu1 %v2149_v12  ;;  %v2170_v12 = vld [vmem:[%s2843_s3 + $0xc0] sm:$0xff]  }
  0xaf   :  { %780 = vmatprep.subr.bf16.mxu1 %v2243_v7 }
  0xb0   :  { %672 = vmatpush1.bf16.msra.mxu0 %v2150_v21  ;;  %v2179_v21 = vld [vmem:[%s2843_s3 + $0xf0] sm:$0xff]  }
  0xb1   :  { %685 = vmatprep.subr.bf16.mxu0 %v2243_v7 }
  0xb2   :  { %781 = vmatpush1.bf16.msra.mxu1 %v2151_v22  ;;  %v2180_v22 = vld [vmem:[%s2843_s3 + $0xe8] sm:$0xff]  }
  0xb3   :  { %794 = vmatprep.subr.bf16.mxu1 %v2243_v7 }
  0xb4   :  { %686 = vmatpush2.bf16.msra.mxu0 %v2152_v30  ;;  %v2186_v30 = vld [vmem:[%s2845_s5 + $0x38] sm:$0xff]  }
  0xb5   :  { %687 = vmatprep.subr.bf16.mxu0 %v2243_v7 }
  0xb6   :  { %795 = vmatpush2.bf16.msra.mxu1 %v2153_v31  ;;  %v2187_v31 = vld [vmem:[%s2845_s5 + $0x98] sm:$0xff]  }
  0xb7   :  { %796 = vmatprep.subr.bf16.mxu1 %v2243_v7 }
  0xb8   :  { %688 = vmatpush2.bf16.msra.mxu0 %v2154_v36  ;;  %v2192_v36 = vld [vmem:[%s2845_s5 + $0x20] sm:$0xff]  }
  0xb9   :  { %903 = vmatprep.subr.bf16.mxu0 %v2243_v7 }
  0xba   :  { %797 = vmatpush2.bf16.msra.mxu1 %v2155_v37  ;;  %v2193_v37 = vld [vmem:[%s2845_s5 + $0x80] sm:$0xff]  }
  0xbb   :  { %1041 = vmatprep.subr.bf16.mxu1 %v2243_v7 }
 0x143   :  { %v211_v62 = vpop.f32.mrf.mxu0 }
 0x145   :  { %v2070_v63 = vpop.f32.mrf.mxu0  ;;  %v284_v0 = vpop.f32.mrf.mxu1 }
 0x146   :  { %v285_v9 = vadd.f32 %v284_v0, %v211_v62 }
 0x147   :  { %v214_v1 = vpop.f32.mrf.mxu0  ;;  %v2082_v2 = vpop.f32.mrf.mxu1 }
 0x148   :  { %v2161_v2 = vld [vmem:[%s2843_s3 + $0x128] sm:$0xff]  }
 0x149   :  { %v2071_v3 = vpop.f32.mrf.mxu0  ;;  %v287_v4 = vpop.f32.mrf.mxu1 }
 0x14a   :  { %v288_v17 = vadd.f32 %v287_v4, %v214_v1 }
 0x14b   :  { %v2083_v5 = vpop.f32.mrf.mxu1 }
 0x153   :  { %v375_v10 = vpop.f32.mrf.mxu0 }
 0x154   :  { %v382_v13 = vadd.f32 %v375_v10, %v285_v9  ;;  %v2168_v10 = vld [vmem:[%s2843_s3 + $0xc8] sm:$0xff]  }
 0x155   :  { %v2094_v14 = vpop.f32.mrf.mxu0  ;;  %v467_v15 = vpop.f32.mrf.mxu1 }
 0x156   :  { %v474_v18 = vadd.f32 %v467_v15, %v382_v13  ;;  %v2171_v13 = vld [vmem:[%s2843_s3 + $0x110] sm:$0xff]   ;;  %v2172_v14 = vld [vmem:[%s2843_s3 + $0xb8] sm:$0xff]   ;;  %v2173_v15 = vld [vmem:[%s2843_s3 + $0x108] sm:$0xff]  }
 0x157   :  { %v378_v19 = vpop.f32.mrf.mxu0  ;;  %v2106_v20 = vpop.f32.mrf.mxu1 }
 0x158   :  { %v483_v23 = vadd.f32 %v1781_v16, %v474_v18  ;;  %v383_v24 = vadd.f32 %v378_v19, %v288_v17  ;;  %v2175_v17 = vld [vmem:[%s2843_s3 + $0x100] sm:$0xff]   ;;  %v2176_v18 = vld [vmem:[%s2843_s3 + $0xa8] sm:$0xff]   ;;  %v2177_v19 = vld [vmem:[%s2843_s3 + $0xf8] sm:$0xff]  }
 0x159   :  { %v2095_v25 = vpop.f32.mrf.mxu0  ;;  %v470_v26 = vpop.f32.mrf.mxu1  ;;  %v2178_v20 = vld [vmem:[%s2843_s3 + $0xa0] sm:$0xff]  }
 0x15a   :  { %v485_v27 = vmax.f32 %v483_v23, 0.0  ;;  %v475_v28 = vadd.f32 %v470_v26, %v383_v24  ;;  %v2181_v23 = vld [vmem:[%s2843_s3 + $0x138] sm:$0xff]   ;;  %v2182_v24 = vld [vmem:[%s2843_s3 + $0xe0] sm:$0xff]   ;;  %v2183_v25 = vld [vmem:[%s2843_s3 + $0x130] sm:$0xff]  }
 0x15b   :  { %v2107_v29 = vpop.f32.mrf.mxu1 }
 0x15c   :  { %v2037_v32 = vpack.c.bf16 %v485_v27, %v485_v27  ;;  %v484_v33 = vadd.f32 %v1781_v16, %v475_v28  ;;  %v2174_v16 = vld [vmem:[%s2843_s3 + $0xb0] sm:$0xff]  }
 0x15e   :  { %v486_v34 = vmax.f32 %v484_v33, 0.0  ;;  %491 = vrot.lane.b32.xlu1 %v2037_v32, %s2246_s28  ;;  %v1783_v35 = vrot.slane %v2037_v32, 9  ;;  %v2188_v32 = vld [vmem:[%s2845_s5 + $0x30] sm:$0xff]  }
 0x15f   :  { %v2189_v33 = vld [vmem:[%s2845_s5 + $0x90] sm:$0xff]  }
 0x160   :  { %v2038_v38 = vpack.c.bf16 %v486_v34, %v486_v34  ;;  %507 = vrot.lane.b32.xlu0 %v1783_v35, %s2246_s28  ;;  %v2190_v34 = vld [vmem:[%s2845_s5 + $0x28] sm:$0xff]  }
 0x161   :  { %v2191_v35 = vld [vmem:[%s2845_s5 + $0x88] sm:$0xff]  }
 0x162   :  { %v530_v39 = vrot.slane %v2038_v38, 7  ;;  %v519_v40 = vrot.slane %v2038_v38, 6  ;;  %v2194_v38 = vld [vmem:[%s2845_s5 + $0x18] sm:$0xff]  }
 0x164   :  { %531 = vrot.lane.b32.xlu0 %v530_v39, %s2246_s28  ;;  %520 = vrot.lane.b32.xlu1 %v519_v40, %s2246_s28  ;;  %v537_v41 = vrot.slane %v530_v39, 4  ;;  %v2195_v39 = vld [vmem:[%s2845_s5 + $0x78] sm:$0xff]   ;;  %v2196_v40 = vld [vmem:[%s2845_s5 + $0x10] sm:$0xff]  }
 0x168   :  { %538 = vrot.lane.b32.xlu1 %v537_v41, %s2246_s28  ;;  %v2197_v41 = vld [vmem:[%s2845_s5 + $0x70] sm:$0xff]  }
 0x1d0   :  { %v492_v43 = vpop.permute.xlu1 %491 }
 0x1d1   :  { %v493_v44 = vrot.slane %v492_v43, 4 }
 0x1d2   :  { %v508_v45 = vpop.permute.xlu0 %507 }
 0x1d3   :  { %v495_v46 = vsel %vm494_vm12, %v493_v44, %v492_v43  ;;  %v509_v48 = vrot.slane %v508_v45, 4  ;;  %v2199_v43 = vld [vmem:[%s2845_s5 + $0x68] sm:$0xff]   ;;  %v2200_v44 = vld [vmem:[%s2845_s5] sm:$0xff]  }
 0x1d4   :  { %500 = vst.msk [vmem:[#allocation5] sm:$0x11] %vm2509_vm13, %v495_v46 }
 0x1d5   :  { %504 = vst.msk [vmem:[#allocation4] sm:$0x22] %vm503_vm1, %v495_v46  ;;  %v510_v49 = vsel %vm494_vm12, %v509_v48, %v508_v45  ;;  %v2201_v45 = vld [vmem:[%s2845_s5 + $0x60] sm:$0xff]   ;;  %v2202_v46 = vld [vmem:[%s2845_s5 + $0x58] sm:$0xff]  }
 0x1d6   :  { %512 = vst.msk [vmem:[#allocation5] sm:$0x22] %vm503_vm1, %v510_v49  ;;  %v532_v50 = vpop.permute.xlu0 %531  ;;  %v521_v51 = vpop.permute.xlu1 %520  ;;  %vm1116_vm1 = vcmask 1042690  }
 0x1d7   :  { %516 = vst.msk [vmem:[#allocation4] sm:$0x44] %vm2514_vm2, %v510_v49  ;;  %v533_v52 = vrot.slane %v532_v50, 4  ;;  %v522_v53 = vrot.slane %v521_v51, 4 }
 0x1d9   :  { %v534_v54 = vsel %vm494_vm12, %v533_v52, %v532_v50  ;;  %v523_v55 = vsel %vm494_vm12, %v522_v53, %v521_v51 }
 0x1da   :  { %536 = vst.msk [vmem:[#allocation5] sm:$0x88] %vm528_vm5, %v534_v54  ;;  %529 = vst.msk [vmem:[#allocation4] sm:$0x88] %vm528_vm5, %v523_v55  ;;  %v539_v56 = vpop.permute.xlu1 %538  ;;  %vm1249_vm5 = vcmask 523264  }
 0x1db   :  { %525 = vst.msk [vmem:[#allocation5] sm:$0x44] %vm2514_vm2, %v523_v55  ;;  %v540_v57 = vrot.slane %v539_v56, 4  ;;  %v2203_v55 = vld [vmem:[%s2845_s5 + $0xb8] sm:$0xff]   ;;  %vm1117_vm2 = vcmask 260102  }
 0x1dc   :  { %vm1118_vm4 = vmor %vm1117_vm2, %vm1116_vm1 }
 0x1dd   :  { %v541_v58 = vsel %vm494_vm12, %v540_v57, %v539_v56  ;;  %v2204_v57 = vld [vmem:[%s2845_s5 + $0x50] sm:$0xff]   ;;  %vm1101_vm12 = vcmask 1040640  }
 0x1de   :  { %543 = vst.msk [vmem:[#allocation4 + $0x8] sm:$0x11] %vm2509_vm13, %v541_v58  ;;  %vm1104_vm13 = vcmask 1041665   ;;  %vm1102_vm15 = vmor %vm47_vm0, %vm1101_vm12 }
 0x1df   :  { %vm1106_vm3 = vmor %vm1105_vm14, %vm1104_vm13 }
 0x1e1   :  { %v544_v61 = vld [vmem:[#allocation4] sm:$0xff] }
 0x1e2   :  { %v565_v60 = vld [vmem:[#allocation5] sm:$0xff]  ;;  %v1819_v63 = vcombine.high %v544_v61, %v544_v61  ;;  %v1818_v1 = vcombine.low %v544_v61, %v544_v61  ;;  %v2205_v61 = vld [vmem:[%s2845_s5 + $0xb0] sm:$0xff]  }
 0x1e3   :  { %v1806_v62 = vcombine.high %v565_v60, %v565_v60  ;;  %v1805_v0 = vcombine.low %v565_v60, %v565_v60  ;;  %v2162_v3 = vld [vmem:[#allocation5 + $0x4] ss:$8 sps:$4 sm:$0x1e]   ;;  %v2185_v27 = vld [vmem:[#allocation5] ss:$8 sps:$4 sm:$0x1e]  }
 0x1e4   :  { %1830 = vmatprep.mubr.msk.bf16.mxu1 %vm653_vm6, %v1819_v63  ;;  %v976_v4 = vrot.slane %v2162_v3, 1  ;;  %v975_v29 = vrot.slane %v2185_v27, 1  ;;  %v2207_v3 = vld [vmem:[%s2845_s5 + $0xa8] sm:$0xff]  }
 0x1e5   :  { %1817 = vmatprep.mubr.msk.bf16.mxu0 %vm653_vm6, %v1806_v62  ;;  %799 = vmatmul.mubr.bf16.vlgmr.msra.gmra.mxu1 %v1818_v1  ;;  %v2166_v5 = vld [vmem:[#allocation4 + $0x4] ss:$8 sps:$4 sm:$0x1e]   ;;  %v2184_v26 = vld [vmem:[#allocation4] ss:$8 sps:$4 sm:$0x1e]  }
 0x1e6   :  { %690 = vmatmul.mubr.bf16.vlgmr.msra.gmra.mxu0 %v1805_v0  ;;  %1042 = vmatpush1.bf16.msra.mxu1 %v2161_v2  ;;  %v838_v9 = vrot.slane %v2166_v5, 1  ;;  %v837_v28 = vrot.slane %v2184_v26, 1  ;;  %v1897_v62 = vld [vmem:[%s2846_s4] ss:$0 sm:$0xff]  ;;  %v2206_v2 = vld [vmem:[%s2845_s5 + $0x48] sm:$0xff]  }
 0x1e7   :  { %904 = vmatpush1.bf16.msra.mxu0 %v2160_v59  ;;  %1896 = vmatprep.mubr.msk.bf16.mxu1 %vm653_vm6, %v976_v4 }
 0x1e8   :  { %905 = vmatprep.subr.bf16.mxu0 %v2243_v7  ;;  %1043 = vmatprep.subr.bf16.mxu1 %v2243_v7 }
 0x1e9   :  { %1863 = vmatprep.mubr.msk.bf16.mxu0 %vm653_vm6, %v838_v9 }
 0x1ea   :  { %1044 = vmatpush1.bf16.msra.mxu1 %v2165_v8  ;;  %v2208_v8 = vld [vmem:[%s2845_s5 + $0x40] sm:$0xff]  }
 0x1eb   :  { %906 = vmatpush1.bf16.msra.mxu0 %v2164_v6  ;;  %1045 = vmatprep.subr.bf16.mxu1 %v2243_v7 }
 0x1ec   :  { %907 = vmatprep.subr.bf16.mxu0 %v2243_v7 }
 0x1ee   :  { %1046 = vmatpush1.bf16.msra.mxu1 %v2169_v11 }
 0x1ef   :  { %908 = vmatpush1.bf16.msra.mxu0 %v2168_v10  ;;  %1047 = vmatprep.subr.bf16.mxu1 %v2243_v7 }
 0x1f0   :  { %909 = vmatprep.subr.bf16.mxu0 %v2243_v7 }
 0x1f2   :  { %1048 = vmatpush1.bf16.msra.mxu1 %v2171_v13 }
 0x1f3   :  { %910 = vmatpush1.bf16.msra.mxu0 %v2170_v12  ;;  %1049 = vmatprep.subr.bf16.mxu1 %v2243_v7  ;;  %v2209_v12 = vld [vmem:[%s2845_s5 + $0xa0] sm:$0xff]  }
 0x1f4   :  { %911 = vmatprep.subr.bf16.mxu0 %v2243_v7 }
 0x1f6   :  { %1050 = vmatpush1.bf16.msra.mxu1 %v2173_v15 }
 0x1f7   :  { %912 = vmatpush1.bf16.msra.mxu0 %v2172_v14  ;;  %1051 = vmatprep.subr.bf16.mxu1 %v2243_v7 }
 0x1f8   :  { %913 = vmatprep.subr.bf16.mxu0 %v2243_v7 }
 0x1fa   :  { %1052 = vmatpush1.bf16.msra.mxu1 %v2175_v17 }
 0x1fb   :  { %914 = vmatpush1.bf16.msra.mxu0 %v2174_v16  ;;  %1053 = vmatprep.subr.bf16.mxu1 %v2243_v7 }
 0x1fc   :  { %915 = vmatprep.subr.bf16.mxu0 %v2243_v7 }
 0x1fe   :  { %1054 = vmatpush1.bf16.msra.mxu1 %v2177_v19 }
 0x1ff   :  { %916 = vmatpush1.bf16.msra.mxu0 %v2176_v18  ;;  %1055 = vmatprep.subr.bf16.mxu1 %v2243_v7 }
 0x200   :  { %917 = vmatprep.subr.bf16.mxu0 %v2243_v7 }
 0x202   :  { %1056 = vmatpush1.bf16.msra.mxu1 %v2179_v21 }
 0x203   :  { %918 = vmatpush1.bf16.msra.mxu0 %v2178_v20  ;;  %1069 = vmatprep.subr.bf16.mxu1 %v2243_v7 }
 0x204   :  { %931 = vmatprep.subr.bf16.mxu0 %v2243_v7 }
 0x206   :  { %1070 = vmatpush2.bf16.msra.mxu1 %v2181_v23 }
 0x207   :  { %932 = vmatpush2.bf16.msra.mxu0 %v2180_v22  ;;  %1071 = vmatprep.subr.bf16.mxu1 %v2243_v7 }
 0x208   :  { %933 = vmatprep.subr.bf16.mxu0 %v2243_v7 }
 0x20a   :  { %1072 = vmatpush2.bf16.msra.mxu1 %v2183_v25 }
 0x20b   :  { %934 = vmatpush2.bf16.msra.mxu0 %v2182_v24  ;;  %1374 = vmatprep.subr.bf16.mxu1 %v2243_v7  ;;  %v2212_v24 = vld [vmem:[%s2845_s5 + $0x158] sm:$0xff]  }
 0x20c   :  { %1253 = vmatprep.subr.bf16.mxu0 %v2243_v7 }
 0x20d   :  { %1074 = vmatmul.mubr.bf16.vlgmr.msra.gmra.mxu1 %v975_v29 }
 0x20e   :  { %936 = vmatmul.mubr.bf16.vlgmr.msra.gmra.mxu0 %v837_v28  ;;  %1375 = vmatpush1.bf16.msra.mxu1 %v2186_v30  ;;  %v2215_v30 = vld [vmem:[%s2845_s5 + $0xf8] sm:$0xff]  }
 0x20f   :  { %1254 = vmatpush1.bf16.msra.mxu0 %v2187_v31  ;;  %1376 = vmatprep.subr.bf16.mxu1 %v2243_v7 }
 0x210   :  { %1255 = vmatprep.subr.bf16.mxu0 %v2243_v7 }
 0x212   :  { %1377 = vmatpush1.bf16.msra.mxu1 %v2188_v32 }
 0x213   :  { %1256 = vmatpush1.bf16.msra.mxu0 %v2189_v33  ;;  %1378 = vmatprep.subr.bf16.mxu1 %v2243_v7 }
 0x214   :  { %1257 = vmatprep.subr.bf16.mxu0 %v2243_v7 }
 0x216   :  { %1379 = vmatpush1.bf16.msra.mxu1 %v2190_v34 }
 0x217   :  { %1258 = vmatpush1.bf16.msra.mxu0 %v2191_v35  ;;  %1380 = vmatprep.subr.bf16.mxu1 %v2243_v7  ;;  %v2218_v35 = vld [vmem:[%s2845_s5 + $0x150] sm:$0xff]  }
 0x218   :  { %1259 = vmatprep.subr.bf16.mxu0 %v2243_v7 }
 0x21a   :  { %1381 = vmatpush1.bf16.msra.mxu1 %v2192_v36  ;;  %v2219_v36 = vld [vmem:[%s2845_s5 + $0xf0] sm:$0xff]  }
 0x21b   :  { %1260 = vmatpush1.bf16.msra.mxu0 %v2193_v37  ;;  %1382 = vmatprep.subr.bf16.mxu1 %v2243_v7  ;;  %v2220_v37 = vld [vmem:[%s2845_s5 + $0x148] sm:$0xff]  }
 0x21c   :  { %1261 = vmatprep.subr.bf16.mxu0 %v2243_v7 }
 0x21e   :  { %1383 = vmatpush1.bf16.msra.mxu1 %v2194_v38  ;;  %v2221_v38 = vld [vmem:[%s2845_s5 + $0xe8] sm:$0xff]  }
 0x21f   :  { %1262 = vmatpush1.bf16.msra.mxu0 %v2195_v39  ;;  %1384 = vmatprep.subr.bf16.mxu1 %v2243_v7  ;;  %v2222_v39 = vld [vmem:[%s2845_s5 + $0x140] sm:$0xff]  }
 0x220   :  { %1263 = vmatprep.subr.bf16.mxu0 %v2243_v7 }
 0x222   :  { %1385 = vmatpush1.bf16.msra.mxu1 %v2196_v40  ;;  %v2223_v40 = vld [vmem:[%s2845_s5 + $0xe0] sm:$0xff]  }
 0x223   :  { %1264 = vmatpush1.bf16.msra.mxu0 %v2197_v41  ;;  %1386 = vmatprep.subr.bf16.mxu1 %v2243_v7  ;;  %v2224_v41 = vld [vmem:[%s2845_s5 + $0x138] sm:$0xff]  }
 0x224   :  { %1265 = vmatprep.subr.bf16.mxu0 %v2243_v7 }
 0x226   :  { %1387 = vmatpush1.bf16.msra.mxu1 %v2198_v42  ;;  %v2225_v42 = vld [vmem:[%s2845_s5 + $0xd8] sm:$0xff]  }
 0x227   :  { %1266 = vmatpush1.bf16.msra.mxu0 %v2199_v43  ;;  %1388 = vmatprep.subr.bf16.mxu1 %v2243_v7  ;;  %v2226_v43 = vld [vmem:[%s2845_s5 + $0x130] sm:$0xff]  }
 0x228   :  { %1267 = vmatprep.subr.bf16.mxu0 %v2243_v7 }
 0x22a   :  { %1389 = vmatpush1.bf16.msra.mxu1 %v2200_v44  ;;  %v2227_v44 = vld [vmem:[%s2845_s5 + $0xd0] sm:$0xff]  }
 0x22b   :  { %1268 = vmatpush1.bf16.msra.mxu0 %v2201_v45  ;;  %1398 = vmatprep.subr.bf16.mxu1 %v2243_v7  ;;  %v2228_v45 = vld [vmem:[%s2845_s5 + $0x128] sm:$0xff]  }
 0x22c   :  { %1277 = vmatprep.subr.bf16.mxu0 %v2243_v7 }
 0x22e   :  { %1399 = vmatpush2.bf16.msra.mxu1 %v2202_v46  ;;  %v2229_v46 = vld [vmem:[%s2845_s5 + $0xc8] sm:$0xff]  }
 0x22f   :  { %1400 = vmatprep.subr.bf16.mxu1 %v2243_v7  ;;  %1278 = vmatpush2.bf16.msra.mxu0 %v2203_v55  ;;  %v2238_v55 = vld [vmem:[%s2845_s5 + $0x160] sm:$0xff]  }
 0x230   :  { %1279 = vmatprep.subr.bf16.mxu0 %v2243_v7 }
 0x232   :  { %1401 = vmatpush2.bf16.msra.mxu1 %v2204_v57  ;;  %v2239_v57 = vld [vmem:[%s2845_s5 + $0x100] sm:$0xff]  }
 0x233   :  { %1402 = vmatprep.subr.bf16.mxu1 %v2243_v7  ;;  %1280 = vmatpush2.bf16.msra.mxu0 %v2205_v61 }
 0x234   :  { %1281 = vmatprep.subr.bf16.mxu0 %v2243_v7 }
 0x236   :  { %1403 = vmatpush2.bf16.msra.mxu1 %v2206_v2 }
 0x237   :  { %1404 = vmatprep.subr.bf16.mxu1 %v2243_v7  ;;  %1282 = vmatpush2.bf16.msra.mxu0 %v2207_v3 }
 0x238   :  { %1283 = vmatprep.subr.bf16.mxu0 %v2243_v7 }
 0x23a   :  { %1405 = vmatpush2.bf16.msra.mxu1 %v2208_v8 }
 0x23b   :  { %1673 = vmatprep.subr.bf16.mxu1 %v2243_v7  ;;  %1284 = vmatpush2.bf16.msra.mxu0 %v2209_v12 }
 0x23c   :  { %1523 = vmatprep.subr.bf16.mxu0 %v2243_v7 }
 0x2a5   :  { %v800_v48 = vpop.f32.mrf.mxu1 }
 0x2a6   :  { %v691_v47 = vpop.f32.mrf.mxu0 }
 0x2a7   :  { %v802_v50 = vpop.f32.mrf.mxu1  ;;  %v801_v56 = vadd.f32 %v800_v48, %v691_v47  ;;  %v2230_v47 = vld [vmem:[%s2845_s5 + $0x120] sm:$0xff]  }
 0x2a8   :  { %v693_v49 = vpop.f32.mrf.mxu0  ;;  %v2231_v48 = vld [vmem:[%s2845_s5 + $0xc0] sm:$0xff]   ;;  %v2233_v50 = vld [vmem:[%s2845_s5 + $0x118] sm:$0xff]  }
 0x2a9   :  { %v803_v52 = vpop.f32.mrf.mxu1  ;;  %v2232_v49 = vld [vmem:[%s2845_s5 + $0x178] sm:$0xff]  }
 0x2aa   :  { %v694_v51 = vpop.f32.mrf.mxu0  ;;  %v2235_v52 = vld [vmem:[%s2845_s5 + $0x110] sm:$0xff]  }
 0x2ab   :  { %v804_v54 = vpop.f32.mrf.mxu1  ;;  %v2234_v51 = vld [vmem:[%s2845_s5 + $0x170] sm:$0xff]  }
 0x2ac   :  { %v695_v53 = vpop.f32.mrf.mxu0  ;;  %v2237_v54 = vld [vmem:[%s2845_s5 + $0x108] sm:$0xff]  }
 0x2ad   :  { %v2236_v53 = vld [vmem:[%s2845_s5 + $0x168] sm:$0xff]  }
 0x2cd   :  { %v1075_v59 = vpop.f32.mrf.mxu1 }
 0x2ce   :  { %v937_v58 = vpop.f32.mrf.mxu0 }
 0x2cf   :  { %v943_v60 = vadd.f32 %v937_v58, %v801_v56  ;;  %v1077_v0 = vpop.f32.mrf.mxu1 }
 0x2d0   :  { %v939_v63 = vpop.f32.mrf.mxu0 }
 0x2d1   :  { %v1081_v1 = vadd.f32 %v1075_v59, %v943_v60  ;;  %v1078_v5 = vpop.f32.mrf.mxu1 }
 0x2d2   :  { %v940_v4 = vpop.f32.mrf.mxu0 }
 0x2d3   :  { %v1089_v6 = vadd.f32 %v1897_v62, %v1081_v1  ;;  %v1079_v10 = vpop.f32.mrf.mxu1 }
 0x2d4   :  { %v941_v9 = vpop.f32.mrf.mxu0  ;;  %v2032_v10 = vld [vmem:[%s2847_s6] ss:$0 sm:$0xff] }
 0x2d5   :  { %v1090_v11 = vmax.f32 %v1089_v6, 0.0 }
 0x2d7   :  { %v2039_v13 = vpack.c.bf16 %v1090_v11, %v1090_v11 }
 0x2d9   :  { %1095 = vrot.lane.b32.xlu0 %v2039_v13, %s2247_s17  ;;  %v1899_v14 = vrot.slane %v2039_v13, 9 }
 0x2db   :  { %1110 = vrot.lane.b32.xlu1 %v1899_v14, %s2247_s17 }
 0x34b   :  { %v1096_v15 = vpop.permute.xlu0 %1095 }
 0x34c   :  { %v1097_v16 = vrot.slane %v1096_v15, 4 }
 0x34d   :  { %v1111_v17 = vpop.permute.xlu1 %1110 }
 0x34e   :  { %v1099_v18 = vsel %vm653_vm6, %v1097_v16, %v1096_v15  ;;  %v1112_v19 = vrot.slane %v1111_v17, 4 }
 0x34f   :  { %1103 = vst.msk [vmem:[#allocation7] sm:$0x11] %vm1102_vm15, %v1099_v18 }
 0x350   :  { %1107 = vst.msk [vmem:[#allocation6] sm:$0x22] %vm1106_vm3, %v1099_v18  ;;  %v1113_v20 = vsel %vm653_vm6, %v1112_v19, %v1111_v17 }
 0x351   :  { %1115 = vst.msk [vmem:[#allocation7] sm:$0x22] %vm1106_vm3, %v1113_v20 }
 0x352   :  { %1119 = vst.msk [vmem:[#allocation6] sm:$0x44] %vm1118_vm4, %v1113_v20 }
 0x357   :  { %v1120_v21 = vld [vmem:[#allocation6] sm:$0x33] }
 0x358   :  { %v1940_v22 = vcombine.high %v1120_v21, %v1120_v21  ;;  %v1939_v23 = vcombine.low %v1120_v21, %v1120_v21  ;;  %v1145_v25 = vld [vmem:[#allocation7] sm:$0x33] }
 0x359   :  { %v2728_v26 = vld [vmem:[#allocation6] sm:$0x66]  ;;  %v2730_v27 = vld [vmem:[#allocation7] sm:$0x66]  ;;  %v1925_v28 = vcombine.high %v1145_v25, %v1145_v25  ;;  %v1924_v29 = vcombine.low %v1145_v25, %v1145_v25 }
 0x35a   :  { %1953 = vmatprep.mubr.msk.bf16.mxu1 %vm1249_vm5, %v1940_v22  ;;  %v1979_v31 = vcombine.high %v2728_v26, %v2728_v26  ;;  %v2018_v32 = vcombine.high %v2730_v27, %v2730_v27  ;;  %v2017_v56 = vcombine.low %v2730_v27, %v2730_v27  ;;  %v1978_v58 = vcombine.low %v2728_v26, %v2728_v26 }
 0x35b   :  { %1407 = vmatmul.mubr.bf16.vlgmr.msra.gmra.mxu1 %v1939_v23  ;;  %1938 = vmatprep.mubr.msk.bf16.mxu0 %vm1249_vm5, %v1925_v28 }
 0x35c   :  { %1674 = vmatpush1.bf16.msra.mxu1 %v2212_v24  ;;  %v1446_v33 = vrot.slane %v1979_v31, 1  ;;  %v1596_v34 = vrot.slane %v2018_v32, 1  ;;  %1286 = vmatmul.mubr.bf16.vlgmr.msra.gmra.mxu0 %v1924_v29  ;;  %v1595_v59 = vrot.slane %v2017_v56, 1  ;;  %v1445_v60 = vrot.slane %v1978_v58, 1 }
 0x35d   :  { %1675 = vmatprep.subr.bf16.mxu1 %v2243_v7  ;;  %1524 = vmatpush1.bf16.msra.mxu0 %v2215_v30 }
 0x35e   :  { %1992 = vmatprep.mubr.msk.bf16.mxu0 %vm1249_vm5, %v1446_v33  ;;  %2031 = vmatprep.mubr.msk.bf16.mxu1 %vm1249_vm5, %v1596_v34 }
 0x35f   :  { %1525 = vmatprep.subr.bf16.mxu0 %v2243_v7 }
 0x360   :  { %1676 = vmatpush1.bf16.msra.mxu1 %v2218_v35 }
 0x361   :  { %1677 = vmatprep.subr.bf16.mxu1 %v2243_v7  ;;  %1526 = vmatpush1.bf16.msra.mxu0 %v2219_v36 }
 0x362   :  { %1527 = vmatprep.subr.bf16.mxu0 %v2243_v7 }
 0x364   :  { %1678 = vmatpush1.bf16.msra.mxu1 %v2220_v37 }
 0x365   :  { %1679 = vmatprep.subr.bf16.mxu1 %v2243_v7  ;;  %1528 = vmatpush1.bf16.msra.mxu0 %v2221_v38 }
 0x366   :  { %1529 = vmatprep.subr.bf16.mxu0 %v2243_v7 }
 0x368   :  { %1680 = vmatpush1.bf16.msra.mxu1 %v2222_v39 }
 0x369   :  { %1681 = vmatprep.subr.bf16.mxu1 %v2243_v7  ;;  %1530 = vmatpush1.bf16.msra.mxu0 %v2223_v40 }
 0x36a   :  { %1531 = vmatprep.subr.bf16.mxu0 %v2243_v7 }
 0x36c   :  { %1682 = vmatpush1.bf16.msra.mxu1 %v2224_v41 }
 0x36d   :  { %1683 = vmatprep.subr.bf16.mxu1 %v2243_v7  ;;  %1532 = vmatpush1.bf16.msra.mxu0 %v2225_v42 }
 0x36e   :  { %1533 = vmatprep.subr.bf16.mxu0 %v2243_v7 }
 0x370   :  { %1684 = vmatpush1.bf16.msra.mxu1 %v2226_v43 }
 0x371   :  { %1685 = vmatprep.subr.bf16.mxu1 %v2243_v7  ;;  %1534 = vmatpush1.bf16.msra.mxu0 %v2227_v44 }
 0x372   :  { %1535 = vmatprep.subr.bf16.mxu0 %v2243_v7 }
 0x374   :  { %1686 = vmatpush1.bf16.msra.mxu1 %v2228_v45 }
 0x375   :  { %1687 = vmatprep.subr.bf16.mxu1 %v2243_v7  ;;  %1536 = vmatpush1.bf16.msra.mxu0 %v2229_v46 }
 0x376   :  { %1537 = vmatprep.subr.bf16.mxu0 %v2243_v7 }
 0x378   :  { %1688 = vmatpush1.bf16.msra.mxu1 %v2230_v47 }
 0x379   :  { %1697 = vmatprep.subr.bf16.mxu1 %v2243_v7  ;;  %1538 = vmatpush1.bf16.msra.mxu0 %v2231_v48 }
 0x37a   :  { %1547 = vmatprep.subr.bf16.mxu0 %v2243_v7 }
 0x37c   :  { %1698 = vmatpush2.bf16.msra.mxu1 %v2232_v49 }
 0x37d   :  { %1699 = vmatprep.subr.bf16.mxu1 %v2243_v7  ;;  %1548 = vmatpush2.bf16.msra.mxu0 %v2233_v50 }
 0x37e   :  { %1549 = vmatprep.subr.bf16.mxu0 %v2243_v7 }
 0x380   :  { %1700 = vmatpush2.bf16.msra.mxu1 %v2234_v51 }
 0x381   :  { %1701 = vmatprep.subr.bf16.mxu1 %v2243_v7  ;;  %1550 = vmatpush2.bf16.msra.mxu0 %v2235_v52 }
 0x382   :  { %1551 = vmatprep.subr.bf16.mxu0 %v2243_v7 }
 0x384   :  { %1702 = vmatpush2.bf16.msra.mxu1 %v2236_v53 }
 0x385   :  { %1703 = vmatprep.subr.bf16.mxu1 %v2243_v7  ;;  %1552 = vmatpush2.bf16.msra.mxu0 %v2237_v54 }
 0x386   :  { %1553 = vmatprep.subr.bf16.mxu0 %v2243_v7 }
 0x388   :  { %1704 = vmatpush2.bf16.msra.mxu1 %v2238_v55 }
 0x389   :  { %1554 = vmatpush2.bf16.msra.mxu0 %v2239_v57 }
 0x38b   :  { %1706 = vmatmul.mubr.bf16.vlgmr.msra.gmra.mxu1 %v1595_v59 }
 0x38c   :  { %1556 = vmatmul.mubr.bf16.vlgmr.msra.gmra.mxu0 %v1445_v60 }
 0x41b   :  { %v1408_v61 = vpop.f32.mrf.mxu1 }
 0x41c   :  { %v1287_v62 = vpop.f32.mrf.mxu0 }
 0x41d   :  { %v1410_v63 = vpop.f32.mrf.mxu1  ;;  %v1409_v6 = vadd.f32 %v1408_v61, %v1287_v62 }
 0x41e   :  { %v1289_v0 = vpop.f32.mrf.mxu0 }
 0x41f   :  { %v1411_v1 = vpop.f32.mrf.mxu1 }
 0x420   :  { %v1290_v2 = vpop.f32.mrf.mxu0 }
 0x421   :  { %v1412_v3 = vpop.f32.mrf.mxu1 }
 0x422   :  { %v1291_v4 = vpop.f32.mrf.mxu0 }
 0x44b   :  { %v1707_v5 = vpop.f32.mrf.mxu1 }
 0x44c   :  { %v1557_v7 = vpop.f32.mrf.mxu0 }
 0x44d   :  { %v1709_v8 = vpop.f32.mrf.mxu1  ;;  %v1563_v9 = vadd.f32 %v1557_v7, %v1409_v6 }
 0x44e   :  { %v1559_v11 = vpop.f32.mrf.mxu0 }
 0x44f   :  { %v1710_v12 = vpop.f32.mrf.mxu1  ;;  %v1713_v13 = vadd.f32 %v1707_v5, %v1563_v9 }
 0x450   :  { %v1560_v14 = vpop.f32.mrf.mxu0 }
 0x451   :  { %v1711_v15 = vpop.f32.mrf.mxu1  ;;  %v1721_v16 = vadd.f32 %v2032_v10, %v1713_v13 }
 0x452   :  { %v1561_v17 = vpop.f32.mrf.mxu0 }
 0x453   :  { %v1722_v18 = vmax.f32 %v1721_v16, 0.0 }
 0x455   :  { %1723 = vst [vmem:[%s2848_s7] sm:$0xf] %v1722_v18 }

</bundles_post_ra>
